<compile_context>
chip_gen: v5e
topology: v5e:2x2
jax: 0.10.0
libtpu: 0.0.40
codegen_flags: <defaults>
</compile_context>

<pallas_src>
import functools

import jax
import jax.numpy as jnp
from jax.experimental import pallas as pl
from jax.experimental.pallas import tpu as pltpu


def _round_up(x, m):
    return ((x + m - 1) // m) * m


# ----------------------------- fused Pallas kernel ---------------------------------

def _fused_gemm_kernel(*refs, use_in, use_relu, use_tanh, has_skip, has_phase, eps):
    """out = cols @ w + b, then optional InstanceNorm / ReLU / +skip / tanh.

    Per grid step (= one image):
      cols  : (M, Kp)  bf16   (M = Ho*Wo of this layer, Kp % 128 == 0)
      w     : (Kp, Np) bf16   (Np % 128 == 0, zero-padded output channels)
      b     : (1, Np)  f32
      phase : (Np, Np) f32    optional -- averages IN stats over phase groups (ConvT)
      skip  : (M, Np)  f32    optional residual input (already channel-padded)
      out   : (M, Np)  f32
    """
    it = iter(refs)
    x_ref = next(it)
    w_ref = next(it)
    b_ref = next(it)
    p_ref = next(it) if has_phase else None
    s_ref = next(it) if has_skip else None
    o_ref = next(it)

    acc = jnp.dot(x_ref[...], w_ref[...], preferred_element_type=jnp.float32)
    acc = acc + b_ref[...]

    if use_in:
        # InstanceNorm(affine=False, eps=1e-5): per-channel stats over this image's
        # rows (and phase groups, if any).  Zero-padded channels stay exactly zero.
        mu = jnp.mean(acc, axis=0, keepdims=True)                   # (1, Np)
        if has_phase:
            mu = jnp.dot(mu, p_ref[...], preferred_element_type=jnp.float32)
        xc = acc - mu
        var = jnp.mean(xc * xc, axis=0, keepdims=True)              # biased variance
        if has_phase:
            var = jnp.dot(var, p_ref[...], preferred_element_type=jnp.float32)
        acc = xc * jax.lax.rsqrt(var + eps)
    if use_relu:
        acc = jnp.maximum(acc, 0.0)
    if has_skip:
        acc = acc + s_ref[...]
    if use_tanh:
        acc = jnp.tanh(acc)
    o_ref[...] = acc.astype(o_ref.dtype)


def fused_gemm(cols, wmat, bias, *, rows_per_image, use_in=False, use_relu=False,
               use_tanh=False, skip=None, phase=None):
    """(G*M, K) @ (K, Nout) + bias with a fused epilogue; grid over the G images."""
    Mtot, K = cols.shape
    Kw, Nout = wmat.shape
    assert Kw == K
    M = rows_per_image
    assert Mtot % M == 0
    G = Mtot // M
    assert G == 1 or M % 8 == 0, "per-image row count must be a multiple of 8"

    Kp = _round_up(K, 128)
    Np = _round_up(Nout, 128)
    if phase is not None:
        assert Nout == Np, "phase-grouped GEMM must come pre-padded to 128 lanes"

    # bf16 MXU operands, f32 accumulation + f32 epilogue (fine on v5e/v6e/v7x).
    colsp = jnp.pad(cols, ((0, 0), (0, Kp - K))).astype(jnp.bfloat16)
    wp = jnp.pad(wmat, ((0, Kp - K), (0, Np - Nout))).astype(jnp.bfloat16)
    bp = jnp.pad(bias, (0, Np - Nout)).astype(jnp.float32).reshape(1, Np)

    in_arrays = [colsp, wp, bp]
    in_specs = [
        pl.BlockSpec((M, Kp), lambda g: (g, 0)),
        pl.BlockSpec((Kp, Np), lambda g: (0, 0)),
        pl.BlockSpec((1, Np), lambda g: (0, 0)),
    ]
    if phase is not None:
        in_arrays.append(phase.astype(jnp.float32))
        in_specs.append(pl.BlockSpec((Np, Np), lambda g: (0, 0)))
    if skip is not None:
        skp = jnp.pad(skip, ((0, 0), (0, Np - skip.shape[1]))).astype(jnp.float32)
        in_arrays.append(skp)
        in_specs.append(pl.BlockSpec((M, Np), lambda g: (g, 0)))

    kernel = functools.partial(
        _fused_gemm_kernel, use_in=use_in, use_relu=use_relu, use_tanh=use_tanh,
        has_skip=skip is not None, has_phase=phase is not None, eps=1e-5)

    out = pl.pallas_call(
        kernel,
        out_shape=jax.ShapeDtypeStruct((Mtot, Np), jnp.float32),
        grid=(G,),
        in_specs=in_specs,
        out_specs=pl.BlockSpec((M, Np), lambda g: (g, 0)),
        # batch axis >= 2 keeps both v7x TensorCores busy; harmless on v5e/v6e.
        compiler_params=pltpu.CompilerParams(dimension_semantics=("parallel",)),
    )(*in_arrays)
    return out[:, :Nout]


# --------------------------- convolution glue (plain JAX) ---------------------------

def _extract_patches(xp, kh, kw, stride, Ho, Wo):
    # xp: (N, Hp, Wp, C) padded input -> (N*Ho*Wo, kh*kw*C), tap-major, channel-minor.
    taps = []
    for i in range(kh):
        for j in range(kw):
            taps.append(xp[:, i:i + stride * Ho:stride, j:j + stride * Wo:stride, :])
    p = jnp.stack(taps, axis=3)                       # (N, Ho, Wo, kh*kw, C)
    N, _, _, T, C = p.shape
    return p.reshape(N * Ho * Wo, T * C)


def conv2d_fused(x, w_oihw, b, *, stride, pad, use_in, use_relu,
                 use_tanh=False, skip=None):
    """Conv2d (reflect pad) + optional fused InstanceNorm / ReLU / residual / tanh."""
    N, H, W, Cin = x.shape
    Cout, _, kh, kw = w_oihw.shape
    xp = jnp.pad(x, ((0, 0), (pad, pad), (pad, pad), (0, 0)), mode="reflect") if pad else x
    Ho = (H + 2 * pad - kh) // stride + 1
    Wo = (W + 2 * pad - kw) // stride + 1
    cols = _extract_patches(xp, kh, kw, stride, Ho, Wo)            # (N*Ho*Wo, kh*kw*Cin)
    wmat = jnp.transpose(w_oihw, (2, 3, 1, 0)).reshape(kh * kw * Cin, Cout)
    skip2 = skip.reshape(N * Ho * Wo, Cout) if skip is not None else None
    y = fused_gemm(cols, wmat, b, rows_per_image=Ho * Wo,
                   use_in=use_in, use_relu=use_relu, use_tanh=use_tanh, skip=skip2)
    return y.reshape(N, Ho, Wo, Cout)


def conv_transpose2d_fused(x, w_iokk, b, *, use_relu=True):
    """ConvTranspose2d(k=3, s=2, p=1, output_padding=1) + fused InstanceNorm + ReLU.

    Sub-pixel (phase) decomposition: one 2x2-tap stride-1 GEMM producing 4*Cout phase
    channels, then depth-to-space -- no zero-dilated input, no wasted MXU FLOPs.
    """
    N, H, W, Cin = x.shape
    _, Cout, kh, kw = w_iokk.shape                                 # PyTorch: (Cin, Cout, 3, 3)
    assert kh == 3 and kw == 3
    Cp = _round_up(Cout, 32)                                       # per-phase lane pad
    Np = 4 * Cp                                                    # multiple of 128

    # out[2m+a, 2n+b, co] = bias[co] + sum_{di,dj in {0,1}} x_pad[m+di, n+dj, ci]
    #                                   * w[ci, co, a+1-2*di, b+1-2*dj]   (valid taps only)
    xp = jnp.pad(x, ((0, 0), (0, 1), (0, 1), (0, 0)))              # bottom/right zero pad
    cols = _extract_patches(xp, 2, 2, 1, H, W)                     # (N*H*W, 4*Cin)

    tap_rows = []
    for di in (0, 1):
        for dj in (0, 1):
            phase_cols = []
            for a in (0, 1):
                for bb in (0, 1):
                    ki, kj = a + 1 - 2 * di, bb + 1 - 2 * dj
                    if 0 <= ki < kh and 0 <= kj < kw:
                        blk = w_iokk[:, :, ki, kj]                 # (Cin, Cout)
                    else:
                        blk = jnp.zeros((Cin, Cout), w_iokk.dtype)
                    phase_cols.append(jnp.pad(blk, ((0, 0), (0, Cp - Cout))))
            tap_rows.append(jnp.concatenate(phase_cols, axis=1))   # (Cin, 4*Cp)
    wmat = jnp.concatenate(tap_rows, axis=0)                       # (4*Cin, 4*Cp)
    bias = jnp.tile(jnp.pad(b, (0, Cp - Cout)), 4)                 # (4*Cp,)

    # Phase-averaging matrix: IN stats for channel c pool its 4 phase columns.
    lane = jnp.arange(Np)
    phase_avg = (lane[:, None] % Cp == lane[None, :] % Cp).astype(jnp.float32) * 0.25

    y = fused_gemm(cols, wmat, bias, rows_per_image=H * W,
                   use_in=True, use_relu=use_relu, phase=phase_avg)  # (N*H*W, 4*Cp)

    # depth-to-space: (N, H, W, phase(a,b), Cout) -> (N, 2H, 2W, Cout)
    y = y.reshape(N, H, W, 4, Cp)[..., :Cout].reshape(N, H, W, 2, 2, Cout)
    y = jnp.transpose(y, (0, 1, 3, 2, 4, 5)).reshape(N, 2 * H, 2 * W, Cout)
    return y


# ------------------------------- Generator model ------------------------------------

def init_generator_params(key, img_channels=3, n_features=8, n_res=2, scale=0.05):
    def conv_p(k, cout, cin, ksz):
        k1, k2 = jax.random.split(k)
        return {"w": scale * jax.random.normal(k1, (cout, cin, ksz, ksz), jnp.float32),
                "b": scale * jax.random.normal(k2, (cout,), jnp.float32)}

    def convt_p(k, cin, cout, ksz):   # PyTorch ConvTranspose2d weight: (in, out, k, k)
        k1, k2 = jax.random.split(k)
        return {"w": scale * jax.random.normal(k1, (cin, cout, ksz, ksz), jnp.float32),
                "b": scale * jax.random.normal(k2, (cout,), jnp.float32)}

    keys = jax.random.split(key, 6 + 2 * n_res)
    nf = n_features
    return {
        "initial": conv_p(keys[0], nf, img_channels, 7),
        "down0": conv_p(keys[1], nf * 2, nf, 3),
        "down1": conv_p(keys[2], nf * 4, nf * 2, 3),
        "res": [(conv_p(keys[3 + 2 * r], nf * 4, nf * 4, 3),
                 conv_p(keys[4 + 2 * r], nf * 4, nf * 4, 3)) for r in range(n_res)],
        "up0": convt_p(keys[3 + 2 * n_res], nf * 4, nf * 2, 3),
        "up1": convt_p(keys[4 + 2 * n_res], nf * 2, nf, 3),
        "last": conv_p(keys[5 + 2 * n_res], img_channels, nf, 7),
    }


def generator_forward(params, x_nchw):
    x = jnp.transpose(x_nchw, (0, 2, 3, 1)).astype(jnp.float32)    # NCHW -> NHWC
    p = params
    # initial: Conv(k7,s1,p3,reflect) + IN + ReLU (fused)
    x = conv2d_fused(x, p["initial"]["w"], p["initial"]["b"], stride=1, pad=3,
                     use_in=True, use_relu=True)
    # down blocks: Conv(k3,s2,p1,reflect) + IN + ReLU (fused)
    x = conv2d_fused(x, p["down0"]["w"], p["down0"]["b"], stride=2, pad=1,
                     use_in=True, use_relu=True)
    x = conv2d_fused(x, p["down1"]["w"], p["down1"]["b"], stride=2, pad=1,
                     use_in=True, use_relu=True)
    # residual blocks: (Conv+IN+ReLU) -> (Conv+IN) -> +x, residual add fused into 2nd conv
    for p1, p2 in p["res"]:
        y = conv2d_fused(x, p1["w"], p1["b"], stride=1, pad=1, use_in=True, use_relu=True)
        x = conv2d_fused(y, p2["w"], p2["b"], stride=1, pad=1, use_in=True, use_relu=False,
                         skip=x)
    # up blocks: ConvTranspose(k3,s2,p1,op1) + IN + ReLU (phase-decomposed, fused)
    x = conv_transpose2d_fused(x, p["up0"]["w"], p["up0"]["b"], use_relu=True)
    x = conv_transpose2d_fused(x, p["up1"]["w"], p["up1"]["b"], use_relu=True)
    # last: Conv(k7,s1,p3,reflect) + tanh (fused)
    x = conv2d_fused(x, p["last"]["w"], p["last"]["b"], stride=1, pad=3,
                     use_in=False, use_relu=False, use_tanh=True)
    return jnp.transpose(x, (0, 3, 1, 2))                          # NHWC -> NCHW


if __name__ == "__main__":
    key = jax.random.PRNGKey(0)
    kp, kx = jax.random.split(key)
    # small config consistent with the module: img_channels=3, n_features=8, n_res=2
    params = init_generator_params(kp, img_channels=3, n_features=8, n_res=2)
    x = jax.random.normal(kx, (2, 3, 16, 16), jnp.float32)

    fwd = jax.jit(generator_forward)
    out = jax.block_until_ready(fwd(params, x))

    assert out.shape == (2, 3, 16, 16), out.shape
    assert bool(jnp.all(jnp.isfinite(out)))
    assert bool(jnp.all(jnp.abs(out) <= 1.0))  # tanh output range
    print("KERNEL_OK")
</pallas_src>

<mosaic_0001>
module attributes {stable_mosaic.version = 11 : i64} {
  func.func @_fused_gemm_kernel(%arg0: i32, %arg1: memref<256x256xbf16, #tpu.memory_space<vmem>>, %arg2: memref<256x128xbf16, #tpu.memory_space<vmem>>, %arg3: memref<1x128xf32, #tpu.memory_space<vmem>>, %arg4: memref<256x128xf32, #tpu.memory_space<vmem>>) attributes {dimension_semantics = [#tpu.dimension_semantics<parallel>], iteration_bounds = array<i64: 2>, scalar_prefetch = 0 : i64, scratch_operands = 0 : i64, tpu.core_type = #tpu.core_type<tc>, window_params = [{transform_indices = @transform_0, window_bounds = array<i64: 256, 256>}, {pipeline_mode = #tpu.pipeline_mode<synchronous>, transform_indices = @transform_1, window_bounds = array<i64: 256, 128>}, {pipeline_mode = #tpu.pipeline_mode<synchronous>, transform_indices = @transform_2, window_bounds = array<i64: 1, 128>}, {transform_indices = @transform_3, window_bounds = array<i64: 256, 128>}]} {
    %c0 = arith.constant 0 : index
    %c0_0 = arith.constant 0 : index
    %0 = vector.load %arg1[%c0, %c0_0] : memref<256x256xbf16, #tpu.memory_space<vmem>>, vector<256x256xbf16>
    %c0_1 = arith.constant 0 : index
    %c0_2 = arith.constant 0 : index
    %1 = vector.load %arg2[%c0_1, %c0_2] : memref<256x128xbf16, #tpu.memory_space<vmem>>, vector<256x128xbf16>
    %cst = arith.constant dense<0.000000e+00> : vector<256x128xf32>
    %2 = tpu.matmul %0, %1, %cst {dimension_numbers = #tpu.dot_dimension_numbers<[1], [0], [0], [1], [0, 0, 1, 1], [], []>} : vector<256x256xbf16>, vector<256x128xbf16>, vector<256x128xf32> -> vector<256x128xf32>
    %c0_3 = arith.constant 0 : index
    %c0_4 = arith.constant 0 : index
    %3 = vector.load %arg3[%c0_3, %c0_4] : memref<1x128xf32, #tpu.memory_space<vmem>>, vector<1x128xf32>
    %4 = vector.broadcast %3 : vector<1x128xf32> to vector<256x128xf32>
    %5 = arith.addf %2, %4 : vector<256x128xf32>
    %cst_5 = arith.constant dense<0.000000e+00> : vector<128xf32>
    %6 = vector.multi_reduction <add>, %5, %cst_5 [0] : vector<256x128xf32> to vector<128xf32>
    %7 = vector.shape_cast %6 : vector<128xf32> to vector<1x128xf32>
    %cst_6 = arith.constant 2.560000e+02 : f32
    %8 = vector.broadcast %cst_6 : f32 to vector<1x128xf32>
    %9 = arith.divf %7, %8 : vector<1x128xf32>
    %10 = vector.broadcast %9 : vector<1x128xf32> to vector<256x128xf32>
    %11 = arith.subf %5, %10 : vector<256x128xf32>
    %12 = arith.mulf %11, %11 : vector<256x128xf32>
    %cst_7 = arith.constant dense<0.000000e+00> : vector<128xf32>
    %13 = vector.multi_reduction <add>, %12, %cst_7 [0] : vector<256x128xf32> to vector<128xf32>
    %14 = vector.shape_cast %13 : vector<128xf32> to vector<1x128xf32>
    %cst_8 = arith.constant 2.560000e+02 : f32
    %15 = vector.broadcast %cst_8 : f32 to vector<1x128xf32>
    %16 = arith.divf %14, %15 : vector<1x128xf32>
    %cst_9 = arith.constant 9.99999974E-6 : f32
    %17 = vector.broadcast %cst_9 : f32 to vector<1x128xf32>
    %18 = arith.addf %16, %17 : vector<1x128xf32>
    %19 = math.rsqrt %18 : vector<1x128xf32>
    %20 = vector.broadcast %19 : vector<1x128xf32> to vector<256x128xf32>
    %21 = arith.mulf %11, %20 : vector<256x128xf32>
    %cst_10 = arith.constant 0.000000e+00 : f32
    %22 = vector.broadcast %cst_10 : f32 to vector<256x128xf32>
    %23 = arith.maximumf %21, %22 : vector<256x128xf32>
    %c0_11 = arith.constant 0 : index
    %c0_12 = arith.constant 0 : index
    %24 = vector.load %arg4[%c0_11, %c0_12] : memref<256x128xf32, #tpu.memory_space<vmem>>, vector<256x128xf32>
    tpu.vector_store %arg4[%c0_11, %c0_12], %23 {strides = array<i32>} : memref<256x128xf32, #tpu.memory_space<vmem>>, vector<256x128xf32>,
    return
  }
  func.func @transform_0(%arg0: i32) -> (i32, i32) {
    %c0_i32 = arith.constant 0 : i32
    %c0_i32_0 = arith.constant 0 : i32
    return %arg0, %c0_i32 : i32, i32
  }
  func.func @transform_1(%arg0: i32) -> (i32, i32) {
    %c0_i32 = arith.constant 0 : i32
    %c0_i32_0 = arith.constant 0 : i32
    %c0_i32_1 = arith.constant 0 : i32
    return %c0_i32, %c0_i32_0 : i32, i32
  }
  func.func @transform_2(%arg0: i32) -> (i32, i32) {
    %c0_i32 = arith.constant 0 : i32
    %c0_i32_0 = arith.constant 0 : i32
    %c0_i32_1 = arith.constant 0 : i32
    return %c0_i32, %c0_i32_0 : i32, i32
  }
  func.func @transform_3(%arg0: i32) -> (i32, i32) {
    %c0_i32 = arith.constant 0 : i32
    %c0_i32_0 = arith.constant 0 : i32
    return %arg0, %c0_i32 : i32, i32
  }
}

module attributes {stable_mosaic.version = 11 : i64} {
  func.func @_fused_gemm_kernel(%arg0: i32, %arg1: memref<64x128xbf16, #tpu.memory_space<vmem>>, %arg2: memref<128x128xbf16, #tpu.memory_space<vmem>>, %arg3: memref<1x128xf32, #tpu.memory_space<vmem>>, %arg4: memref<64x128xf32, #tpu.memory_space<vmem>>) attributes {dimension_semantics = [#tpu.dimension_semantics<parallel>], iteration_bounds = array<i64: 2>, scalar_prefetch = 0 : i64, scratch_operands = 0 : i64, tpu.core_type = #tpu.core_type<tc>, window_params = [{transform_indices = @transform_0, window_bounds = array<i64: 64, 128>}, {pipeline_mode = #tpu.pipeline_mode<synchronous>, transform_indices = @transform_1, window_bounds = array<i64: 128, 128>}, {pipeline_mode = #tpu.pipeline_mode<synchronous>, transform_indices = @transform_2, window_bounds = array<i64: 1, 128>}, {transform_indices = @transform_3, window_bounds = array<i64: 64, 128>}]} {
    %c0 = arith.constant 0 : index
    %c0_0 = arith.constant 0 : index
    %0 = vector.load %arg1[%c0, %c0_0] : memref<64x128xbf16, #tpu.memory_space<vmem>>, vector<64x128xbf16>
    %c0_1 = arith.constant 0 : index
    %c0_2 = arith.constant 0 : index
    %1 = vector.load %arg2[%c0_1, %c0_2] : memref<128x128xbf16, #tpu.memory_space<vmem>>, vector<128x128xbf16>
    %cst = arith.constant dense<0.000000e+00> : vector<64x128xf32>
    %2 = tpu.matmul %0, %1, %cst {dimension_numbers = #tpu.dot_dimension_numbers<[1], [0], [0], [1], [0, 0, 1, 1], [], []>} : vector<64x128xbf16>, vector<128x128xbf16>, vector<64x128xf32> -> vector<64x128xf32>
    %c0_3 = arith.constant 0 : index
    %c0_4 = arith.constant 0 : index
    %3 = vector.load %arg3[%c0_3, %c0_4] : memref<1x128xf32, #tpu.memory_space<vmem>>, vector<1x128xf32>
    %4 = vector.broadcast %3 : vector<1x128xf32> to vector<64x128xf32>
    %5 = arith.addf %2, %4 : vector<64x128xf32>
    %cst_5 = arith.constant dense<0.000000e+00> : vector<128xf32>
    %6 = vector.multi_reduction <add>, %5, %cst_5 [0] : vector<64x128xf32> to vector<128xf32>
    %7 = vector.shape_cast %6 : vector<128xf32> to vector<1x128xf32>
    %cst_6 = arith.constant 6.400000e+01 : f32
    %8 = vector.broadcast %cst_6 : f32 to vector<1x128xf32>
    %9 = arith.divf %7, %8 : vector<1x128xf32>
    %10 = vector.broadcast %9 : vector<1x128xf32> to vector<64x128xf32>
    %11 = arith.subf %5, %10 : vector<64x128xf32>
    %12 = arith.mulf %11, %11 : vector<64x128xf32>
    %cst_7 = arith.constant dense<0.000000e+00> : vector<128xf32>
    %13 = vector.multi_reduction <add>, %12, %cst_7 [0] : vector<64x128xf32> to vector<128xf32>
    %14 = vector.shape_cast %13 : vector<128xf32> to vector<1x128xf32>
    %cst_8 = arith.constant 6.400000e+01 : f32
    %15 = vector.broadcast %cst_8 : f32 to vector<1x128xf32>
    %16 = arith.divf %14, %15 : vector<1x128xf32>
    %cst_9 = arith.constant 9.99999974E-6 : f32
    %17 = vector.broadcast %cst_9 : f32 to vector<1x128xf32>
    %18 = arith.addf %16, %17 : vector<1x128xf32>
    %19 = math.rsqrt %18 : vector<1x128xf32>
    %20 = vector.broadcast %19 : vector<1x128xf32> to vector<64x128xf32>
    %21 = arith.mulf %11, %20 : vector<64x128xf32>
    %cst_10 = arith.constant 0.000000e+00 : f32
    %22 = vector.broadcast %cst_10 : f32 to vector<64x128xf32>
    %23 = arith.maximumf %21, %22 : vector<64x128xf32>
    %c0_11 = arith.constant 0 : index
    %c0_12 = arith.constant 0 : index
    %24 = vector.load %arg4[%c0_11, %c0_12] : memref<64x128xf32, #tpu.memory_space<vmem>>, vector<64x128xf32>
    tpu.vector_store %arg4[%c0_11, %c0_12], %23 {strides = array<i32>} : memref<64x128xf32, #tpu.memory_space<vmem>>, vector<64x128xf32>,
    return
  }
  func.func @transform_0(%arg0: i32) -> (i32, i32) {
    %c0_i32 = arith.constant 0 : i32
    %c0_i32_0 = arith.constant 0 : i32
    return %arg0, %c0_i32 : i32, i32
  }
  func.func @transform_1(%arg0: i32) -> (i32, i32) {
    %c0_i32 = arith.constant 0 : i32
    %c0_i32_0 = arith.constant 0 : i32
    %c0_i32_1 = arith.constant 0 : i32
    return %c0_i32, %c0_i32_0 : i32, i32
  }
  func.func @transform_2(%arg0: i32) -> (i32, i32) {
    %c0_i32 = arith.constant 0 : i32
    %c0_i32_0 = arith.constant 0 : i32
    %c0_i32_1 = arith.constant 0 : i32
    return %c0_i32, %c0_i32_0 : i32, i32
  }
  func.func @transform_3(%arg0: i32) -> (i32, i32) {
    %c0_i32 = arith.constant 0 : i32
    %c0_i32_0 = arith.constant 0 : i32
    return %arg0, %c0_i32 : i32, i32
  }
}

module attributes {stable_mosaic.version = 11 : i64} {
  func.func @_fused_gemm_kernel(%arg0: i32, %arg1: memref<16x256xbf16, #tpu.memory_space<vmem>>, %arg2: memref<256x128xbf16, #tpu.memory_space<vmem>>, %arg3: memref<1x128xf32, #tpu.memory_space<vmem>>, %arg4: memref<16x128xf32, #tpu.memory_space<vmem>>) attributes {dimension_semantics = [#tpu.dimension_semantics<parallel>], iteration_bounds = array<i64: 2>, scalar_prefetch = 0 : i64, scratch_operands = 0 : i64, tpu.core_type = #tpu.core_type<tc>, window_params = [{transform_indices = @transform_0, window_bounds = array<i64: 16, 256>}, {pipeline_mode = #tpu.pipeline_mode<synchronous>, transform_indices = @transform_1, window_bounds = array<i64: 256, 128>}, {pipeline_mode = #tpu.pipeline_mode<synchronous>, transform_indices = @transform_2, window_bounds = array<i64: 1, 128>}, {transform_indices = @transform_3, window_bounds = array<i64: 16, 128>}]} {
    %c0 = arith.constant 0 : index
    %c0_0 = arith.constant 0 : index
    %0 = vector.load %arg1[%c0, %c0_0] : memref<16x256xbf16, #tpu.memory_space<vmem>>, vector<16x256xbf16>
    %c0_1 = arith.constant 0 : index
    %c0_2 = arith.constant 0 : index
    %1 = vector.load %arg2[%c0_1, %c0_2] : memref<256x128xbf16, #tpu.memory_space<vmem>>, vector<256x128xbf16>
    %cst = arith.constant dense<0.000000e+00> : vector<16x128xf32>
    %2 = tpu.matmul %0, %1, %cst {dimension_numbers = #tpu.dot_dimension_numbers<[1], [0], [0], [1], [0, 0, 1, 1], [], []>} : vector<16x256xbf16>, vector<256x128xbf16>, vector<16x128xf32> -> vector<16x128xf32>
    %c0_3 = arith.constant 0 : index
    %c0_4 = arith.constant 0 : index
    %3 = vector.load %arg3[%c0_3, %c0_4] : memref<1x128xf32, #tpu.memory_space<vmem>>, vector<1x128xf32>
    %4 = vector.broadcast %3 : vector<1x128xf32> to vector<16x128xf32>
    %5 = arith.addf %2, %4 : vector<16x128xf32>
    %cst_5 = arith.constant dense<0.000000e+00> : vector<128xf32>
    %6 = vector.multi_reduction <add>, %5, %cst_5 [0] : vector<16x128xf32> to vector<128xf32>
    %7 = vector.shape_cast %6 : vector<128xf32> to vector<1x128xf32>
    %cst_6 = arith.constant 1.600000e+01 : f32
    %8 = vector.broadcast %cst_6 : f32 to vector<1x128xf32>
    %9 = arith.divf %7, %8 : vector<1x128xf32>
    %10 = vector.broadcast %9 : vector<1x128xf32> to vector<16x128xf32>
    %11 = arith.subf %5, %10 : vector<16x128xf32>
    %12 = arith.mulf %11, %11 : vector<16x128xf32>
    %cst_7 = arith.constant dense<0.000000e+00> : vector<128xf32>
    %13 = vector.multi_reduction <add>, %12, %cst_7 [0] : vector<16x128xf32> to vector<128xf32>
    %14 = vector.shape_cast %13 : vector<128xf32> to vector<1x128xf32>
    %cst_8 = arith.constant 1.600000e+01 : f32
    %15 = vector.broadcast %cst_8 : f32 to vector<1x128xf32>
    %16 = arith.divf %14, %15 : vector<1x128xf32>
    %cst_9 = arith.constant 9.99999974E-6 : f32
    %17 = vector.broadcast %cst_9 : f32 to vector<1x128xf32>
    %18 = arith.addf %16, %17 : vector<1x128xf32>
    %19 = math.rsqrt %18 : vector<1x128xf32>
    %20 = vector.broadcast %19 : vector<1x128xf32> to vector<16x128xf32>
    %21 = arith.mulf %11, %20 : vector<16x128xf32>
    %cst_10 = arith.constant 0.000000e+00 : f32
    %22 = vector.broadcast %cst_10 : f32 to vector<16x128xf32>
    %23 = arith.maximumf %21, %22 : vector<16x128xf32>
    %c0_11 = arith.constant 0 : index
    %c0_12 = arith.constant 0 : index
    %24 = vector.load %arg4[%c0_11, %c0_12] : memref<16x128xf32, #tpu.memory_space<vmem>>, vector<16x128xf32>
    tpu.vector_store %arg4[%c0_11, %c0_12], %23 {strides = array<i32>} : memref<16x128xf32, #tpu.memory_space<vmem>>, vector<16x128xf32>,
    return
  }
  func.func @transform_0(%arg0: i32) -> (i32, i32) {
    %c0_i32 = arith.constant 0 : i32
    %c0_i32_0 = arith.constant 0 : i32
    return %arg0, %c0_i32 : i32, i32
  }
  func.func @transform_1(%arg0: i32) -> (i32, i32) {
    %c0_i32 = arith.constant 0 : i32
    %c0_i32_0 = arith.constant 0 : i32
    %c0_i32_1 = arith.constant 0 : i32
    return %c0_i32, %c0_i32_0 : i32, i32
  }
  func.func @transform_2(%arg0: i32) -> (i32, i32) {
    %c0_i32 = arith.constant 0 : i32
    %c0_i32_0 = arith.constant 0 : i32
    %c0_i32_1 = arith.constant 0 : i32
    return %c0_i32, %c0_i32_0 : i32, i32
  }
  func.func @transform_3(%arg0: i32) -> (i32, i32) {
    %c0_i32 = arith.constant 0 : i32
    %c0_i32_0 = arith.constant 0 : i32
    return %arg0, %c0_i32 : i32, i32
  }
}

module attributes {stable_mosaic.version = 11 : i64} {
  func.func @_fused_gemm_kernel(%arg0: i32, %arg1: memref<16x384xbf16, #tpu.memory_space<vmem>>, %arg2: memref<384x128xbf16, #tpu.memory_space<vmem>>, %arg3: memref<1x128xf32, #tpu.memory_space<vmem>>, %arg4: memref<16x128xf32, #tpu.memory_space<vmem>>) attributes {dimension_semantics = [#tpu.dimension_semantics<parallel>], iteration_bounds = array<i64: 2>, scalar_prefetch = 0 : i64, scratch_operands = 0 : i64, tpu.core_type = #tpu.core_type<tc>, window_params = [{transform_indices = @transform_0, window_bounds = array<i64: 16, 384>}, {pipeline_mode = #tpu.pipeline_mode<synchronous>, transform_indices = @transform_1, window_bounds = array<i64: 384, 128>}, {pipeline_mode = #tpu.pipeline_mode<synchronous>, transform_indices = @transform_2, window_bounds = array<i64: 1, 128>}, {transform_indices = @transform_3, window_bounds = array<i64: 16, 128>}]} {
    %c0 = arith.constant 0 : index
    %c0_0 = arith.constant 0 : index
    %0 = vector.load %arg1[%c0, %c0_0] : memref<16x384xbf16, #tpu.memory_space<vmem>>, vector<16x384xbf16>
    %c0_1 = arith.constant 0 : index
    %c0_2 = arith.constant 0 : index
    %1 = vector.load %arg2[%c0_1, %c0_2] : memref<384x128xbf16, #tpu.memory_space<vmem>>, vector<384x128xbf16>
    %cst = arith.constant dense<0.000000e+00> : vector<16x128xf32>
    %2 = tpu.matmul %0, %1, %cst {dimension_numbers = #tpu.dot_dimension_numbers<[1], [0], [0], [1], [0, 0, 1, 1], [], []>} : vector<16x384xbf16>, vector<384x128xbf16>, vector<16x128xf32> -> vector<16x128xf32>
    %c0_3 = arith.constant 0 : index
    %c0_4 = arith.constant 0 : index
    %3 = vector.load %arg3[%c0_3, %c0_4] : memref<1x128xf32, #tpu.memory_space<vmem>>, vector<1x128xf32>
    %4 = vector.broadcast %3 : vector<1x128xf32> to vector<16x128xf32>
    %5 = arith.addf %2, %4 : vector<16x128xf32>
    %cst_5 = arith.constant dense<0.000000e+00> : vector<128xf32>
    %6 = vector.multi_reduction <add>, %5, %cst_5 [0] : vector<16x128xf32> to vector<128xf32>
    %7 = vector.shape_cast %6 : vector<128xf32> to vector<1x128xf32>
    %cst_6 = arith.constant 1.600000e+01 : f32
    %8 = vector.broadcast %cst_6 : f32 to vector<1x128xf32>
    %9 = arith.divf %7, %8 : vector<1x128xf32>
    %10 = vector.broadcast %9 : vector<1x128xf32> to vector<16x128xf32>
    %11 = arith.subf %5, %10 : vector<16x128xf32>
    %12 = arith.mulf %11, %11 : vector<16x128xf32>
    %cst_7 = arith.constant dense<0.000000e+00> : vector<128xf32>
    %13 = vector.multi_reduction <add>, %12, %cst_7 [0] : vector<16x128xf32> to vector<128xf32>
    %14 = vector.shape_cast %13 : vector<128xf32> to vector<1x128xf32>
    %cst_8 = arith.constant 1.600000e+01 : f32
    %15 = vector.broadcast %cst_8 : f32 to vector<1x128xf32>
    %16 = arith.divf %14, %15 : vector<1x128xf32>
    %cst_9 = arith.constant 9.99999974E-6 : f32
    %17 = vector.broadcast %cst_9 : f32 to vector<1x128xf32>
    %18 = arith.addf %16, %17 : vector<1x128xf32>
    %19 = math.rsqrt %18 : vector<1x128xf32>
    %20 = vector.broadcast %19 : vector<1x128xf32> to vector<16x128xf32>
    %21 = arith.mulf %11, %20 : vector<16x128xf32>
    %cst_10 = arith.constant 0.000000e+00 : f32
    %22 = vector.broadcast %cst_10 : f32 to vector<16x128xf32>
    %23 = arith.maximumf %21, %22 : vector<16x128xf32>
    %c0_11 = arith.constant 0 : index
    %c0_12 = arith.constant 0 : index
    %24 = vector.load %arg4[%c0_11, %c0_12] : memref<16x128xf32, #tpu.memory_space<vmem>>, vector<16x128xf32>
    tpu.vector_store %arg4[%c0_11, %c0_12], %23 {strides = array<i32>} : memref<16x128xf32, #tpu.memory_space<vmem>>, vector<16x128xf32>,
    return
  }
  func.func @transform_0(%arg0: i32) -> (i32, i32) {
    %c0_i32 = arith.constant 0 : i32
    %c0_i32_0 = arith.constant 0 : i32
    return %arg0, %c0_i32 : i32, i32
  }
  func.func @transform_1(%arg0: i32) -> (i32, i32) {
    %c0_i32 = arith.constant 0 : i32
    %c0_i32_0 = arith.constant 0 : i32
    %c0_i32_1 = arith.constant 0 : i32
    return %c0_i32, %c0_i32_0 : i32, i32
  }
  func.func @transform_2(%arg0: i32) -> (i32, i32) {
    %c0_i32 = arith.constant 0 : i32
    %c0_i32_0 = arith.constant 0 : i32
    %c0_i32_1 = arith.constant 0 : i32
    return %c0_i32, %c0_i32_0 : i32, i32
  }
  func.func @transform_3(%arg0: i32) -> (i32, i32) {
    %c0_i32 = arith.constant 0 : i32
    %c0_i32_0 = arith.constant 0 : i32
    return %arg0, %c0_i32 : i32, i32
  }
}

module attributes {stable_mosaic.version = 11 : i64} {
  func.func @_fused_gemm_kernel(%arg0: i32, %arg1: memref<16x384xbf16, #tpu.memory_space<vmem>>, %arg2: memref<384x128xbf16, #tpu.memory_space<vmem>>, %arg3: memref<1x128xf32, #tpu.memory_space<vmem>>, %arg4: memref<16x128xf32, #tpu.memory_space<vmem>>, %arg5: memref<16x128xf32, #tpu.memory_space<vmem>>) attributes {dimension_semantics = [#tpu.dimension_semantics<parallel>], iteration_bounds = array<i64: 2>, scalar_prefetch = 0 : i64, scratch_operands = 0 : i64, tpu.core_type = #tpu.core_type<tc>, window_params = [{transform_indices = @transform_0, window_bounds = array<i64: 16, 384>}, {pipeline_mode = #tpu.pipeline_mode<synchronous>, transform_indices = @transform_1, window_bounds = array<i64: 384, 128>}, {pipeline_mode = #tpu.pipeline_mode<synchronous>, transform_indices = @transform_2, window_bounds = array<i64: 1, 128>}, {transform_indices = @transform_3, window_bounds = array<i64: 16, 128>}, {transform_indices = @transform_4, window_bounds = array<i64: 16, 128>}]} {
    %c0 = arith.constant 0 : index
    %c0_0 = arith.constant 0 : index
    %0 = vector.load %arg1[%c0, %c0_0] : memref<16x384xbf16, #tpu.memory_space<vmem>>, vector<16x384xbf16>
    %c0_1 = arith.constant 0 : index
    %c0_2 = arith.constant 0 : index
    %1 = vector.load %arg2[%c0_1, %c0_2] : memref<384x128xbf16, #tpu.memory_space<vmem>>, vector<384x128xbf16>
    %cst = arith.constant dense<0.000000e+00> : vector<16x128xf32>
    %2 = tpu.matmul %0, %1, %cst {dimension_numbers = #tpu.dot_dimension_numbers<[1], [0], [0], [1], [0, 0, 1, 1], [], []>} : vector<16x384xbf16>, vector<384x128xbf16>, vector<16x128xf32> -> vector<16x128xf32>
    %c0_3 = arith.constant 0 : index
    %c0_4 = arith.constant 0 : index
    %3 = vector.load %arg3[%c0_3, %c0_4] : memref<1x128xf32, #tpu.memory_space<vmem>>, vector<1x128xf32>
    %4 = vector.broadcast %3 : vector<1x128xf32> to vector<16x128xf32>
    %5 = arith.addf %2, %4 : vector<16x128xf32>
    %cst_5 = arith.constant dense<0.000000e+00> : vector<128xf32>
    %6 = vector.multi_reduction <add>, %5, %cst_5 [0] : vector<16x128xf32> to vector<128xf32>
    %7 = vector.shape_cast %6 : vector<128xf32> to vector<1x128xf32>
    %cst_6 = arith.constant 1.600000e+01 : f32
    %8 = vector.broadcast %cst_6 : f32 to vector<1x128xf32>
    %9 = arith.divf %7, %8 : vector<1x128xf32>
    %10 = vector.broadcast %9 : vector<1x128xf32> to vector<16x128xf32>
    %11 = arith.subf %5, %10 : vector<16x128xf32>
    %12 = arith.mulf %11, %11 : vector<16x128xf32>
    %cst_7 = arith.constant dense<0.000000e+00> : vector<128xf32>
    %13 = vector.multi_reduction <add>, %12, %cst_7 [0] : vector<16x128xf32> to vector<128xf32>
    %14 = vector.shape_cast %13 : vector<128xf32> to vector<1x128xf32>
    %cst_8 = arith.constant 1.600000e+01 : f32
    %15 = vector.broadcast %cst_8 : f32 to vector<1x128xf32>
    %16 = arith.divf %14, %15 : vector<1x128xf32>
    %cst_9 = arith.constant 9.99999974E-6 : f32
    %17 = vector.broadcast %cst_9 : f32 to vector<1x128xf32>
    %18 = arith.addf %16, %17 : vector<1x128xf32>
    %19 = math.rsqrt %18 : vector<1x128xf32>
    %20 = vector.broadcast %19 : vector<1x128xf32> to vector<16x128xf32>
    %21 = arith.mulf %11, %20 : vector<16x128xf32>
    %c0_10 = arith.constant 0 : index
    %c0_11 = arith.constant 0 : index
    %22 = vector.load %arg4[%c0_10, %c0_11] : memref<16x128xf32, #tpu.memory_space<vmem>>, vector<16x128xf32>
    %23 = arith.addf %21, %22 : vector<16x128xf32>
    %c0_12 = arith.constant 0 : index
    %c0_13 = arith.constant 0 : index
    %24 = vector.load %arg5[%c0_12, %c0_13] : memref<16x128xf32, #tpu.memory_space<vmem>>, vector<16x128xf32>
    tpu.vector_store %arg5[%c0_12, %c0_13], %23 {strides = array<i32>} : memref<16x128xf32, #tpu.memory_space<vmem>>, vector<16x128xf32>,
    return
  }
  func.func @transform_0(%arg0: i32) -> (i32, i32) {
    %c0_i32 = arith.constant 0 : i32
    %c0_i32_0 = arith.constant 0 : i32
    return %arg0, %c0_i32 : i32, i32
  }
  func.func @transform_1(%arg0: i32) -> (i32, i32) {
    %c0_i32 = arith.constant 0 : i32
    %c0_i32_0 = arith.constant 0 : i32
    %c0_i32_1 = arith.constant 0 : i32
    return %c0_i32, %c0_i32_0 : i32, i32
  }
  func.func @transform_2(%arg0: i32) -> (i32, i32) {
    %c0_i32 = arith.constant 0 : i32
    %c0_i32_0 = arith.constant 0 : i32
    %c0_i32_1 = arith.constant 0 : i32
    return %c0_i32, %c0_i32_0 : i32, i32
  }
  func.func @transform_3(%arg0: i32) -> (i32, i32) {
    %c0_i32 = arith.constant 0 : i32
    %c0_i32_0 = arith.constant 0 : i32
    return %arg0, %c0_i32 : i32, i32
  }
  func.func @transform_4(%arg0: i32) -> (i32, i32) {
    %c0_i32 = arith.constant 0 : i32
    %c0_i32_0 = arith.constant 0 : i32
    return %arg0, %c0_i32 : i32, i32
  }
}

module attributes {stable_mosaic.version = 11 : i64} {
  func.func @_fused_gemm_kernel(%arg0: i32, %arg1: memref<16x128xbf16, #tpu.memory_space<vmem>>, %arg2: memref<128x128xbf16, #tpu.memory_space<vmem>>, %arg3: memref<1x128xf32, #tpu.memory_space<vmem>>, %arg4: memref<128x128xf32, #tpu.memory_space<vmem>>, %arg5: memref<16x128xf32, #tpu.memory_space<vmem>>) attributes {dimension_semantics = [#tpu.dimension_semantics<parallel>], iteration_bounds = array<i64: 2>, scalar_prefetch = 0 : i64, scratch_operands = 0 : i64, tpu.core_type = #tpu.core_type<tc>, window_params = [{transform_indices = @transform_0, window_bounds = array<i64: 16, 128>}, {pipeline_mode = #tpu.pipeline_mode<synchronous>, transform_indices = @transform_1, window_bounds = array<i64: 128, 128>}, {pipeline_mode = #tpu.pipeline_mode<synchronous>, transform_indices = @transform_2, window_bounds = array<i64: 1, 128>}, {pipeline_mode = #tpu.pipeline_mode<synchronous>, transform_indices = @transform_3, window_bounds = array<i64: 128, 128>}, {transform_indices = @transform_4, window_bounds = array<i64: 16, 128>}]} {
    %c0 = arith.constant 0 : index
    %c0_0 = arith.constant 0 : index
    %0 = vector.load %arg1[%c0, %c0_0] : memref<16x128xbf16, #tpu.memory_space<vmem>>, vector<16x128xbf16>
    %c0_1 = arith.constant 0 : index
    %c0_2 = arith.constant 0 : index
    %1 = vector.load %arg2[%c0_1, %c0_2] : memref<128x128xbf16, #tpu.memory_space<vmem>>, vector<128x128xbf16>
    %cst = arith.constant dense<0.000000e+00> : vector<16x128xf32>
    %2 = tpu.matmul %0, %1, %cst {dimension_numbers = #tpu.dot_dimension_numbers<[1], [0], [0], [1], [0, 0, 1, 1], [], []>} : vector<16x128xbf16>, vector<128x128xbf16>, vector<16x128xf32> -> vector<16x128xf32>
    %c0_3 = arith.constant 0 : index
    %c0_4 = arith.constant 0 : index
    %3 = vector.load %arg3[%c0_3, %c0_4] : memref<1x128xf32, #tpu.memory_space<vmem>>, vector<1x128xf32>
    %4 = vector.broadcast %3 : vector<1x128xf32> to vector<16x128xf32>
    %5 = arith.addf %2, %4 : vector<16x128xf32>
    %cst_5 = arith.constant dense<0.000000e+00> : vector<128xf32>
    %6 = vector.multi_reduction <add>, %5, %cst_5 [0] : vector<16x128xf32> to vector<128xf32>
    %7 = vector.shape_cast %6 : vector<128xf32> to vector<1x128xf32>
    %cst_6 = arith.constant 1.600000e+01 : f32
    %8 = vector.broadcast %cst_6 : f32 to vector<1x128xf32>
    %9 = arith.divf %7, %8 : vector<1x128xf32>
    %c0_7 = arith.constant 0 : index
    %c0_8 = arith.constant 0 : index
    %10 = vector.load %arg4[%c0_7, %c0_8] : memref<128x128xf32, #tpu.memory_space<vmem>>, vector<128x128xf32>
    %cst_9 = arith.constant dense<0.000000e+00> : vector<1x128xf32>
    %11 = tpu.matmul %9, %10, %cst_9 {dimension_numbers = #tpu.dot_dimension_numbers<[1], [0], [0], [1], [0, 0, 1, 1], [], []>} : vector<1x128xf32>, vector<128x128xf32>, vector<1x128xf32> -> vector<1x128xf32>
    %12 = vector.broadcast %11 : vector<1x128xf32> to vector<16x128xf32>
    %13 = arith.subf %5, %12 : vector<16x128xf32>
    %14 = arith.mulf %13, %13 : vector<16x128xf32>
    %cst_10 = arith.constant dense<0.000000e+00> : vector<128xf32>
    %15 = vector.multi_reduction <add>, %14, %cst_10 [0] : vector<16x128xf32> to vector<128xf32>
    %16 = vector.shape_cast %15 : vector<128xf32> to vector<1x128xf32>
    %cst_11 = arith.constant 1.600000e+01 : f32
    %17 = vector.broadcast %cst_11 : f32 to vector<1x128xf32>
    %18 = arith.divf %16, %17 : vector<1x128xf32>
    %c0_12 = arith.constant 0 : index
    %c0_13 = arith.constant 0 : index
    %19 = vector.load %arg4[%c0_12, %c0_13] : memref<128x128xf32, #tpu.memory_space<vmem>>, vector<128x128xf32>
    %cst_14 = arith.constant dense<0.000000e+00> : vector<1x128xf32>
    %20 = tpu.matmul %18, %19, %cst_14 {dimension_numbers = #tpu.dot_dimension_numbers<[1], [0], [0], [1], [0, 0, 1, 1], [], []>} : vector<1x128xf32>, vector<128x128xf32>, vector<1x128xf32> -> vector<1x128xf32>
    %cst_15 = arith.constant 9.99999974E-6 : f32
    %21 = vector.broadcast %cst_15 : f32 to vector<1x128xf32>
    %22 = arith.addf %20, %21 : vector<1x128xf32>
    %23 = math.rsqrt %22 : vector<1x128xf32>
    %24 = vector.broadcast %23 : vector<1x128xf32> to vector<16x128xf32>
    %25 = arith.mulf %13, %24 : vector<16x128xf32>
    %cst_16 = arith.constant 0.000000e+00 : f32
    %26 = vector.broadcast %cst_16 : f32 to vector<16x128xf32>
    %27 = arith.maximumf %25, %26 : vector<16x128xf32>
    %c0_17 = arith.constant 0 : index
    %c0_18 = arith.constant 0 : index
    %28 = vector.load %arg5[%c0_17, %c0_18] : memref<16x128xf32, #tpu.memory_space<vmem>>, vector<16x128xf32>
    tpu.vector_store %arg5[%c0_17, %c0_18], %27 {strides = array<i32>} : memref<16x128xf32, #tpu.memory_space<vmem>>, vector<16x128xf32>,
    return
  }
  func.func @transform_0(%arg0: i32) -> (i32, i32) {
    %c0_i32 = arith.constant 0 : i32
    %c0_i32_0 = arith.constant 0 : i32
    return %arg0, %c0_i32 : i32, i32
  }
  func.func @transform_1(%arg0: i32) -> (i32, i32) {
    %c0_i32 = arith.constant 0 : i32
    %c0_i32_0 = arith.constant 0 : i32
    %c0_i32_1 = arith.constant 0 : i32
    return %c0_i32, %c0_i32_0 : i32, i32
  }
  func.func @transform_2(%arg0: i32) -> (i32, i32) {
    %c0_i32 = arith.constant 0 : i32
    %c0_i32_0 = arith.constant 0 : i32
    %c0_i32_1 = arith.constant 0 : i32
    return %c0_i32, %c0_i32_0 : i32, i32
  }
  func.func @transform_3(%arg0: i32) -> (i32, i32) {
    %c0_i32 = arith.constant 0 : i32
    %c0_i32_0 = arith.constant 0 : i32
    %c0_i32_1 = arith.constant 0 : i32
    return %c0_i32, %c0_i32_0 : i32, i32
  }
  func.func @transform_4(%arg0: i32) -> (i32, i32) {
    %c0_i32 = arith.constant 0 : i32
    %c0_i32_0 = arith.constant 0 : i32
    return %arg0, %c0_i32 : i32, i32
  }
}

module attributes {stable_mosaic.version = 11 : i64} {
  func.func @_fused_gemm_kernel(%arg0: i32, %arg1: memref<64x128xbf16, #tpu.memory_space<vmem>>, %arg2: memref<128x128xbf16, #tpu.memory_space<vmem>>, %arg3: memref<1x128xf32, #tpu.memory_space<vmem>>, %arg4: memref<128x128xf32, #tpu.memory_space<vmem>>, %arg5: memref<64x128xf32, #tpu.memory_space<vmem>>) attributes {dimension_semantics = [#tpu.dimension_semantics<parallel>], iteration_bounds = array<i64: 2>, scalar_prefetch = 0 : i64, scratch_operands = 0 : i64, tpu.core_type = #tpu.core_type<tc>, window_params = [{transform_indices = @transform_0, window_bounds = array<i64: 64, 128>}, {pipeline_mode = #tpu.pipeline_mode<synchronous>, transform_indices = @transform_1, window_bounds = array<i64: 128, 128>}, {pipeline_mode = #tpu.pipeline_mode<synchronous>, transform_indices = @transform_2, window_bounds = array<i64: 1, 128>}, {pipeline_mode = #tpu.pipeline_mode<synchronous>, transform_indices = @transform_3, window_bounds = array<i64: 128, 128>}, {transform_indices = @transform_4, window_bounds = array<i64: 64, 128>}]} {
    %c0 = arith.constant 0 : index
    %c0_0 = arith.constant 0 : index
    %0 = vector.load %arg1[%c0, %c0_0] : memref<64x128xbf16, #tpu.memory_space<vmem>>, vector<64x128xbf16>
    %c0_1 = arith.constant 0 : index
    %c0_2 = arith.constant 0 : index
    %1 = vector.load %arg2[%c0_1, %c0_2] : memref<128x128xbf16, #tpu.memory_space<vmem>>, vector<128x128xbf16>
    %cst = arith.constant dense<0.000000e+00> : vector<64x128xf32>
    %2 = tpu.matmul %0, %1, %cst {dimension_numbers = #tpu.dot_dimension_numbers<[1], [0], [0], [1], [0, 0, 1, 1], [], []>} : vector<64x128xbf16>, vector<128x128xbf16>, vector<64x128xf32> -> vector<64x128xf32>
    %c0_3 = arith.constant 0 : index
    %c0_4 = arith.constant 0 : index
    %3 = vector.load %arg3[%c0_3, %c0_4] : memref<1x128xf32, #tpu.memory_space<vmem>>, vector<1x128xf32>
    %4 = vector.broadcast %3 : vector<1x128xf32> to vector<64x128xf32>
    %5 = arith.addf %2, %4 : vector<64x128xf32>
    %cst_5 = arith.constant dense<0.000000e+00> : vector<128xf32>
    %6 = vector.multi_reduction <add>, %5, %cst_5 [0] : vector<64x128xf32> to vector<128xf32>
    %7 = vector.shape_cast %6 : vector<128xf32> to vector<1x128xf32>
    %cst_6 = arith.constant 6.400000e+01 : f32
    %8 = vector.broadcast %cst_6 : f32 to vector<1x128xf32>
    %9 = arith.divf %7, %8 : vector<1x128xf32>
    %c0_7 = arith.constant 0 : index
    %c0_8 = arith.constant 0 : index
    %10 = vector.load %arg4[%c0_7, %c0_8] : memref<128x128xf32, #tpu.memory_space<vmem>>, vector<128x128xf32>
    %cst_9 = arith.constant dense<0.000000e+00> : vector<1x128xf32>
    %11 = tpu.matmul %9, %10, %cst_9 {dimension_numbers = #tpu.dot_dimension_numbers<[1], [0], [0], [1], [0, 0, 1, 1], [], []>} : vector<1x128xf32>, vector<128x128xf32>, vector<1x128xf32> -> vector<1x128xf32>
    %12 = vector.broadcast %11 : vector<1x128xf32> to vector<64x128xf32>
    %13 = arith.subf %5, %12 : vector<64x128xf32>
    %14 = arith.mulf %13, %13 : vector<64x128xf32>
    %cst_10 = arith.constant dense<0.000000e+00> : vector<128xf32>
    %15 = vector.multi_reduction <add>, %14, %cst_10 [0] : vector<64x128xf32> to vector<128xf32>
    %16 = vector.shape_cast %15 : vector<128xf32> to vector<1x128xf32>
    %cst_11 = arith.constant 6.400000e+01 : f32
    %17 = vector.broadcast %cst_11 : f32 to vector<1x128xf32>
    %18 = arith.divf %16, %17 : vector<1x128xf32>
    %c0_12 = arith.constant 0 : index
    %c0_13 = arith.constant 0 : index
    %19 = vector.load %arg4[%c0_12, %c0_13] : memref<128x128xf32, #tpu.memory_space<vmem>>, vector<128x128xf32>
    %cst_14 = arith.constant dense<0.000000e+00> : vector<1x128xf32>
    %20 = tpu.matmul %18, %19, %cst_14 {dimension_numbers = #tpu.dot_dimension_numbers<[1], [0], [0], [1], [0, 0, 1, 1], [], []>} : vector<1x128xf32>, vector<128x128xf32>, vector<1x128xf32> -> vector<1x128xf32>
    %cst_15 = arith.constant 9.99999974E-6 : f32
    %21 = vector.broadcast %cst_15 : f32 to vector<1x128xf32>
    %22 = arith.addf %20, %21 : vector<1x128xf32>
    %23 = math.rsqrt %22 : vector<1x128xf32>
    %24 = vector.broadcast %23 : vector<1x128xf32> to vector<64x128xf32>
    %25 = arith.mulf %13, %24 : vector<64x128xf32>
    %cst_16 = arith.constant 0.000000e+00 : f32
    %26 = vector.broadcast %cst_16 : f32 to vector<64x128xf32>
    %27 = arith.maximumf %25, %26 : vector<64x128xf32>
    %c0_17 = arith.constant 0 : index
    %c0_18 = arith.constant 0 : index
    %28 = vector.load %arg5[%c0_17, %c0_18] : memref<64x128xf32, #tpu.memory_space<vmem>>, vector<64x128xf32>
    tpu.vector_store %arg5[%c0_17, %c0_18], %27 {strides = array<i32>} : memref<64x128xf32, #tpu.memory_space<vmem>>, vector<64x128xf32>,
    return
  }
  func.func @transform_0(%arg0: i32) -> (i32, i32) {
    %c0_i32 = arith.constant 0 : i32
    %c0_i32_0 = arith.constant 0 : i32
    return %arg0, %c0_i32 : i32, i32
  }
  func.func @transform_1(%arg0: i32) -> (i32, i32) {
    %c0_i32 = arith.constant 0 : i32
    %c0_i32_0 = arith.constant 0 : i32
    %c0_i32_1 = arith.constant 0 : i32
    return %c0_i32, %c0_i32_0 : i32, i32
  }
  func.func @transform_2(%arg0: i32) -> (i32, i32) {
    %c0_i32 = arith.constant 0 : i32
    %c0_i32_0 = arith.constant 0 : i32
    %c0_i32_1 = arith.constant 0 : i32
    return %c0_i32, %c0_i32_0 : i32, i32
  }
  func.func @transform_3(%arg0: i32) -> (i32, i32) {
    %c0_i32 = arith.constant 0 : i32
    %c0_i32_0 = arith.constant 0 : i32
    %c0_i32_1 = arith.constant 0 : i32
    return %c0_i32, %c0_i32_0 : i32, i32
  }
  func.func @transform_4(%arg0: i32) -> (i32, i32) {
    %c0_i32 = arith.constant 0 : i32
    %c0_i32_0 = arith.constant 0 : i32
    return %arg0, %c0_i32 : i32, i32
  }
}

module attributes {stable_mosaic.version = 11 : i64} {
  func.func @_fused_gemm_kernel(%arg0: i32, %arg1: memref<256x512xbf16, #tpu.memory_space<vmem>>, %arg2: memref<512x128xbf16, #tpu.memory_space<vmem>>, %arg3: memref<1x128xf32, #tpu.memory_space<vmem>>, %arg4: memref<256x128xf32, #tpu.memory_space<vmem>>) attributes {dimension_semantics = [#tpu.dimension_semantics<parallel>], iteration_bounds = array<i64: 2>, scalar_prefetch = 0 : i64, scratch_operands = 0 : i64, tpu.core_type = #tpu.core_type<tc>, window_params = [{transform_indices = @transform_0, window_bounds = array<i64: 256, 512>}, {pipeline_mode = #tpu.pipeline_mode<synchronous>, transform_indices = @transform_1, window_bounds = array<i64: 512, 128>}, {pipeline_mode = #tpu.pipeline_mode<synchronous>, transform_indices = @transform_2, window_bounds = array<i64: 1, 128>}, {transform_indices = @transform_3, window_bounds = array<i64: 256, 128>}]} {
    %c0 = arith.constant 0 : index
    %c0_0 = arith.constant 0 : index
    %0 = vector.load %arg1[%c0, %c0_0] : memref<256x512xbf16, #tpu.memory_space<vmem>>, vector<256x512xbf16>
    %c0_1 = arith.constant 0 : index
    %c0_2 = arith.constant 0 : index
    %1 = vector.load %arg2[%c0_1, %c0_2] : memref<512x128xbf16, #tpu.memory_space<vmem>>, vector<512x128xbf16>
    %cst = arith.constant dense<0.000000e+00> : vector<256x128xf32>
    %2 = tpu.matmul %0, %1, %cst {dimension_numbers = #tpu.dot_dimension_numbers<[1], [0], [0], [1], [0, 0, 1, 1], [], []>} : vector<256x512xbf16>, vector<512x128xbf16>, vector<256x128xf32> -> vector<256x128xf32>
    %c0_3 = arith.constant 0 : index
    %c0_4 = arith.constant 0 : index
    %3 = vector.load %arg3[%c0_3, %c0_4] : memref<1x128xf32, #tpu.memory_space<vmem>>, vector<1x128xf32>
    %4 = vector.broadcast %3 : vector<1x128xf32> to vector<256x128xf32>
    %5 = arith.addf %2, %4 : vector<256x128xf32>
    %6 = math.tanh %5 : vector<256x128xf32>
    %c0_5 = arith.constant 0 : index
    %c0_6 = arith.constant 0 : index
    %7 = vector.load %arg4[%c0_5, %c0_6] : memref<256x128xf32, #tpu.memory_space<vmem>>, vector<256x128xf32>
    tpu.vector_store %arg4[%c0_5, %c0_6], %6 {strides = array<i32>} : memref<256x128xf32, #tpu.memory_space<vmem>>, vector<256x128xf32>,
    return
  }
  func.func @transform_0(%arg0: i32) -> (i32, i32) {
    %c0_i32 = arith.constant 0 : i32
    %c0_i32_0 = arith.constant 0 : i32
    return %arg0, %c0_i32 : i32, i32
  }
  func.func @transform_1(%arg0: i32) -> (i32, i32) {
    %c0_i32 = arith.constant 0 : i32
    %c0_i32_0 = arith.constant 0 : i32
    %c0_i32_1 = arith.constant 0 : i32
    return %c0_i32, %c0_i32_0 : i32, i32
  }
  func.func @transform_2(%arg0: i32) -> (i32, i32) {
    %c0_i32 = arith.constant 0 : i32
    %c0_i32_0 = arith.constant 0 : i32
    %c0_i32_1 = arith.constant 0 : i32
    return %c0_i32, %c0_i32_0 : i32, i32
  }
  func.func @transform_3(%arg0: i32) -> (i32, i32) {
    %c0_i32 = arith.constant 0 : i32
    %c0_i32_0 = arith.constant 0 : i32
    return %arg0, %c0_i32 : i32, i32
  }
}

</mosaic_0001>

<bundles_post_ra>
// kernel: generator_forward.10
= control target key start
LH: loop header
LB: loop body
LE: loop exit
PB: predicated region body
PF: predicated region fallthrough
CT: control target
= control target key end

     0   :  { %s1301_s12 = smov 0   ;;  %s1828_s0 = inlined_call_operand.vmem [shape: bf16[512,256], index: 0, kind: input, shape index: {}]   ;;  %s1829_s1 = inlined_call_operand.vmem [shape: bf16[256,128], index: 1, kind: input, shape index: {}]   ;;  %s1830_s2 = inlined_call_operand.vmem [shape: f32[1,128], index: 2, kind: input, shape index: {}]   ;;  %s1831_s3 = inlined_call_operand.vmem [shape: f32[512,128], index: 3, kind: output, shape index: {}]  }
   0x1 LB: > { %s989_s13 = sadd.s32 4294967295, %s1278_s12   ;;  %p993_p0 = scmp.ge.s32.totalorder %s1278_s12, 1  ;;  %s1278_s12 = sphi %s1301_s12, %s13_s12  }
   0x2   : > { %p139_p1 = scmp.lt.s32.totalorder %s1278_s12, 3 }
   0x4   : > { %p140_p2 = pnand %p993_p0, %p139_p1 }
   0x5   : > { %s994_s26 = sshll.u32 (!%p140_p2), %s989_s13, 5 }
   0x6   : > { %143 = sbr.rel (%p140_p2) target bundleno = 481 (0x1e1), region = 32  ;;  %p165_p3 = scmp.lt.s32.totalorder (!%p140_p2), %s994_s26, 63 }
   0xb   : > { %v1233_v0 = vld [vmem:[%s1829_s1 + $0x38] sm:$0xff]  ;;  %v1232_v2 = vld [vmem:[%s1829_s1 + $0x30] sm:$0xff]  ;;  %v1231_v4 = vld [vmem:[%s1829_s1 + $0x28] sm:$0xff]  ;;  %s1833_s26 = smov (!%p165_p3, %s994_s26), 63 }
   0xc   : > { %v1241_v1 = vld [vmem:[%s1829_s1 + $0x78] sm:$0xff]  ;;  %501 = vmatpush.bf16.msra.mxu0 %v1233_v0  ;;  %v1240_v3 = vld [vmem:[%s1829_s1 + $0x70] sm:$0xff]  ;;  %1242 = vmatpush.bf16.msra.mxu2 %v1233_v0  ;;  %v1239_v5 = vld [vmem:[%s1829_s1 + $0x68] sm:$0xff]  ;;  %s1193_s13 = sshll.u32 %s1833_s26, 3 }
   0xd   : > { %590 = vmatpush.bf16.msra.mxu1 %v1241_v1  ;;  %1250 = vmatpush.bf16.msra.mxu3 %v1241_v1  ;;  %v1230_v6 = vld [vmem:[%s1829_s1 + $0x20] sm:$0xff]  ;;  %v1229_v8 = vld [vmem:[%s1829_s1 + $0x18] sm:$0xff]  ;;  %v1228_v10 = vld [vmem:[%s1829_s1 + $0x10] sm:$0xff]  ;;  %s1359_s20 = scalar_lea.vmem %s1828_s0, %s1193_s13  ;;  %s1737_s30 = scalar_lea.vmem %s1831_s3, %s1193_s13 }
   0xe   : > { %v1238_v7 = vld [vmem:[%s1829_s1 + $0x60] sm:$0xff]  ;;  %v1237_v9 = vld [vmem:[%s1829_s1 + $0x58] sm:$0xff]  ;;  %v1236_v11 = vld [vmem:[%s1829_s1 + $0x50] sm:$0xff] }
   0xf   : > { %v1227_v12 = vld [vmem:[%s1829_s1 + $0x8] sm:$0xff]  ;;  %v1226_v14 = vld [vmem:[%s1829_s1] sm:$0xff]  ;;  %v1009_v28 = vld [vmem:[%s1359_s20 + $0x10] sm:$0xf] }
  0x10   : > { %502 = vmatpush.bf16.msra.mxu0 %v1232_v2  ;;  %1243 = vmatpush.bf16.msra.mxu2 %v1232_v2  ;;  %v1235_v13 = vld [vmem:[%s1829_s1 + $0x48] sm:$0xff]  ;;  %v1234_v15 = vld [vmem:[%s1829_s1 + $0x40] sm:$0xff]  ;;  %v1197_v29 = vld [vmem:[%s1359_s20 + $0x14] sm:$0xf0] }
  0x11   : > { %591 = vmatpush.bf16.msra.mxu1 %v1240_v3  ;;  %1251 = vmatpush.bf16.msra.mxu3 %v1240_v3  ;;  %v1001_v16 = vld [vmem:[%s1359_s20] sm:$0xf]  ;;  %v1195_v17 = vld [vmem:[%s1359_s20 + $0x4] sm:$0xf0]  ;;  %v1194_v18 = vld [vmem:[%s1359_s20 + $0x4] sm:$0xf]  ;;  %v1010_v36 = vor.u32 %v1197_v29, %v1009_v28 }
  0x12   : > { %v1003_v19 = vld [vmem:[%s1359_s20 + $0x8] sm:$0xf0]  ;;  %v1065_v20 = vld [vmem:[%s1359_s20 + $0x80] sm:$0xf]  ;;  %v1211_v21 = vld [vmem:[%s1359_s20 + $0x84] sm:$0xf0]  ;;  %v1002_v24 = vor.u32 %v1195_v17, %v1001_v16 }
  0x13   : > { %v1210_v22 = vld [vmem:[%s1359_s20 + $0x84] sm:$0xf]  ;;  %v1067_v23 = vld [vmem:[%s1359_s20 + $0x88] sm:$0xf0]  ;;  %v1006_v25 = vor.u32 %v1194_v18, %v1003_v19  ;;  %v1066_v26 = vor.u32 %v1211_v21, %v1065_v20  ;;  %v1196_v30 = vld [vmem:[%s1359_s20 + $0x14] sm:$0xf] }
  0x14   : > { %503 = vmatpush.bf16.msra.mxu0 %v1231_v4  ;;  %1244 = vmatpush.bf16.msra.mxu2 %v1231_v4  ;;  %v1070_v27 = vor.u32 %v1210_v22, %v1067_v23  ;;  %v1011_v31 = vld [vmem:[%s1359_s20 + $0x18] sm:$0xf0]  ;;  %v1073_v32 = vld [vmem:[%s1359_s20 + $0x90] sm:$0xf]  ;;  %v1213_v33 = vld [vmem:[%s1359_s20 + $0x94] sm:$0xf0] }
  0x15   : > { %592 = vmatpush.bf16.msra.mxu1 %v1239_v5  ;;  %1252 = vmatpush.bf16.msra.mxu3 %v1239_v5  ;;  %v1212_v34 = vld [vmem:[%s1359_s20 + $0x94] sm:$0xf]  ;;  %v1075_v35 = vld [vmem:[%s1359_s20 + $0x98] sm:$0xf0]  ;;  %v1014_v37 = vor.u32 %v1196_v30, %v1011_v31  ;;  %v1074_v38 = vor.u32 %v1213_v33, %v1073_v32  ;;  %v1017_v40 = vld [vmem:[%s1359_s20 + $0x20] sm:$0xf] }
  0x16   : > { %v1078_v39 = vor.u32 %v1212_v34, %v1075_v35  ;;  %v1199_v41 = vld [vmem:[%s1359_s20 + $0x24] sm:$0xf0]  ;;  %v1198_v42 = vld [vmem:[%s1359_s20 + $0x24] sm:$0xf]  ;;  %v1019_v43 = vld [vmem:[%s1359_s20 + $0x28] sm:$0xf0] }
  0x17   : > { %v1081_v44 = vld [vmem:[%s1359_s20 + $0xa0] sm:$0xf]  ;;  %v1215_v45 = vld [vmem:[%s1359_s20 + $0xa4] sm:$0xf0]  ;;  %v1214_v46 = vld [vmem:[%s1359_s20 + $0xa4] sm:$0xf]  ;;  %v1018_v48 = vor.u32 %v1199_v41, %v1017_v40  ;;  %v1022_v49 = vor.u32 %v1198_v42, %v1019_v43 }
  0x18   : > { %504 = vmatpush.bf16.msra.mxu0 %v1230_v6  ;;  %1245 = vmatpush.bf16.msra.mxu2 %v1230_v6  ;;  %v1083_v47 = vld [vmem:[%s1359_s20 + $0xa8] sm:$0xf0]  ;;  %v1082_v50 = vor.u32 %v1215_v45, %v1081_v44  ;;  %v1025_v52 = vld [vmem:[%s1359_s20 + $0x30] sm:$0xf]  ;;  %v1201_v53 = vld [vmem:[%s1359_s20 + $0x34] sm:$0xf0] }
  0x19   : > { %593 = vmatpush.bf16.msra.mxu1 %v1238_v7  ;;  %1253 = vmatpush.bf16.msra.mxu3 %v1238_v7  ;;  %v1086_v51 = vor.u32 %v1214_v46, %v1083_v47  ;;  %v1200_v54 = vld [vmem:[%s1359_s20 + $0x34] sm:$0xf]  ;;  %v1027_v55 = vld [vmem:[%s1359_s20 + $0x38] sm:$0xf0]  ;;  %v1089_v56 = vld [vmem:[%s1359_s20 + $0xb0] sm:$0xf]  ;;  %v1026_v60 = vor.u32 %v1201_v53, %v1025_v52 }
  0x1a   : > { %v1217_v57 = vld [vmem:[%s1359_s20 + $0xb4] sm:$0xf0]  ;;  %v1216_v58 = vld [vmem:[%s1359_s20 + $0xb4] sm:$0xf]  ;;  %v1091_v59 = vld [vmem:[%s1359_s20 + $0xb8] sm:$0xf0]  ;;  %v1030_v61 = vor.u32 %v1200_v54, %v1027_v55 }
  0x1b   : > { %v1090_v62 = vor.u32 %v1217_v57, %v1089_v56  ;;  %v1094_v63 = vor.u32 %v1216_v58, %v1091_v59  ;;  %v1033_v0 = vld [vmem:[%s1359_s20 + $0x40] sm:$0xf]  ;;  %v1203_v1 = vld [vmem:[%s1359_s20 + $0x44] sm:$0xf0]  ;;  %v1202_v2 = vld [vmem:[%s1359_s20 + $0x44] sm:$0xf] }
  0x1c   : > { %505 = vmatpush.bf16.msra.mxu0 %v1229_v8  ;;  %1246 = vmatpush.bf16.msra.mxu2 %v1229_v8  ;;  %v1035_v3 = vld [vmem:[%s1359_s20 + $0x48] sm:$0xf0]  ;;  %v1097_v4 = vld [vmem:[%s1359_s20 + $0xc0] sm:$0xf]  ;;  %v1219_v5 = vld [vmem:[%s1359_s20 + $0xc4] sm:$0xf0]  ;;  %v1034_v8 = vor.u32 %v1203_v1, %v1033_v0 }
  0x1d   : > { %594 = vmatpush.bf16.msra.mxu1 %v1237_v9  ;;  %1254 = vmatpush.bf16.msra.mxu3 %v1237_v9  ;;  %v1218_v6 = vld [vmem:[%s1359_s20 + $0xc4] sm:$0xf]  ;;  %v1099_v7 = vld [vmem:[%s1359_s20 + $0xc8] sm:$0xf0]  ;;  %v1038_v9 = vor.u32 %v1202_v2, %v1035_v3  ;;  %v1105_v16 = vld [vmem:[%s1359_s20 + $0xd0] sm:$0xf] }
  0x1e   : > { %v1221_v17 = vld [vmem:[%s1359_s20 + $0xd4] sm:$0xf0]  ;;  %v1220_v18 = vld [vmem:[%s1359_s20 + $0xd4] sm:$0xf]  ;;  %v1107_v19 = vld [vmem:[%s1359_s20 + $0xd8] sm:$0xf0] }
  0x1f   : > { %v1106_v22 = vor.u32 %v1221_v17, %v1105_v16  ;;  %v1110_v23 = vor.u32 %v1220_v18, %v1107_v19  ;;  %v1113_v28 = vld [vmem:[%s1359_s20 + $0xe0] sm:$0xf]  ;;  %v1223_v29 = vld [vmem:[%s1359_s20 + $0xe4] sm:$0xf0]  ;;  %v1222_v30 = vld [vmem:[%s1359_s20 + $0xe4] sm:$0xf] }
  0x20   : > { %506 = vmatpush.bf16.msra.mxu0 %v1228_v10  ;;  %1247 = vmatpush.bf16.msra.mxu2 %v1228_v10  ;;  %v1098_v10 = vor.u32 %v1219_v5, %v1097_v4  ;;  %v1115_v31 = vld [vmem:[%s1359_s20 + $0xe8] sm:$0xf0]  ;;  %v1114_v34 = vor.u32 %v1223_v29, %v1113_v28  ;;  %v1121_v40 = vld [vmem:[%s1359_s20 + $0xf0] sm:$0xf]  ;;  %v1225_v41 = vld [vmem:[%s1359_s20 + $0xf4] sm:$0xf0] }
  0x21   : > { %595 = vmatpush.bf16.msra.mxu1 %v1236_v11  ;;  %1255 = vmatpush.bf16.msra.mxu3 %v1236_v11  ;;  %v1102_v11 = vor.u32 %v1218_v6, %v1099_v7  ;;  %v1118_v35 = vor.u32 %v1222_v30, %v1115_v31  ;;  %v1224_v42 = vld [vmem:[%s1359_s20 + $0xf4] sm:$0xf]  ;;  %v1123_v43 = vld [vmem:[%s1359_s20 + $0xf8] sm:$0xf0]  ;;  %v1122_v46 = vor.u32 %v1225_v41, %v1121_v40 }
  0x22   : > { %v1126_v47 = vor.u32 %v1224_v42, %v1123_v43 }
  0x24   : > { %507 = vmatpush.bf16.msra.mxu0 %v1227_v12  ;;  %1248 = vmatpush.bf16.msra.mxu2 %v1227_v12  ;;  %v1041_v12 = vld [vmem:[%s1359_s20 + $0x50] sm:$0xf] }
  0x25   : > { %596 = vmatpush.bf16.msra.mxu1 %v1235_v13  ;;  %1256 = vmatpush.bf16.msra.mxu3 %v1235_v13  ;;  %v1205_v13 = vld [vmem:[%s1359_s20 + $0x54] sm:$0xf0] }
  0x26   : > { %v1042_v20 = vor.u32 %v1205_v13, %v1041_v12 }
  0x28   : > { %508 = vmatpush.bf16.msra.mxu0 %v1226_v14  ;;  %1249 = vmatpush.bf16.msra.mxu2 %v1226_v14  ;;  %v1204_v14 = vld [vmem:[%s1359_s20 + $0x54] sm:$0xf] }
  0x29   : > { %597 = vmatpush.bf16.msra.mxu1 %v1234_v15  ;;  %1257 = vmatpush.bf16.msra.mxu3 %v1234_v15  ;;  %v1043_v15 = vld [vmem:[%s1359_s20 + $0x58] sm:$0xf0] }
  0x2a   : > { %v1046_v21 = vor.u32 %v1204_v14, %v1043_v15 }
  0x2b   : > { %509 = vmatmul.bf16.vlgmr.msra.gmra.mxu0 %v1002_v24  ;;  %549 = vmatmul.bf16.vlgmr.msra.gmra.mxu2 %v1066_v26  ;;  %v1049_v24 = vld [vmem:[%s1359_s20 + $0x60] sm:$0xf]  ;;  %v1206_v26 = vld [vmem:[%s1359_s20 + $0x64] sm:$0xf] }
  0x2c   : > { %598 = vmatmul.bf16.vlgmr.msra.gmra.mxu1 %v1006_v25  ;;  %638 = vmatmul.bf16.vlgmr.msra.gmra.mxu3 %v1070_v27  ;;  %v1207_v25 = vld [vmem:[%s1359_s20 + $0x64] sm:$0xf0]  ;;  %v1051_v27 = vld [vmem:[%s1359_s20 + $0x68] sm:$0xf0] }
  0x2d   : > { %v1050_v32 = vor.u32 %v1207_v25, %v1049_v24  ;;  %v1054_v33 = vor.u32 %v1206_v26, %v1051_v27 }
  0x3b   : > { %514 = vmatmul.bf16.gmra.mxu0 %v1010_v36  ;;  %554 = vmatmul.bf16.gmra.mxu2 %v1074_v38  ;;  %v1057_v36 = vld [vmem:[%s1359_s20 + $0x70] sm:$0xf]  ;;  %v1208_v38 = vld [vmem:[%s1359_s20 + $0x74] sm:$0xf] }
  0x3c   : > { %603 = vmatmul.bf16.gmra.mxu1 %v1014_v37  ;;  %643 = vmatmul.bf16.gmra.mxu3 %v1078_v39  ;;  %v1209_v37 = vld [vmem:[%s1359_s20 + $0x74] sm:$0xf0]  ;;  %v1059_v39 = vld [vmem:[%s1359_s20 + $0x78] sm:$0xf0] }
  0x3d   : > { %v1058_v44 = vor.u32 %v1209_v37, %v1057_v36  ;;  %v1062_v45 = vor.u32 %v1208_v38, %v1059_v39 }
  0x4b   : > { %519 = vmatmul.bf16.gmra.mxu0 %v1018_v48  ;;  %559 = vmatmul.bf16.gmra.mxu2 %v1082_v50  ;;  %v1434_v48 = vld [vmem:[%s1830_s2] ss:$0 sm:$0xff] }
  0x4c   : > { %608 = vmatmul.bf16.gmra.mxu1 %v1022_v49  ;;  %648 = vmatmul.bf16.gmra.mxu3 %v1086_v51 }
  0x5b   : > { %524 = vmatmul.bf16.gmra.mxu0 %v1026_v60  ;;  %564 = vmatmul.bf16.gmra.mxu2 %v1090_v62 }
  0x5c   : > { %613 = vmatmul.bf16.gmra.mxu1 %v1030_v61  ;;  %653 = vmatmul.bf16.gmra.mxu3 %v1094_v63 }
  0x6b   : > { %529 = vmatmul.bf16.gmra.mxu0 %v1034_v8  ;;  %569 = vmatmul.bf16.gmra.mxu2 %v1098_v10 }
  0x6c   : > { %618 = vmatmul.bf16.gmra.mxu1 %v1038_v9  ;;  %658 = vmatmul.bf16.gmra.mxu3 %v1102_v11 }
  0x7b   : > { %534 = vmatmul.bf16.gmra.mxu0 %v1042_v20  ;;  %574 = vmatmul.bf16.gmra.mxu2 %v1106_v22 }
  0x7c   : > { %623 = vmatmul.bf16.gmra.mxu1 %v1046_v21  ;;  %663 = vmatmul.bf16.gmra.mxu3 %v1110_v23 }
  0x8b   : > { %539 = vmatmul.bf16.gmra.mxu0 %v1050_v32  ;;  %579 = vmatmul.bf16.gmra.mxu2 %v1114_v34 }
  0x8c   : > { %628 = vmatmul.bf16.gmra.mxu1 %v1054_v33  ;;  %668 = vmatmul.bf16.gmra.mxu3 %v1118_v35 }
  0x9b   : > { %544 = vmatmul.bf16.gmra.mxu0 %v1058_v44  ;;  %584 = vmatmul.bf16.gmra.mxu2 %v1122_v46 }
  0x9c   : > { %633 = vmatmul.bf16.gmra.mxu1 %v1062_v45  ;;  %673 = vmatmul.bf16.gmra.mxu3 %v1126_v47 }
  0xa8   : > { %v510_v49 = vpop.f32.mrf.mxu0 }
  0xa9   : > { %v599_v50 = vpop.f32.mrf.mxu1  ;;  %v511_v51 = vadd.f32 %v1434_v48, %v510_v49 }
  0xab   : > { %v1437_v52 = vadd.f32 %v599_v50, %v511_v51 }
  0xae   : > { %v550_v53 = vpop.f32.mrf.mxu2 }
  0xaf   : > { %v639_v54 = vpop.f32.mrf.mxu3  ;;  %v551_v57 = vadd.f32 %v1434_v48, %v550_v53 }
  0xb0   : > { %v512_v55 = vpop.f32.mrf.mxu0 }
  0xb1   : > { %v601_v56 = vpop.f32.mrf.mxu1  ;;  %v513_v58 = vadd.f32 %v1434_v48, %v512_v55  ;;  %v1441_v59 = vadd.f32 %v639_v54, %v551_v57 }
  0xb3   : > { %v1443_v60 = vadd.f32 %v601_v56, %v513_v58 }
  0xb5   : > { %v679_v53 = vadd.f32 %v1443_v60, %v1437_v52 }
  0xb6   : > { %v552_v61 = vpop.f32.mrf.mxu2 }
  0xb7   : > { %v641_v62 = vpop.f32.mrf.mxu3  ;;  %v553_v1 = vadd.f32 %v1434_v48, %v552_v61 }
  0xb8   : > { %v515_v63 = vpop.f32.mrf.mxu0 }
  0xb9   : > { %v604_v0 = vpop.f32.mrf.mxu1  ;;  %v516_v2 = vadd.f32 %v1434_v48, %v515_v63  ;;  %v1447_v3 = vadd.f32 %v641_v62, %v553_v1 }
  0xbb   : > { %v1449_v4 = vadd.f32 %v604_v0, %v516_v2 }
  0xbd   : > { %v680_v56 = vadd.f32 %v679_v53, %v1449_v4 }
  0xbe   : > { %v555_v5 = vpop.f32.mrf.mxu2 }
  0xbf   : > { %v644_v6 = vpop.f32.mrf.mxu3  ;;  %v556_v9 = vadd.f32 %v1434_v48, %v555_v5 }
  0xc0   : > { %v517_v7 = vpop.f32.mrf.mxu0 }
  0xc1   : > { %v606_v8 = vpop.f32.mrf.mxu1  ;;  %v518_v10 = vadd.f32 %v1434_v48, %v517_v7  ;;  %v1453_v11 = vadd.f32 %v644_v6, %v556_v9 }
  0xc3   : > { %v1455_v12 = vadd.f32 %v606_v8, %v518_v10 }
  0xc5   : > { %v681_v58 = vadd.f32 %v680_v56, %v1455_v12 }
  0xc6   : > { %v557_v13 = vpop.f32.mrf.mxu2 }
  0xc7   : > { %v646_v14 = vpop.f32.mrf.mxu3  ;;  %v558_v17 = vadd.f32 %v1434_v48, %v557_v13 }
  0xc8   : > { %v520_v15 = vpop.f32.mrf.mxu0 }
  0xc9   : > { %v609_v16 = vpop.f32.mrf.mxu1  ;;  %v521_v18 = vadd.f32 %v1434_v48, %v520_v15  ;;  %v1459_v19 = vadd.f32 %v646_v14, %v558_v17 }
  0xcb   : > { %v1461_v20 = vadd.f32 %v609_v16, %v521_v18 }
  0xcd   : > { %v682_v0 = vadd.f32 %v681_v58, %v1461_v20 }
  0xce   : > { %v560_v21 = vpop.f32.mrf.mxu2 }
  0xcf   : > { %v561_v24 = vadd.f32 %v1434_v48, %v560_v21  ;;  %v649_v25 = vpop.f32.mrf.mxu3 }
  0xd0   : > { %v522_v22 = vpop.f32.mrf.mxu0 }
  0xd1   : > { %v611_v23 = vpop.f32.mrf.mxu1  ;;  %v1464_v26 = vadd.f32 %v649_v25, %v561_v24  ;;  %v523_v54 = vadd.f32 %v1434_v48, %v522_v22 }
  0xd3   : > { %v1494_v61 = vadd.f32 %v611_v23, %v523_v54 }
  0xd5   : > { %v683_v7 = vadd.f32 %v682_v0, %v1494_v61 }
  0xd6   : > { %v1466_v27 = vpop.f32.mrf.mxu2 }
  0xd7   : > { %v1468_v30 = vpop.f32.mrf.mxu3 }
  0xd8   : > { %v525_v28 = vpop.f32.mrf.mxu0 }
  0xd9   : > { %v614_v29 = vpop.f32.mrf.mxu1  ;;  %v526_v57 = vadd.f32 %v1434_v48, %v525_v28 }
  0xdb   : > { %v1500_v1 = vadd.f32 %v614_v29, %v526_v57 }
  0xdd   : > { %v684_v10 = vadd.f32 %v683_v7, %v1500_v1 }
  0xde   : > { %v1470_v33 = vpop.f32.mrf.mxu2 }
  0xdf   : > { %v1472_v34 = vpop.f32.mrf.mxu3 }
  0xe0   : > { %v527_v31 = vpop.f32.mrf.mxu0 }
  0xe1   : > { %v616_v32 = vpop.f32.mrf.mxu1  ;;  %v528_v62 = vadd.f32 %v1434_v48, %v527_v31 }
  0xe3   : > { %v1504_v8 = vadd.f32 %v616_v32, %v528_v62 }
  0xe5   : > { %v685_v16 = vadd.f32 %v684_v10, %v1504_v8  ;;  %v566_v10 = vadd.f32 %v1434_v48, %v1470_v33 }
  0xe6   : > { %v1474_v37 = vpop.f32.mrf.mxu2 }
  0xe7   : > { %v1476_v38 = vpop.f32.mrf.mxu3 }
  0xe8   : > { %v530_v35 = vpop.f32.mrf.mxu0 }
  0xe9   : > { %v619_v36 = vpop.f32.mrf.mxu1  ;;  %v531_v2 = vadd.f32 %v1434_v48, %v530_v35 }
  0xeb   : > { %v1508_v13 = vadd.f32 %v619_v36, %v531_v2 }
  0xed   : > { %v686_v21 = vadd.f32 %v685_v16, %v1508_v13 }
  0xee   : > { %v1478_v41 = vpop.f32.mrf.mxu2 }
  0xef   : > { %v1480_v44 = vpop.f32.mrf.mxu3 }
  0xf0   : > { %v532_v39 = vpop.f32.mrf.mxu0 }
  0xf1   : > { %v621_v40 = vpop.f32.mrf.mxu1  ;;  %v533_v9 = vadd.f32 %v1434_v48, %v532_v39 }
  0xf3   : > { %v1512_v17 = vadd.f32 %v621_v40, %v533_v9 }
  0xf5   : > { %v687_v29 = vadd.f32 %v686_v21, %v1512_v17 }
  0xf6   : > { %v1482_v45 = vpop.f32.mrf.mxu2 }
  0xf7   : > { %v1484_v49 = vpop.f32.mrf.mxu3  ;;  %v573_v33 = vadd.f32 %v1434_v48, %v1482_v45 }
  0xf8   : > { %v535_v42 = vpop.f32.mrf.mxu0 }
  0xf9   : > { %v624_v43 = vpop.f32.mrf.mxu1  ;;  %v536_v14 = vadd.f32 %v1434_v48, %v535_v42 }
  0xfb   : > { %v1516_v22 = vadd.f32 %v624_v43, %v536_v14 }
  0xfd   : > { %v688_v35 = vadd.f32 %v687_v29, %v1516_v22 }
  0xfe   : > { %v1489_v55 = vpop.f32.mrf.mxu2 }
  0xff   : > { %v1497_v63 = vpop.f32.mrf.mxu3 }
 0x100   : > { %v537_v46 = vpop.f32.mrf.mxu0 }
 0x101   : > { %v626_v47 = vpop.f32.mrf.mxu1  ;;  %v538_v18 = vadd.f32 %v1434_v48, %v537_v46 }
 0x103   : > { %v1520_v31 = vadd.f32 %v626_v47, %v538_v18  ;;  %v568_v18 = vadd.f32 %v1434_v48, %v1474_v37  ;;  %v576_v37 = vadd.f32 %v1434_v48, %v1489_v55 }
 0x105   : > { %v689_v40 = vadd.f32 %v688_v35, %v1520_v31  ;;  %v657_v29 = vadd.f32 %v1476_v38, %v568_v18  ;;  %v665_v38 = vadd.f32 %v1497_v63, %v576_v37 }
 0x106   : > { %v577_v15 = vpop.f32.mrf.mxu2 }
 0x107   : > { %v666_v24 = vpop.f32.mrf.mxu3 }
 0x108   : > { %v540_v50 = vpop.f32.mrf.mxu0 }
 0x109   : > { %v629_v51 = vpop.f32.mrf.mxu1  ;;  %v541_v23 = vadd.f32 %v1434_v48, %v540_v50 }
 0x10b   : > { %v1524_v36 = vadd.f32 %v629_v51, %v541_v23  ;;  %v655_v23 = vadd.f32 %v1472_v34, %v566_v10  ;;  %v662_v34 = vadd.f32 %v1484_v49, %v573_v33 }
 0x10d   : > { %v690_v46 = vadd.f32 %v689_v40, %v1524_v36  ;;  %v578_v40 = vadd.f32 %v1434_v48, %v577_v15 }
 0x10e   : > { %v580_v43 = vpop.f32.mrf.mxu2 }
 0x10f   : > { %v669_v57 = vpop.f32.mrf.mxu3 }
 0x110   : > { %v542_v5 = vpop.f32.mrf.mxu0 }
 0x111   : > { %v631_v6 = vpop.f32.mrf.mxu1  ;;  %v543_v32 = vadd.f32 %v1434_v48, %v542_v5 }
 0x113   : > { %v1528_v42 = vadd.f32 %v631_v6, %v543_v32  ;;  %v563_v6 = vadd.f32 %v1434_v48, %v1466_v27  ;;  %v571_v27 = vadd.f32 %v1434_v48, %v1478_v41 }
 0x115   : > { %v691_v47 = vadd.f32 %v690_v46, %v1528_v42  ;;  %v652_v16 = vadd.f32 %v1468_v30, %v563_v6  ;;  %v660_v30 = vadd.f32 %v1480_v44, %v571_v27  ;;  %v1280_v46 = vmov 256.0  }
 0x116   : > { %v582_v2 = vpop.f32.mrf.mxu2  ;;  %1268 = vrcp.f32 %v1280_v46 }
 0x117   : > { %v671_v9 = vpop.f32.mrf.mxu3  ;;  %v583_v44 = vadd.f32 %v1434_v48, %v582_v2 }
 0x118   : > { %v545_v25 = vpop.f32.mrf.mxu0 }
 0x119   : > { %v634_v28 = vpop.f32.mrf.mxu1  ;;  %v546_v39 = vadd.f32 %v1434_v48, %v545_v25  ;;  %v672_v15 = vadd.f32 %v671_v9, %v583_v44 }
 0x11b   : > { %v1531_v50 = vadd.f32 %v634_v28, %v546_v39 }
 0x11c   : > { %v1269_v49 = vpop.eup %1268 }
 0x11d   : > { %v692_v51 = vadd.f32 %v691_v47, %v1531_v50  ;;  %v667_v47 = vadd.f32 %v666_v24, %v578_v40  ;;  %v717_v10 = vmul.f32 256.0, %v1269_v49  ;;  %vm721_vm0 = vweird.f32 %v1269_v49 }
 0x11e   : > { %v585_v28 = vpop.f32.mrf.mxu2 }
 0x11f   : > { %v674_v39 = vpop.f32.mrf.mxu3  ;;  %v718_v18 = vsub.f32 1.0, %v717_v10 }
 0x120   : > { %v547_v53 = vpop.f32.mrf.mxu0 }
 0x121   : > { %v548_v54 = vadd.f32 %v1434_v48, %v547_v53  ;;  %v636_v56 = vpop.f32.mrf.mxu1  ;;  %v581_v53 = vadd.f32 %v1434_v48, %v580_v43  ;;  %v719_v27 = vmul.f32 %v1269_v49, %v718_v18 }
 0x123   : > { %v1536_v58 = vadd.f32 %v636_v56, %v548_v54  ;;  %v670_v55 = vadd.f32 %v669_v57, %v581_v53  ;;  %v720_v33 = vadd.f32 %v1269_v49, %v719_v27 }
 0x125   : > { %v693_v62 = vadd.f32 %v692_v51, %v1536_v58  ;;  %v1567_v9 = vsel %vm721_vm0, %v1269_v49, %v720_v33 }
 0x126   : > { %v587_v56 = vpop.f32.mrf.mxu2 }
 0x127   : > { %v694_v0 = vadd.f32 %v693_v62, %v1441_v59  ;;  %v586_v62 = vadd.f32 %v1434_v48, %v585_v28  ;;  %v676_v6 = vpop.f32.mrf.mxu3 }
 0x129   : > { %v695_v5 = vadd.f32 %v694_v0, %v1447_v3  ;;  %v675_v63 = vadd.f32 %v674_v39, %v586_v62 }
 0x12b   : > { %v696_v7 = vadd.f32 %v695_v5, %v1453_v11  ;;  %v588_v5 = vadd.f32 %v1434_v48, %v587_v56 }
 0x12d   : > { %v697_v14 = vadd.f32 %v696_v7, %v1459_v19 }
 0x12f   : > { %v698_v21 = vadd.f32 %v697_v14, %v1464_v26  ;;  %v677_v14 = vadd.f32 %v676_v6, %v588_v5 }
 0x131   : > { %v699_v25 = vadd.f32 %v698_v21, %v652_v16 }
 0x133   : > { %v700_v32 = vadd.f32 %v699_v25, %v655_v23 }
 0x135   : > { %v701_v35 = vadd.f32 %v700_v32, %v657_v29 }
 0x137   : > { %v702_v41 = vadd.f32 %v701_v35, %v660_v30 }
 0x139   : > { %v703_v45 = vadd.f32 %v702_v41, %v662_v34 }
 0x13b   : > { %v704_v54 = vadd.f32 %v703_v45, %v665_v38 }
 0x13d   : > { %v705_v51 = vadd.f32 %v704_v54, %v667_v47 }
 0x13f   : > { %v706_v0 = vadd.f32 %v705_v51, %v670_v55 }
 0x141   : > { %v707_v7 = vadd.f32 %v706_v0, %v672_v15 }
 0x143   : > { %v708_v43 = vadd.f32 %v707_v7, %v675_v63 }
 0x145   : > { %v709_v24 = vadd.f32 %v708_v43, %v677_v14 }
 0x147   : > { %v710_v21 = vrot.slane %v709_v24, 4 }
 0x149   : > { %v711_v2 = vadd.f32 %v710_v21, %v709_v24 }
 0x14b   : > { %v712_v57 = vrot.slane %v711_v2, 2 }
 0x14d   : > { %v713_v25 = vadd.f32 %v712_v57, %v711_v2 }
 0x14f   : > { %v714_v28 = vrot.slane %v713_v25, 1 }
 0x151   : > { %v715_v32 = vadd.f32 %v714_v28, %v713_v25 }
 0x153   : > { %v723_v48 = vmul.f32 %v1567_v9, %v715_v32 }
 0x155   : > { %v1571_v37 = vsub.f32 %v1531_v50, %v723_v48  ;;  %v1574_v35 = vsub.f32 %v1536_v58, %v723_v48  ;;  %v1577_v39 = vsub.f32 %v1441_v59, %v723_v48  ;;  %v1580_v40 = vsub.f32 %v1447_v3, %v723_v48 }
 0x156   : > { %v1583_v41 = vsub.f32 %v1453_v11, %v723_v48  ;;  %v1586_v46 = vsub.f32 %v1459_v19, %v723_v48  ;;  %v1589_v53 = vsub.f32 %v1464_v26, %v723_v48  ;;  %v1591_v50 = vsub.f32 %v652_v16, %v723_v48 }
 0x157   : > { %v1593_v45 = vsub.f32 %v655_v23, %v723_v48  ;;  %v1595_v58 = vsub.f32 %v657_v29, %v723_v48  ;;  %v1597_v59 = vsub.f32 %v660_v30, %v723_v48  ;;  %v1599_v54 = vsub.f32 %v662_v34, %v723_v48 }
 0x158   : > { %v1601_v3 = vsub.f32 %v665_v38, %v723_v48  ;;  %v1603_v11 = vsub.f32 %v667_v47, %v723_v48  ;;  %v1605_v44 = vsub.f32 %v670_v55, %v723_v48  ;;  %v1607_v19 = vsub.f32 %v672_v15, %v723_v48 }
 0x159   : > { %v1609_v26 = vsub.f32 %v675_v63, %v723_v48  ;;  %v1611_v16 = vsub.f32 %v677_v14, %v723_v48  ;;  %v1614_v23 = vsub.f32 %v1437_v52, %v723_v48  ;;  %v1617_v29 = vsub.f32 %v1443_v60, %v723_v48 }
 0x15a   : > { %v1620_v30 = vsub.f32 %v1449_v4, %v723_v48  ;;  %v1627_v47 = vsub.f32 %v1455_v12, %v723_v48  ;;  %v1630_v56 = vsub.f32 %v1461_v20, %v723_v48  ;;  %v1635_v55 = vsub.f32 %v1494_v61, %v723_v48 }
 0x15b   : > { %v756_v34 = vmul.f32 %v1614_v23, %v1614_v23  ;;  %v757_v38 = vmul.f32 %v1617_v29, %v1617_v29  ;;  %v1640_v62 = vsub.f32 %v1500_v1, %v723_v48  ;;  %v1645_v20 = vsub.f32 %v1504_v8, %v723_v48 }
 0x15c   : > { %v758_v52 = vmul.f32 %v1620_v30, %v1620_v30  ;;  %v759_v4 = vmul.f32 %v1627_v47, %v1627_v47  ;;  %v760_v12 = vmul.f32 %v1630_v56, %v1630_v56  ;;  %v761_v0 = vmul.f32 %v1635_v55, %v1635_v55 }
 0x15d   : > { %v788_v60 = vadd.f32 %v757_v38, %v756_v34  ;;  %v1650_v61 = vsub.f32 %v1508_v13, %v723_v48  ;;  %v762_v5 = vmul.f32 %v1640_v62, %v1640_v62  ;;  %v1655_v1 = vsub.f32 %v1512_v17, %v723_v48 }
 0x15e   : > { %v763_v7 = vmul.f32 %v1645_v20, %v1645_v20  ;;  %v1660_v8 = vsub.f32 %v1516_v22, %v723_v48  ;;  %v1665_v13 = vsub.f32 %v1520_v31, %v723_v48  ;;  %v1670_v17 = vsub.f32 %v1524_v36, %v723_v48 }
 0x15f   : > { %v789_v51 = vadd.f32 %v788_v60, %v758_v52  ;;  %v764_v10 = vmul.f32 %v1650_v61, %v1650_v61  ;;  %v765_v14 = vmul.f32 %v1655_v1, %v1655_v1  ;;  %v1675_v22 = vsub.f32 %v1528_v42, %v723_v48 }
 0x160   : > { %v766_v18 = vmul.f32 %v1660_v8, %v1660_v8  ;;  %v767_v2 = vmul.f32 %v1665_v13, %v1665_v13  ;;  %v768_v31 = vmul.f32 %v1670_v17, %v1670_v17  ;;  %v770_v33 = vmul.f32 %v1571_v37, %v1571_v37 }
 0x161   : > { %v790_v49 = vadd.f32 %v789_v51, %v759_v4  ;;  %v769_v25 = vmul.f32 %v1675_v22, %v1675_v22  ;;  %v771_v42 = vmul.f32 %v1574_v35, %v1574_v35  ;;  %v772_v48 = vmul.f32 %v1577_v39, %v1577_v39 }
 0x162   : > { %v773_v38 = vmul.f32 %v1580_v40, %v1580_v40  ;;  %v774_v60 = vmul.f32 %v1583_v41, %v1583_v41  ;;  %v775_v51 = vmul.f32 %v1586_v46, %v1586_v46 }
 0x163   : > { %v791_v15 = vadd.f32 %v790_v49, %v760_v12  ;;  %v776_v49 = vmul.f32 %v1589_v53, %v1589_v53 }
 0x165   : > { %v792_v6 = vadd.f32 %v791_v15, %v761_v0  ;;  %v777_v15 = vmul.f32 %v1591_v50, %v1591_v50 }
 0x167   : > { %v793_v63 = vadd.f32 %v792_v6, %v762_v5  ;;  %v778_v6 = vmul.f32 %v1593_v45, %v1593_v45 }
 0x169   : > { %v794_v43 = vadd.f32 %v793_v63, %v763_v7  ;;  %v779_v63 = vmul.f32 %v1595_v58, %v1595_v58 }
 0x16b   : > { %v795_v24 = vadd.f32 %v794_v43, %v764_v10  ;;  %v780_v43 = vmul.f32 %v1597_v59, %v1597_v59 }
 0x16d   : > { %v796_v21 = vadd.f32 %v795_v24, %v765_v14  ;;  %v781_v24 = vmul.f32 %v1599_v54, %v1599_v54 }
 0x16f   : > { %v797_v27 = vadd.f32 %v796_v21, %v766_v18  ;;  %v782_v21 = vmul.f32 %v1601_v3, %v1601_v3 }
 0x171   : > { %v798_v57 = vadd.f32 %v797_v27, %v767_v2  ;;  %v783_v27 = vmul.f32 %v1603_v11, %v1603_v11 }
 0x173   : > { %v799_v36 = vadd.f32 %v798_v57, %v768_v31  ;;  %v784_v57 = vmul.f32 %v1605_v44, %v1605_v44 }
 0x175   : > { %v800_v28 = vadd.f32 %v799_v36, %v769_v25  ;;  %v785_v36 = vmul.f32 %v1607_v19, %v1607_v19 }
 0x177   : > { %v801_v32 = vadd.f32 %v800_v28, %v770_v33  ;;  %v786_v28 = vmul.f32 %v1609_v26, %v1609_v26 }
 0x179   : > { %v802_v34 = vadd.f32 %v801_v32, %v771_v42  ;;  %v787_v32 = vmul.f32 %v1611_v16, %v1611_v16 }
 0x17b   : > { %v803_v52 = vadd.f32 %v802_v34, %v772_v48 }
 0x17d   : > { %v804_v4 = vadd.f32 %v803_v52, %v773_v38 }
 0x17f   : > { %v805_v12 = vadd.f32 %v804_v4, %v774_v60 }
 0x181   : > { %v806_v0 = vadd.f32 %v805_v12, %v775_v51 }
 0x183   : > { %v807_v5 = vadd.f32 %v806_v0, %v776_v49 }
 0x185   : > { %v808_v7 = vadd.f32 %v807_v5, %v777_v15 }
 0x187   : > { %v809_v10 = vadd.f32 %v808_v7, %v778_v6 }
 0x189   : > { %v810_v14 = vadd.f32 %v809_v10, %v779_v63 }
 0x18b   : > { %v811_v18 = vadd.f32 %v810_v14, %v780_v43 }
 0x18d   : > { %v812_v2 = vadd.f32 %v811_v18, %v781_v24 }
 0x18f   : > { %v813_v31 = vadd.f32 %v812_v2, %v782_v21 }
 0x191   : > { %v814_v25 = vadd.f32 %v813_v31, %v783_v27 }
 0x193   : > { %v815_v33 = vadd.f32 %v814_v25, %v784_v57 }
 0x195   : > { %v816_v42 = vadd.f32 %v815_v33, %v785_v36 }
 0x197   : > { %v817_v48 = vadd.f32 %v816_v42, %v786_v28 }
 0x199   : > { %v818_v34 = vadd.f32 %v817_v48, %v787_v32 }
 0x19b   : > { %v819_v38 = vrot.slane %v818_v34, 4 }
 0x19d   : > { %v820_v52 = vadd.f32 %v819_v38, %v818_v34 }
 0x19f   : > { %v821_v60 = vrot.slane %v820_v52, 2 }
 0x1a1   : > { %v822_v4 = vadd.f32 %v821_v60, %v820_v52 }
 0x1a3   : > { %v823_v51 = vrot.slane %v822_v4, 1 }
 0x1a5   : > { %v824_v12 = vadd.f32 %v823_v51, %v822_v4 }
 0x1a7   : > { %v825_v49 = vmul.f32 %v824_v12, %v1567_v9 }
 0x1a9   : > { %v826_v0 = vadd.f32 1e-05, %v825_v49 }
 0x1ab   : > { %1270 = vrsqrt.f32 %v826_v0  ;;  %vm833_vm2 = vweird.f32 %v826_v0 }
 0x1b1   : > { %v1271_v15 = vpop.eup %1270 }
 0x1b2   : > { %v828_v5 = vmul.f32 %v1271_v15, %v826_v0  ;;  %vm834_vm1 = vweird.f32 %v1271_v15 }
 0x1b3   : > { %vm835_vm3 = vmor %vm833_vm2, %vm834_vm1 }
 0x1b4   : > { %v829_v6 = vmul.f32 %v1271_v15, %v828_v5 }
 0x1b6   : > { %v830_v7 = vmul.f32 0.5, %v829_v6 }
 0x1b8   : > { %v831_v63 = vsub.f32 1.5, %v830_v7 }
 0x1ba   : > { %v832_v10 = vmul.f32 %v1271_v15, %v831_v63 }
 0x1bc   : > { %v1720_v43 = vsel %vm835_vm3, %v1271_v15, %v832_v10 }
 0x1bd   : > { %v837_v14 = vmul.f32 %v1720_v43, %v1614_v23  ;;  %v838_v9 = vmul.f32 %v1720_v43, %v1617_v29  ;;  %v839_v24 = vmul.f32 %v1720_v43, %v1620_v30  ;;  %v840_v18 = vmul.f32 %v1720_v43, %v1627_v47 }
 0x1be   : > { %v841_v21 = vmul.f32 %v1720_v43, %v1630_v56  ;;  %v842_v23 = vmul.f32 %v1720_v43, %v1635_v55  ;;  %v843_v29 = vmul.f32 %v1720_v43, %v1640_v62  ;;  %v844_v56 = vmul.f32 %v1720_v43, %v1645_v20 }
 0x1bf   : > { %v869_v30 = vmax.f32 %v837_v14, 0.0  ;;  %v870_v47 = vmax.f32 %v838_v9, 0.0  ;;  %v871_v2 = vmax.f32 %v839_v24, 0.0  ;;  %v872_v27 = vmax.f32 %v840_v18, 0.0 }
 0x1c0   : > { %v845_v31 = vmul.f32 %v1720_v43, %v1650_v61  ;;  %v873_v57 = vmax.f32 %v841_v21, 0.0  ;;  %v846_v55 = vmul.f32 %v1720_v43, %v1655_v1  ;;  %v874_v25 = vmax.f32 %v842_v23, 0.0 }
 0x1c1   : > { %901 = vst [vmem:[%s1737_s30] sm:$0xff] %v869_v30  ;;  %v847_v62 = vmul.f32 %v1720_v43, %v1660_v8  ;;  %v875_v36 = vmax.f32 %v843_v29, 0.0  ;;  %v848_v20 = vmul.f32 %v1720_v43, %v1665_v13  ;;  %v876_v33 = vmax.f32 %v844_v56, 0.0 }
 0x1c2   : > { %902 = vst [vmem:[%s1737_s30 + $0x8] sm:$0xff] %v870_v47  ;;  %v849_v61 = vmul.f32 %v1720_v43, %v1670_v17  ;;  %v877_v28 = vmax.f32 %v845_v31, 0.0  ;;  %v850_v1 = vmul.f32 %v1720_v43, %v1675_v22  ;;  %v878_v42 = vmax.f32 %v846_v55, 0.0 }
 0x1c3   : > { %903 = vst [vmem:[%s1737_s30 + $0x10] sm:$0xff] %v871_v2  ;;  %v851_v8 = vmul.f32 %v1720_v43, %v1571_v37  ;;  %v879_v32 = vmax.f32 %v847_v62, 0.0  ;;  %v852_v13 = vmul.f32 %v1720_v43, %v1574_v35  ;;  %v880_v48 = vmax.f32 %v848_v20, 0.0 }
 0x1c4   : > { %904 = vst [vmem:[%s1737_s30 + $0x18] sm:$0xff] %v872_v27  ;;  %v853_v17 = vmul.f32 %v1720_v43, %v1577_v39  ;;  %v881_v34 = vmax.f32 %v849_v61, 0.0  ;;  %v854_v22 = vmul.f32 %v1720_v43, %v1580_v40  ;;  %v882_v38 = vmax.f32 %v850_v1, 0.0 }
 0x1c5   : > { %905 = vst [vmem:[%s1737_s30 + $0x20] sm:$0xff] %v873_v57  ;;  %v855_v37 = vmul.f32 %v1720_v43, %v1583_v41  ;;  %v883_v52 = vmax.f32 %v851_v8, 0.0  ;;  %v856_v35 = vmul.f32 %v1720_v43, %v1586_v46  ;;  %v884_v60 = vmax.f32 %v852_v13, 0.0 }
 0x1c6   : > { %906 = vst [vmem:[%s1737_s30 + $0x28] sm:$0xff] %v874_v25  ;;  %v857_v39 = vmul.f32 %v1720_v43, %v1589_v53  ;;  %v885_v4 = vmax.f32 %v853_v17, 0.0  ;;  %v858_v40 = vmul.f32 %v1720_v43, %v1591_v50  ;;  %v886_v51 = vmax.f32 %v854_v22, 0.0 }
 0x1c7   : > { %907 = vst [vmem:[%s1737_s30 + $0x30] sm:$0xff] %v875_v36  ;;  %v859_v41 = vmul.f32 %v1720_v43, %v1593_v45  ;;  %v887_v12 = vmax.f32 %v855_v37, 0.0  ;;  %v860_v46 = vmul.f32 %v1720_v43, %v1595_v58  ;;  %v888_v49 = vmax.f32 %v856_v35, 0.0 }
 0x1c8   : > { %908 = vst [vmem:[%s1737_s30 + $0x38] sm:$0xff] %v876_v33  ;;  %v861_v53 = vmul.f32 %v1720_v43, %v1597_v59  ;;  %v889_v0 = vmax.f32 %v857_v39, 0.0  ;;  %v862_v50 = vmul.f32 %v1720_v43, %v1599_v54  ;;  %v890_v15 = vmax.f32 %v858_v40, 0.0 }
 0x1c9   : > { %909 = vst [vmem:[%s1737_s30 + $0x40] sm:$0xff] %v877_v28  ;;  %v863_v45 = vmul.f32 %v1720_v43, %v1601_v3  ;;  %v891_v5 = vmax.f32 %v859_v41, 0.0  ;;  %v864_v58 = vmul.f32 %v1720_v43, %v1603_v11  ;;  %v892_v59 = vmax.f32 %v860_v46, 0.0 }
 0x1ca   : > { %910 = vst [vmem:[%s1737_s30 + $0x48] sm:$0xff] %v878_v42  ;;  %v865_v6 = vmul.f32 %v1720_v43, %v1605_v44  ;;  %v893_v54 = vmax.f32 %v861_v53, 0.0  ;;  %v866_v7 = vmul.f32 %v1720_v43, %v1607_v19  ;;  %v894_v3 = vmax.f32 %v862_v50, 0.0 }
 0x1cb   : > { %911 = vst [vmem:[%s1737_s30 + $0x50] sm:$0xff] %v879_v32  ;;  %v867_v11 = vmul.f32 %v1720_v43, %v1609_v26  ;;  %v895_v63 = vmax.f32 %v863_v45, 0.0  ;;  %v868_v44 = vmul.f32 %v1720_v43, %v1611_v16  ;;  %v896_v10 = vmax.f32 %v864_v58, 0.0 }
 0x1cc   : > { %912 = vst [vmem:[%s1737_s30 + $0x58] sm:$0xff] %v880_v48  ;;  %v897_v14 = vmax.f32 %v865_v6, 0.0  ;;  %v898_v19 = vmax.f32 %v866_v7, 0.0 }
 0x1cd   : > { %913 = vst [vmem:[%s1737_s30 + $0x60] sm:$0xff] %v881_v34  ;;  %v899_v9 = vmax.f32 %v867_v11, 0.0  ;;  %v900_v24 = vmax.f32 %v868_v44, 0.0 }
 0x1ce   : > { %914 = vst [vmem:[%s1737_s30 + $0x68] sm:$0xff] %v882_v38 }
 0x1cf   : > { %915 = vst [vmem:[%s1737_s30 + $0x70] sm:$0xff] %v883_v52 }
 0x1d0   : > { %916 = vst [vmem:[%s1737_s30 + $0x78] sm:$0xff] %v884_v60 }
 0x1d1   : > { %917 = vst [vmem:[%s1737_s30 + $0x80] sm:$0xff] %v885_v4 }
 0x1d2   : > { %918 = vst [vmem:[%s1737_s30 + $0x88] sm:$0xff] %v886_v51 }
 0x1d3   : > { %919 = vst [vmem:[%s1737_s30 + $0x90] sm:$0xff] %v887_v12 }
 0x1d4   : > { %920 = vst [vmem:[%s1737_s30 + $0x98] sm:$0xff] %v888_v49 }
 0x1d5   : > { %921 = vst [vmem:[%s1737_s30 + $0xa0] sm:$0xff] %v889_v0 }
 0x1d6   : > { %922 = vst [vmem:[%s1737_s30 + $0xa8] sm:$0xff] %v890_v15 }
 0x1d7   : > { %923 = vst [vmem:[%s1737_s30 + $0xb0] sm:$0xff] %v891_v5 }
 0x1d8   : > { %924 = vst [vmem:[%s1737_s30 + $0xb8] sm:$0xff] %v892_v59 }
 0x1d9   : > { %925 = vst [vmem:[%s1737_s30 + $0xc0] sm:$0xff] %v893_v54 }
 0x1da   : > { %926 = vst [vmem:[%s1737_s30 + $0xc8] sm:$0xff] %v894_v3 }
 0x1db   : > { %927 = vst [vmem:[%s1737_s30 + $0xd0] sm:$0xff] %v895_v63 }
 0x1dc   : > { %928 = vst [vmem:[%s1737_s30 + $0xd8] sm:$0xff] %v896_v10 }
 0x1dd   : > { %929 = vst [vmem:[%s1737_s30 + $0xe0] sm:$0xff] %v897_v14 }
 0x1de   : > { %930 = vst [vmem:[%s1737_s30 + $0xe8] sm:$0xff] %v898_v19 }
 0x1df   : > { %931 = vst [vmem:[%s1737_s30 + $0xf0] sm:$0xff] %v899_v9 }
 0x1e0   : > { %932 = vst [vmem:[%s1737_s30 + $0xf8] sm:$0xff] %v900_v24 }
 0x1e1 PF: > { %s13_s12 = sadd.s32 1, %s1278_s12  }
 0x1e2   : > { %p10_p4 = scmp.ge.s32.totalorder %s13_s12, 4  }
 0x1e4   :  { %12 = sbr.rel (!%p10_p4) target bundleno = 1 (0x1), region = 62 }

// kernel: generator_forward.11
= control target key start
LH: loop header
LB: loop body
LE: loop exit
PB: predicated region body
PF: predicated region fallthrough
CT: control target
= control target key end

     0   :  { %s583_s12 = smov 0   ;;  %s631_s0 = inlined_call_operand.vmem [shape: bf16[128,128], index: 0, kind: input, shape index: {}]   ;;  %s632_s1 = inlined_call_operand.vmem [shape: bf16[128,128], index: 1, kind: input, shape index: {}]   ;;  %s633_s2 = inlined_call_operand.vmem [shape: f32[1,128], index: 2, kind: input, shape index: {}]   ;;  %s634_s3 = inlined_call_operand.vmem [shape: f32[128,128], index: 3, kind: output, shape index: {}]  }
   0x1 LB: > { %s445_s13 = sadd.s32 4294967295, %s560_s12   ;;  %p449_p0 = scmp.ge.s32.totalorder %s560_s12, 1  ;;  %s560_s12 = sphi %s583_s12, %s13_s12  }
   0x2   : > { %p138_p1 = scmp.lt.s32.totalorder %s560_s12, 3 }
   0x4   : > { %p139_p2 = pnand %p449_p0, %p138_p1 }
   0x5   : > { %s450_s22 = sshll.u32 (!%p139_p2), %s445_s13, 3 }
   0x6   : > { %142 = sbr.rel (%p139_p2) target bundleno = 271 (0x10f), region = 32  ;;  %p163_p3 = scmp.lt.s32.totalorder (!%p139_p2), %s450_s22, 15 }
   0xb   : > { %v515_v0 = vld [vmem:[%s632_s1 + $0x38] sm:$0xff]  ;;  %v514_v1 = vld [vmem:[%s632_s1 + $0x30] sm:$0xff]  ;;  %v513_v2 = vld [vmem:[%s632_s1 + $0x28] sm:$0xff]  ;;  %s636_s22 = smov (!%p163_p3, %s450_s22), 15  ;;  %v562_v20 = vmov 64.0  }
   0xc   : > { %274 = vmatpush.bf16.msra.mxu0 %v515_v0  ;;  %516 = vmatpush.bf16.msra.mxu1 %v515_v0  ;;  %v512_v3 = vld [vmem:[%s632_s1 + $0x20] sm:$0xff]  ;;  %v511_v4 = vld [vmem:[%s632_s1 + $0x18] sm:$0xff]  ;;  %v510_v5 = vld [vmem:[%s632_s1 + $0x10] sm:$0xff]  ;;  %s451_s29 = sshll.u32 %s636_s22, 2  ;;  %550 = vrcp.f32 %v562_v20  ;;  %s453_s10 = sshll.u32 %s636_s22, 3 }
   0xd   : > { %517 = vmatpush.bf16.msra.mxu2 %v515_v0  ;;  %518 = vmatpush.bf16.msra.mxu3 %v515_v0  ;;  %v509_v6 = vld [vmem:[%s632_s1 + $0x8] sm:$0xff]  ;;  %v508_v7 = vld [vmem:[%s632_s1] sm:$0xff]  ;;  %s166_s7 = scalar_lea.vmem %s631_s0, %s451_s29  ;;  %s172_s14 = scalar_lea.vmem %s634_s3, %s453_s10 }
   0xe   : > { %v504_v8 = vld [vmem:[%s166_s7] sm:$0xff]  ;;  %v505_v9 = vld [vmem:[%s166_s7 + $0x8] sm:$0xff]  ;;  %v506_v10 = vld [vmem:[%s166_s7 + $0x10] sm:$0xff] }
   0xf   : > { %v507_v11 = vld [vmem:[%s166_s7 + $0x18] sm:$0xff]  ;;  %v549_v14 = vld [vmem:[%s633_s2] ss:$0 sm:$0xff] }
  0x10   : > { %275 = vmatpush.bf16.msra.mxu0 %v514_v1  ;;  %519 = vmatpush.bf16.msra.mxu1 %v514_v1 }
  0x11   : > { %520 = vmatpush.bf16.msra.mxu2 %v514_v1  ;;  %521 = vmatpush.bf16.msra.mxu3 %v514_v1 }
  0x12   : > { %v551_v26 = vpop.eup %550 }
  0x13   : > { %v317_v33 = vmul.f32 64.0, %v551_v26  ;;  %vm321_vm0 = vweird.f32 %v551_v26 }
  0x14   : > { %276 = vmatpush.bf16.msra.mxu0 %v513_v2  ;;  %522 = vmatpush.bf16.msra.mxu1 %v513_v2 }
  0x15   : > { %523 = vmatpush.bf16.msra.mxu2 %v513_v2  ;;  %524 = vmatpush.bf16.msra.mxu3 %v513_v2  ;;  %v318_v38 = vsub.f32 1.0, %v317_v33 }
  0x17   : > { %v319_v41 = vmul.f32 %v551_v26, %v318_v38 }
  0x18   : > { %277 = vmatpush.bf16.msra.mxu0 %v512_v3  ;;  %525 = vmatpush.bf16.msra.mxu1 %v512_v3 }
  0x19   : > { %526 = vmatpush.bf16.msra.mxu2 %v512_v3  ;;  %527 = vmatpush.bf16.msra.mxu3 %v512_v3  ;;  %v320_v44 = vadd.f32 %v551_v26, %v319_v41 }
  0x1b   : > { %v322_v47 = vsel %vm321_vm0, %v551_v26, %v320_v44 }
  0x1c   : > { %278 = vmatpush.bf16.msra.mxu0 %v511_v4  ;;  %528 = vmatpush.bf16.msra.mxu1 %v511_v4 }
  0x1d   : > { %529 = vmatpush.bf16.msra.mxu2 %v511_v4  ;;  %530 = vmatpush.bf16.msra.mxu3 %v511_v4 }
  0x20   : > { %279 = vmatpush.bf16.msra.mxu0 %v510_v5  ;;  %531 = vmatpush.bf16.msra.mxu1 %v510_v5 }
  0x21   : > { %532 = vmatpush.bf16.msra.mxu2 %v510_v5  ;;  %533 = vmatpush.bf16.msra.mxu3 %v510_v5 }
  0x24   : > { %280 = vmatpush.bf16.msra.mxu0 %v509_v6  ;;  %534 = vmatpush.bf16.msra.mxu1 %v509_v6 }
  0x25   : > { %535 = vmatpush.bf16.msra.mxu2 %v509_v6  ;;  %536 = vmatpush.bf16.msra.mxu3 %v509_v6 }
  0x28   : > { %281 = vmatpush.bf16.msra.mxu0 %v508_v7  ;;  %537 = vmatpush.bf16.msra.mxu1 %v508_v7 }
  0x29   : > { %538 = vmatpush.bf16.msra.mxu2 %v508_v7  ;;  %539 = vmatpush.bf16.msra.mxu3 %v508_v7 }
  0x2b   : > { %282 = vmatmul.bf16.vlgmr.msra.gmra.mxu0 %v504_v8  ;;  %287 = vmatmul.bf16.vlgmr.msra.gmra.mxu1 %v505_v9 }
  0x2c   : > { %292 = vmatmul.bf16.vlgmr.msra.gmra.mxu2 %v506_v10  ;;  %297 = vmatmul.bf16.vlgmr.msra.gmra.mxu3 %v507_v11 }
  0xa8   : > { %v283_v12 = vpop.f32.mrf.mxu0  ;;  %v288_v13 = vpop.f32.mrf.mxu1 }
  0xa9   : > { %v284_v18 = vadd.f32 %v549_v14, %v283_v12  ;;  %v289_v22 = vadd.f32 %v549_v14, %v288_v13 }
  0xaf   : > { %v293_v15 = vpop.f32.mrf.mxu2  ;;  %v298_v16 = vpop.f32.mrf.mxu3 }
  0xb0   : > { %v285_v17 = vpop.f32.mrf.mxu0  ;;  %v290_v21 = vpop.f32.mrf.mxu1  ;;  %v294_v27 = vadd.f32 %v549_v14, %v293_v15  ;;  %v299_v34 = vadd.f32 %v549_v14, %v298_v16 }
  0xb1   : > { %v286_v19 = vadd.f32 %v549_v14, %v285_v17  ;;  %v291_v24 = vadd.f32 %v549_v14, %v290_v21 }
  0xb3   : > { %v303_v23 = vadd.f32 %v286_v19, %v284_v18 }
  0xb5   : > { %v304_v25 = vadd.f32 %v303_v23, %v289_v22 }
  0xb7   : > { %v305_v28 = vadd.f32 %v304_v25, %v291_v24  ;;  %v295_v29 = vpop.f32.mrf.mxu2  ;;  %v300_v32 = vpop.f32.mrf.mxu3 }
  0xb8   : > { %v296_v30 = vadd.f32 %v549_v14, %v295_v29  ;;  %v301_v36 = vadd.f32 %v549_v14, %v300_v32 }
  0xb9   : > { %v306_v31 = vadd.f32 %v305_v28, %v294_v27 }
  0xbb   : > { %v307_v35 = vadd.f32 %v306_v31, %v296_v30 }
  0xbd   : > { %v308_v37 = vadd.f32 %v307_v35, %v299_v34 }
  0xbf   : > { %v309_v39 = vadd.f32 %v308_v37, %v301_v36 }
  0xc1   : > { %v310_v40 = vrot.slane %v309_v39, 4 }
  0xc3   : > { %v311_v42 = vadd.f32 %v310_v40, %v309_v39 }
  0xc5   : > { %v312_v43 = vrot.slane %v311_v42, 2 }
  0xc7   : > { %v313_v45 = vadd.f32 %v312_v43, %v311_v42 }
  0xc9   : > { %v314_v46 = vrot.slane %v313_v45, 1 }
  0xcb   : > { %v315_v48 = vadd.f32 %v314_v46, %v313_v45 }
  0xcd   : > { %v323_v49 = vmul.f32 %v322_v47, %v315_v48 }
  0xcf   : > { %v324_v50 = vsub.f32 %v284_v18, %v323_v49  ;;  %v325_v51 = vsub.f32 %v286_v19, %v323_v49  ;;  %v326_v52 = vsub.f32 %v289_v22, %v323_v49  ;;  %v327_v53 = vsub.f32 %v291_v24, %v323_v49 }
  0xd0   : > { %v328_v56 = vsub.f32 %v294_v27, %v323_v49  ;;  %v329_v59 = vsub.f32 %v296_v30, %v323_v49  ;;  %v330_v62 = vsub.f32 %v299_v34, %v323_v49  ;;  %v331_v1 = vsub.f32 %v301_v36, %v323_v49 }
  0xd1   : > { %v332_v54 = vmul.f32 %v324_v50, %v324_v50  ;;  %v333_v55 = vmul.f32 %v325_v51, %v325_v51  ;;  %v334_v57 = vmul.f32 %v326_v52, %v326_v52  ;;  %v335_v60 = vmul.f32 %v327_v53, %v327_v53 }
  0xd2   : > { %v336_v63 = vmul.f32 %v328_v56, %v328_v56  ;;  %v337_v2 = vmul.f32 %v329_v59, %v329_v59  ;;  %v338_v4 = vmul.f32 %v330_v62, %v330_v62  ;;  %v339_v6 = vmul.f32 %v331_v1, %v331_v1 }
  0xd3   : > { %v340_v58 = vadd.f32 %v333_v55, %v332_v54 }
  0xd5   : > { %v341_v61 = vadd.f32 %v340_v58, %v334_v57 }
  0xd7   : > { %v342_v0 = vadd.f32 %v341_v61, %v335_v60 }
  0xd9   : > { %v343_v3 = vadd.f32 %v342_v0, %v336_v63 }
  0xdb   : > { %v344_v5 = vadd.f32 %v343_v3, %v337_v2 }
  0xdd   : > { %v345_v7 = vadd.f32 %v344_v5, %v338_v4 }
  0xdf   : > { %v346_v8 = vadd.f32 %v345_v7, %v339_v6 }
  0xe1   : > { %v347_v9 = vrot.slane %v346_v8, 4 }
  0xe3   : > { %v348_v10 = vadd.f32 %v347_v9, %v346_v8 }
  0xe5   : > { %v349_v11 = vrot.slane %v348_v10, 2 }
  0xe7   : > { %v350_v12 = vadd.f32 %v349_v11, %v348_v10 }
  0xe9   : > { %v351_v13 = vrot.slane %v350_v12, 1 }
  0xeb   : > { %v352_v14 = vadd.f32 %v351_v13, %v350_v12 }
  0xed   : > { %v353_v15 = vmul.f32 %v352_v14, %v322_v47 }
  0xef   : > { %v354_v16 = vadd.f32 1e-05, %v353_v15 }
  0xf1   : > { %552 = vrsqrt.f32 %v354_v16  ;;  %vm361_vm2 = vweird.f32 %v354_v16 }
  0xf7   : > { %v553_v17 = vpop.eup %552 }
  0xf8   : > { %v356_v18 = vmul.f32 %v553_v17, %v354_v16  ;;  %vm362_vm1 = vweird.f32 %v553_v17 }
  0xf9   : > { %vm363_vm3 = vmor %vm361_vm2, %vm362_vm1 }
  0xfa   : > { %v357_v19 = vmul.f32 %v553_v17, %v356_v18 }
  0xfc   : > { %v358_v20 = vmul.f32 0.5, %v357_v19 }
  0xfe   : > { %v359_v21 = vsub.f32 1.5, %v358_v20 }
 0x100   : > { %v360_v22 = vmul.f32 %v553_v17, %v359_v21 }
 0x102   : > { %v364_v23 = vsel %vm363_vm3, %v553_v17, %v360_v22 }
 0x103   : > { %v365_v24 = vmul.f32 %v364_v23, %v324_v50  ;;  %v366_v25 = vmul.f32 %v364_v23, %v325_v51  ;;  %v367_v26 = vmul.f32 %v364_v23, %v326_v52  ;;  %v368_v27 = vmul.f32 %v364_v23, %v327_v53 }
 0x104   : > { %v369_v28 = vmul.f32 %v364_v23, %v328_v56  ;;  %v370_v29 = vmul.f32 %v364_v23, %v329_v59  ;;  %v371_v30 = vmul.f32 %v364_v23, %v330_v62  ;;  %v372_v34 = vmul.f32 %v364_v23, %v331_v1 }
 0x105   : > { %v373_v31 = vmax.f32 %v365_v24, 0.0  ;;  %v374_v32 = vmax.f32 %v366_v25, 0.0  ;;  %v375_v33 = vmax.f32 %v367_v26, 0.0  ;;  %v376_v35 = vmax.f32 %v368_v27, 0.0 }
 0x106   : > { %v377_v36 = vmax.f32 %v369_v28, 0.0  ;;  %v378_v37 = vmax.f32 %v370_v29, 0.0  ;;  %v379_v38 = vmax.f32 %v371_v30, 0.0  ;;  %v380_v39 = vmax.f32 %v372_v34, 0.0 }
 0x107   : > { %381 = vst [vmem:[%s172_s14] sm:$0xff] %v373_v31 }
 0x108   : > { %382 = vst [vmem:[%s172_s14 + $0x8] sm:$0xff] %v374_v32 }
 0x109   : > { %383 = vst [vmem:[%s172_s14 + $0x10] sm:$0xff] %v375_v33 }
 0x10a   : > { %384 = vst [vmem:[%s172_s14 + $0x18] sm:$0xff] %v376_v35 }
 0x10b   : > { %385 = vst [vmem:[%s172_s14 + $0x20] sm:$0xff] %v377_v36 }
 0x10c   : > { %386 = vst [vmem:[%s172_s14 + $0x28] sm:$0xff] %v378_v37 }
 0x10d   : > { %387 = vst [vmem:[%s172_s14 + $0x30] sm:$0xff] %v379_v38 }
 0x10e   : > { %388 = vst [vmem:[%s172_s14 + $0x38] sm:$0xff] %v380_v39 }
 0x10f PF: > { %s13_s12 = sadd.s32 1, %s560_s12  }
 0x110   : > { %p10_p4 = scmp.ge.s32.totalorder %s13_s12, 4  }
 0x112   :  { %12 = sbr.rel (!%p10_p4) target bundleno = 1 (0x1), region = 62 }

// kernel: generator_forward.12
= control target key start
LH: loop header
LB: loop body
LE: loop exit
PB: predicated region body
PF: predicated region fallthrough
CT: control target
= control target key end

     0   :  { %s595_s12 = smov 0   ;;  %s670_s0 = inlined_call_operand.vmem [shape: bf16[32,256], index: 0, kind: input, shape index: {}]   ;;  %s671_s1 = inlined_call_operand.vmem [shape: bf16[256,128], index: 1, kind: input, shape index: {}]   ;;  %s672_s2 = inlined_call_operand.vmem [shape: f32[1,128], index: 2, kind: input, shape index: {}]   ;;  %s673_s3 = inlined_call_operand.vmem [shape: f32[32,128], index: 3, kind: output, shape index: {}]  }
   0x1 LB: > { %s449_s13 = sadd.s32 4294967295, %s572_s12   ;;  %p453_p0 = scmp.ge.s32.totalorder %s572_s12, 1  ;;  %s572_s12 = sphi %s595_s12, %s13_s12  }
   0x2   : > { %p139_p1 = scmp.lt.s32.totalorder %s572_s12, 3 }
   0x4   : > { %p140_p2 = pnand %p453_p0, %p139_p1 }
   0x5   : > { %s454_s26 = sshll.u32 (!%p140_p2), %s449_s13, 1 }
   0x6   : > { %143 = sbr.rel (%p140_p2) target bundleno = 243 (0xf3), region = 32  ;;  %p165_p3 = scmp.lt.s32.totalorder (!%p140_p2), %s454_s26, 3 }
   0xb   : > { %v543_v0 = vld [vmem:[%s671_s1 + $0x38] sm:$0xff]  ;;  %v542_v2 = vld [vmem:[%s671_s1 + $0x30] sm:$0xff]  ;;  %v541_v4 = vld [vmem:[%s671_s1 + $0x28] sm:$0xff]  ;;  %s675_s26 = smov (!%p165_p3, %s454_s26), 3  ;;  %v574_v22 = vmov 16.0  }
   0xc   : > { %v551_v1 = vld [vmem:[%s671_s1 + $0x78] sm:$0xff]  ;;  %321 = vmatpush.bf16.msra.mxu0 %v543_v0  ;;  %v550_v3 = vld [vmem:[%s671_s1 + $0x70] sm:$0xff]  ;;  %v549_v5 = vld [vmem:[%s671_s1 + $0x68] sm:$0xff]  ;;  %s533_s13 = sshll.u32 %s675_s26, 3  ;;  %562 = vrcp.f32 %v574_v22 }
   0xd   : > { %335 = vmatpush.bf16.msra.mxu1 %v551_v1  ;;  %v540_v6 = vld [vmem:[%s671_s1 + $0x20] sm:$0xff]  ;;  %v539_v8 = vld [vmem:[%s671_s1 + $0x18] sm:$0xff]  ;;  %v538_v10 = vld [vmem:[%s671_s1 + $0x10] sm:$0xff]  ;;  %s169_s20 = scalar_lea.vmem %s670_s0, %s533_s13  ;;  %s175_s30 = scalar_lea.vmem %s673_s3, %s533_s13 }
   0xe   : > { %v548_v7 = vld [vmem:[%s671_s1 + $0x60] sm:$0xff]  ;;  %v547_v9 = vld [vmem:[%s671_s1 + $0x58] sm:$0xff]  ;;  %v546_v11 = vld [vmem:[%s671_s1 + $0x50] sm:$0xff] }
   0xf   : > { %v537_v12 = vld [vmem:[%s671_s1 + $0x8] sm:$0xff]  ;;  %v536_v14 = vld [vmem:[%s671_s1] sm:$0xff] }
  0x10   : > { %322 = vmatpush.bf16.msra.mxu0 %v542_v2  ;;  %v545_v13 = vld [vmem:[%s671_s1 + $0x48] sm:$0xff]  ;;  %v544_v15 = vld [vmem:[%s671_s1 + $0x40] sm:$0xff] }
  0x11   : > { %336 = vmatpush.bf16.msra.mxu1 %v550_v3  ;;  %v461_v16 = vld [vmem:[%s169_s20] sm:$0xf]  ;;  %v535_v17 = vld [vmem:[%s169_s20 + $0x4] sm:$0xf0]  ;;  %v534_v18 = vld [vmem:[%s169_s20 + $0x4] sm:$0xf] }
  0x12   : > { %v463_v19 = vld [vmem:[%s169_s20 + $0x8] sm:$0xf0]  ;;  %v462_v20 = vor.u32 %v535_v17, %v461_v16  ;;  %v561_v25 = vld [vmem:[%s672_s2] ss:$0 sm:$0xff]  ;;  %v563_v26 = vpop.eup %562 }
  0x13   : > { %v466_v21 = vor.u32 %v534_v18, %v463_v19  ;;  %v357_v29 = vmul.f32 16.0, %v563_v26  ;;  %vm361_vm0 = vweird.f32 %v563_v26 }
  0x14   : > { %323 = vmatpush.bf16.msra.mxu0 %v541_v4 }
  0x15   : > { %337 = vmatpush.bf16.msra.mxu1 %v549_v5  ;;  %v358_v34 = vsub.f32 1.0, %v357_v29 }
  0x17   : > { %v359_v37 = vmul.f32 %v563_v26, %v358_v34 }
  0x18   : > { %324 = vmatpush.bf16.msra.mxu0 %v540_v6 }
  0x19   : > { %338 = vmatpush.bf16.msra.mxu1 %v548_v7  ;;  %v360_v40 = vadd.f32 %v563_v26, %v359_v37 }
  0x1b   : > { %v362_v43 = vsel %vm361_vm0, %v563_v26, %v360_v40 }
  0x1c   : > { %325 = vmatpush.bf16.msra.mxu0 %v539_v8 }
  0x1d   : > { %339 = vmatpush.bf16.msra.mxu1 %v547_v9 }
  0x20   : > { %326 = vmatpush.bf16.msra.mxu0 %v538_v10 }
  0x21   : > { %340 = vmatpush.bf16.msra.mxu1 %v546_v11 }
  0x24   : > { %327 = vmatpush.bf16.msra.mxu0 %v537_v12 }
  0x25   : > { %341 = vmatpush.bf16.msra.mxu1 %v545_v13 }
  0x28   : > { %328 = vmatpush.bf16.msra.mxu0 %v536_v14 }
  0x29   : > { %342 = vmatpush.bf16.msra.mxu1 %v544_v15 }
  0x2b   : > { %329 = vmatmul.bf16.vlgmr.msra.gmra.mxu0 %v462_v20 }
  0x2c   : > { %343 = vmatmul.bf16.vlgmr.msra.gmra.mxu1 %v466_v21 }
  0xa8   : > { %v330_v23 = vpop.f32.mrf.mxu0 }
  0xa9   : > { %v344_v24 = vpop.f32.mrf.mxu1  ;;  %v331_v27 = vadd.f32 %v561_v25, %v330_v23 }
  0xab   : > { %v345_v32 = vadd.f32 %v344_v24, %v331_v27 }
  0xb0   : > { %v332_v28 = vpop.f32.mrf.mxu0 }
  0xb1   : > { %v333_v30 = vadd.f32 %v561_v25, %v332_v28  ;;  %v346_v31 = vpop.f32.mrf.mxu1 }
  0xb3   : > { %v347_v33 = vadd.f32 %v346_v31, %v333_v30 }
  0xb5   : > { %v349_v35 = vadd.f32 %v347_v33, %v345_v32 }
  0xb7   : > { %v350_v36 = vrot.slane %v349_v35, 4 }
  0xb9   : > { %v351_v38 = vadd.f32 %v350_v36, %v349_v35 }
  0xbb   : > { %v352_v39 = vrot.slane %v351_v38, 2 }
  0xbd   : > { %v353_v41 = vadd.f32 %v352_v39, %v351_v38 }
  0xbf   : > { %v354_v42 = vrot.slane %v353_v41, 1 }
  0xc1   : > { %v355_v44 = vadd.f32 %v354_v42, %v353_v41 }
  0xc3   : > { %v363_v45 = vmul.f32 %v362_v43, %v355_v44 }
  0xc5   : > { %v364_v46 = vsub.f32 %v345_v32, %v363_v45  ;;  %v365_v47 = vsub.f32 %v347_v33, %v363_v45 }
  0xc7   : > { %v366_v48 = vmul.f32 %v364_v46, %v364_v46  ;;  %v367_v49 = vmul.f32 %v365_v47, %v365_v47 }
  0xc9   : > { %v368_v50 = vadd.f32 %v367_v49, %v366_v48 }
  0xcb   : > { %v369_v51 = vrot.slane %v368_v50, 4 }
  0xcd   : > { %v370_v52 = vadd.f32 %v369_v51, %v368_v50 }
  0xcf   : > { %v371_v53 = vrot.slane %v370_v52, 2 }
  0xd1   : > { %v372_v54 = vadd.f32 %v371_v53, %v370_v52 }
  0xd3   : > { %v373_v55 = vrot.slane %v372_v54, 1 }
  0xd5   : > { %v374_v56 = vadd.f32 %v373_v55, %v372_v54 }
  0xd7   : > { %v375_v57 = vmul.f32 %v374_v56, %v362_v43 }
  0xd9   : > { %v376_v58 = vadd.f32 1e-05, %v375_v57 }
  0xdb   : > { %564 = vrsqrt.f32 %v376_v58  ;;  %vm383_vm2 = vweird.f32 %v376_v58 }
  0xe1   : > { %v565_v59 = vpop.eup %564 }
  0xe2   : > { %v378_v60 = vmul.f32 %v565_v59, %v376_v58  ;;  %vm384_vm1 = vweird.f32 %v565_v59 }
  0xe3   : > { %vm385_vm3 = vmor %vm383_vm2, %vm384_vm1 }
  0xe4   : > { %v379_v61 = vmul.f32 %v565_v59, %v378_v60 }
  0xe6   : > { %v380_v62 = vmul.f32 0.5, %v379_v61 }
  0xe8   : > { %v381_v63 = vsub.f32 1.5, %v380_v62 }
  0xea   : > { %v382_v0 = vmul.f32 %v565_v59, %v381_v63 }
  0xec   : > { %v386_v1 = vsel %vm385_vm3, %v565_v59, %v382_v0 }
  0xed   : > { %v387_v2 = vmul.f32 %v386_v1, %v364_v46  ;;  %v388_v3 = vmul.f32 %v386_v1, %v365_v47 }
  0xef   : > { %v389_v4 = vmax.f32 %v387_v2, 0.0  ;;  %v390_v5 = vmax.f32 %v388_v3, 0.0 }
  0xf1   : > { %391 = vst [vmem:[%s175_s30] sm:$0xff] %v389_v4 }
  0xf2   : > { %392 = vst [vmem:[%s175_s30 + $0x8] sm:$0xff] %v390_v5 }
  0xf3 PF: > { %s13_s12 = sadd.s32 1, %s572_s12  }
  0xf4   : > { %p10_p4 = scmp.ge.s32.totalorder %s13_s12, 4  }
  0xf6   :  { %12 = sbr.rel (!%p10_p4) target bundleno = 1 (0x1), region = 62 }

// kernel: generator_forward.13
= control target key start
LH: loop header
LB: loop body
LE: loop exit
PB: predicated region body
PF: predicated region fallthrough
CT: control target
= control target key end

     0   :  { %s725_s12 = smov 0   ;;  %s821_s0 = inlined_call_operand.vmem [shape: bf16[32,384], index: 0, kind: input, shape index: {}]   ;;  %s822_s1 = inlined_call_operand.vmem [shape: bf16[384,128], index: 1, kind: input, shape index: {}]   ;;  %s823_s2 = inlined_call_operand.vmem [shape: f32[1,128], index: 2, kind: input, shape index: {}]   ;;  %s824_s3 = inlined_call_operand.vmem [shape: f32[32,128], index: 3, kind: output, shape index: {}]  }
   0x1 LB: > { %s535_s13 = sadd.s32 4294967295, %s702_s12   ;;  %p539_p0 = scmp.ge.s32.totalorder %s702_s12, 1  ;;  %s702_s12 = sphi %s725_s12, %s13_s12  }
   0x2   : > { %p139_p1 = scmp.lt.s32.totalorder %s702_s12, 3 }
   0x4   : > { %p140_p2 = pnand %p539_p0, %p139_p1 }
   0x5   : > { %s540_s5 = sshll.u32 (!%p140_p2), %s535_s13, 1 }
   0x6   : > { %143 = sbr.rel (%p140_p2) target bundleno = 249 (0xf9), region = 32  ;;  %p165_p3 = scmp.lt.s32.totalorder (!%p140_p2), %s540_s5, 3 }
   0xb   : > { %v664_v0 = vld [vmem:[%s822_s1 + $0x38] sm:$0xff]  ;;  %v663_v3 = vld [vmem:[%s822_s1 + $0x30] sm:$0xff]  ;;  %v662_v6 = vld [vmem:[%s822_s1 + $0x28] sm:$0xff]  ;;  %s826_s5 = smov (!%p165_p3, %s540_s5), 3  ;;  %v704_v36 = vmov 16.0  }
   0xc   : > { %v672_v1 = vld [vmem:[%s822_s1 + $0x78] sm:$0xff]  ;;  %393 = vmatpush.bf16.msra.mxu0 %v664_v0  ;;  %v671_v4 = vld [vmem:[%s822_s1 + $0x70] sm:$0xff]  ;;  %v670_v7 = vld [vmem:[%s822_s1 + $0x68] sm:$0xff]  ;;  %s681_s23 = smul.u32 12, %s826_s5  ;;  %692 = vrcp.f32 %v704_v36  ;;  %s543_s18 = sshll.u32 %s826_s5, 3 }
   0xd   : > { %v680_v2 = vld [vmem:[%s822_s1 + $0xb8] sm:$0xff]  ;;  %407 = vmatpush.bf16.msra.mxu1 %v672_v1  ;;  %v679_v5 = vld [vmem:[%s822_s1 + $0xb0] sm:$0xff]  ;;  %v678_v8 = vld [vmem:[%s822_s1 + $0xa8] sm:$0xff]  ;;  %s175_s21 = scalar_lea.vmem %s824_s3, %s543_s18 }
   0xe   : > { %421 = vmatpush.bf16.msra.mxu2 %v680_v2  ;;  %v661_v9 = vld [vmem:[%s822_s1 + $0x20] sm:$0xff]  ;;  %v660_v12 = vld [vmem:[%s822_s1 + $0x18] sm:$0xff]  ;;  %v659_v15 = vld [vmem:[%s822_s1 + $0x10] sm:$0xff]  ;;  %s169_s6 = scalar_lea.vmem %s821_s0, %s681_s23 }
   0xf   : > { %v669_v10 = vld [vmem:[%s822_s1 + $0x60] sm:$0xff]  ;;  %v668_v13 = vld [vmem:[%s822_s1 + $0x58] sm:$0xff]  ;;  %v667_v16 = vld [vmem:[%s822_s1 + $0x50] sm:$0xff] }
  0x10   : > { %394 = vmatpush.bf16.msra.mxu0 %v663_v3  ;;  %v677_v11 = vld [vmem:[%s822_s1 + $0xa0] sm:$0xff]  ;;  %v676_v14 = vld [vmem:[%s822_s1 + $0x98] sm:$0xff]  ;;  %v675_v17 = vld [vmem:[%s822_s1 + $0x90] sm:$0xff] }
  0x11   : > { %408 = vmatpush.bf16.msra.mxu1 %v671_v4  ;;  %v658_v18 = vld [vmem:[%s822_s1 + $0x8] sm:$0xff]  ;;  %v657_v21 = vld [vmem:[%s822_s1] sm:$0xff]  ;;  %v548_v26 = vld [vmem:[%s169_s6 + $0xc] sm:$0xf0] }
  0x12   : > { %422 = vmatpush.bf16.msra.mxu2 %v679_v5  ;;  %v666_v19 = vld [vmem:[%s822_s1 + $0x48] sm:$0xff]  ;;  %v665_v22 = vld [vmem:[%s822_s1 + $0x40] sm:$0xff]  ;;  %v656_v29 = vld [vmem:[%s169_s6 + $0x10] sm:$0xf0]  ;;  %v693_v40 = vpop.eup %692 }
  0x13   : > { %v674_v20 = vld [vmem:[%s822_s1 + $0x88] sm:$0xff]  ;;  %v546_v23 = vld [vmem:[%s169_s6] sm:$0xf]  ;;  %v654_v25 = vld [vmem:[%s169_s6 + $0x4] sm:$0xf]  ;;  %v443_v44 = vmul.f32 16.0, %v693_v40  ;;  %vm447_vm0 = vweird.f32 %v693_v40 }
  0x14   : > { %395 = vmatpush.bf16.msra.mxu0 %v662_v6  ;;  %v655_v24 = vld [vmem:[%s169_s6 + $0x8] sm:$0xf0]  ;;  %v673_v27 = vld [vmem:[%s822_s1 + $0x80] sm:$0xff]  ;;  %v554_v28 = vld [vmem:[%s169_s6 + $0x8] sm:$0xf]  ;;  %v551_v31 = vor.u32 %v654_v25, %v548_v26 }
  0x15   : > { %409 = vmatpush.bf16.msra.mxu1 %v670_v7  ;;  %v547_v30 = vor.u32 %v655_v24, %v546_v23  ;;  %v555_v32 = vor.u32 %v656_v29, %v554_v28  ;;  %v691_v35 = vld [vmem:[%s823_s2] ss:$0 sm:$0xff]  ;;  %v444_v49 = vsub.f32 1.0, %v443_v44 }
  0x16   : > { %423 = vmatpush.bf16.msra.mxu2 %v678_v8 }
  0x17   : > { %v445_v52 = vmul.f32 %v693_v40, %v444_v49 }
  0x18   : > { %396 = vmatpush.bf16.msra.mxu0 %v661_v9 }
  0x19   : > { %410 = vmatpush.bf16.msra.mxu1 %v669_v10  ;;  %v446_v55 = vadd.f32 %v693_v40, %v445_v52 }
  0x1a   : > { %424 = vmatpush.bf16.msra.mxu2 %v677_v11 }
  0x1b   : > { %v448_v58 = vsel %vm447_vm0, %v693_v40, %v446_v55 }
  0x1c   : > { %397 = vmatpush.bf16.msra.mxu0 %v660_v12 }
  0x1d   : > { %411 = vmatpush.bf16.msra.mxu1 %v668_v13 }
  0x1e   : > { %425 = vmatpush.bf16.msra.mxu2 %v676_v14 }
  0x20   : > { %398 = vmatpush.bf16.msra.mxu0 %v659_v15 }
  0x21   : > { %412 = vmatpush.bf16.msra.mxu1 %v667_v16 }
  0x22   : > { %426 = vmatpush.bf16.msra.mxu2 %v675_v17 }
  0x24   : > { %399 = vmatpush.bf16.msra.mxu0 %v658_v18 }
  0x25   : > { %413 = vmatpush.bf16.msra.mxu1 %v666_v19 }
  0x26   : > { %427 = vmatpush.bf16.msra.mxu2 %v674_v20 }
  0x28   : > { %400 = vmatpush.bf16.msra.mxu0 %v657_v21 }
  0x29   : > { %414 = vmatpush.bf16.msra.mxu1 %v665_v22 }
  0x2a   : > { %428 = vmatpush.bf16.msra.mxu2 %v673_v27 }
  0x2b   : > { %401 = vmatmul.bf16.vlgmr.msra.gmra.mxu0 %v547_v30 }
  0x2c   : > { %415 = vmatmul.bf16.vlgmr.msra.gmra.mxu1 %v551_v31 }
  0x2d   : > { %429 = vmatmul.bf16.vlgmr.msra.gmra.mxu2 %v555_v32 }
  0xa8   : > { %v402_v33 = vpop.f32.mrf.mxu0 }
  0xa9   : > { %v416_v34 = vpop.f32.mrf.mxu1  ;;  %v403_v38 = vadd.f32 %v691_v35, %v402_v33 }
  0xab   : > { %v417_v42 = vadd.f32 %v416_v34, %v403_v38 }
  0xb0   : > { %v430_v37 = vpop.f32.mrf.mxu2  ;;  %v404_v39 = vpop.f32.mrf.mxu0 }
  0xb1   : > { %v405_v41 = vadd.f32 %v691_v35, %v404_v39  ;;  %v418_v43 = vpop.f32.mrf.mxu1  ;;  %v431_v47 = vadd.f32 %v430_v37, %v417_v42 }
  0xb3   : > { %v419_v45 = vadd.f32 %v418_v43, %v405_v41 }
  0xb8   : > { %v432_v46 = vpop.f32.mrf.mxu2 }
  0xb9   : > { %v433_v48 = vadd.f32 %v432_v46, %v419_v45 }
  0xbb   : > { %v435_v50 = vadd.f32 %v433_v48, %v431_v47 }
  0xbd   : > { %v436_v51 = vrot.slane %v435_v50, 4 }
  0xbf   : > { %v437_v53 = vadd.f32 %v436_v51, %v435_v50 }
  0xc1   : > { %v438_v54 = vrot.slane %v437_v53, 2 }
  0xc3   : > { %v439_v56 = vadd.f32 %v438_v54, %v437_v53 }
  0xc5   : > { %v440_v57 = vrot.slane %v439_v56, 1 }
  0xc7   : > { %v441_v59 = vadd.f32 %v440_v57, %v439_v56 }
  0xc9   : > { %v449_v60 = vmul.f32 %v448_v58, %v441_v59 }
  0xcb   : > { %v450_v61 = vsub.f32 %v431_v47, %v449_v60  ;;  %v451_v62 = vsub.f32 %v433_v48, %v449_v60 }
  0xcd   : > { %v452_v63 = vmul.f32 %v450_v61, %v450_v61  ;;  %v453_v0 = vmul.f32 %v451_v62, %v451_v62 }
  0xcf   : > { %v454_v1 = vadd.f32 %v453_v0, %v452_v63 }
  0xd1   : > { %v455_v2 = vrot.slane %v454_v1, 4 }
  0xd3   : > { %v456_v3 = vadd.f32 %v455_v2, %v454_v1 }
  0xd5   : > { %v457_v4 = vrot.slane %v456_v3, 2 }
  0xd7   : > { %v458_v5 = vadd.f32 %v457_v4, %v456_v3 }
  0xd9   : > { %v459_v6 = vrot.slane %v458_v5, 1 }
  0xdb   : > { %v460_v7 = vadd.f32 %v459_v6, %v458_v5 }
  0xdd   : > { %v461_v8 = vmul.f32 %v460_v7, %v448_v58 }
  0xdf   : > { %v462_v9 = vadd.f32 1e-05, %v461_v8 }
  0xe1   : > { %694 = vrsqrt.f32 %v462_v9  ;;  %vm469_vm2 = vweird.f32 %v462_v9 }
  0xe7   : > { %v695_v10 = vpop.eup %694 }
  0xe8   : > { %v464_v11 = vmul.f32 %v695_v10, %v462_v9  ;;  %vm470_vm1 = vweird.f32 %v695_v10 }
  0xe9   : > { %vm471_vm3 = vmor %vm469_vm2, %vm470_vm1 }
  0xea   : > { %v465_v12 = vmul.f32 %v695_v10, %v464_v11 }
  0xec   : > { %v466_v13 = vmul.f32 0.5, %v465_v12 }
  0xee   : > { %v467_v14 = vsub.f32 1.5, %v466_v13 }
  0xf0   : > { %v468_v15 = vmul.f32 %v695_v10, %v467_v14 }
  0xf2   : > { %v472_v16 = vsel %vm471_vm3, %v695_v10, %v468_v15 }
  0xf3   : > { %v473_v17 = vmul.f32 %v472_v16, %v450_v61  ;;  %v474_v18 = vmul.f32 %v472_v16, %v451_v62 }
  0xf5   : > { %v475_v19 = vmax.f32 %v473_v17, 0.0  ;;  %v476_v20 = vmax.f32 %v474_v18, 0.0 }
  0xf7   : > { %477 = vst [vmem:[%s175_s21] sm:$0xff] %v475_v19 }
  0xf8   : > { %478 = vst [vmem:[%s175_s21 + $0x8] sm:$0xff] %v476_v20 }
  0xf9 PF: > { %s13_s12 = sadd.s32 1, %s702_s12  }
  0xfa   : > { %p10_p4 = scmp.ge.s32.totalorder %s13_s12, 4  }
  0xfc   :  { %12 = sbr.rel (!%p10_p4) target bundleno = 1 (0x1), region = 62 }

// kernel: generator_forward.14
= control target key start
LH: loop header
LB: loop body
LE: loop exit
PB: predicated region body
PF: predicated region fallthrough
CT: control target
= control target key end

     0   :  { %s795_s15 = smov 0   ;;  %s894_s0 = inlined_call_operand.vmem [shape: bf16[32,384], index: 0, kind: input, shape index: {}]   ;;  %s895_s1 = inlined_call_operand.vmem [shape: bf16[384,128], index: 1, kind: input, shape index: {}]   ;;  %s896_s2 = inlined_call_operand.vmem [shape: f32[1,128], index: 2, kind: input, shape index: {}]   ;;  %s897_s3 = inlined_call_operand.vmem [shape: f32[32,128], index: 3, kind: input, shape index: {}]   ;;  %s898_s4 = inlined_call_operand.vmem [shape: f32[32,128], index: 4, kind: output, shape index: {}]  }
   0x1 LB: > { %s598_s16 = sadd.s32 4294967295, %s767_s15   ;;  %p602_p0 = scmp.ge.s32.totalorder %s767_s15, 1  ;;  %s767_s15 = sphi %s795_s15, %s14_s15  }
   0x2   : > { %p175_p1 = scmp.lt.s32.totalorder %s767_s15, 3 }
   0x4   : > { %p176_p2 = pnand %p602_p0, %p175_p1 }
   0x5   : > { %s603_s9 = sshll.u32 (!%p176_p2), %s598_s16, 1 }
   0x6   : > { %179 = sbr.rel (%p176_p2) target bundleno = 249 (0xf9), region = 36  ;;  %p208_p3 = scmp.lt.s32.totalorder (!%p176_p2), %s603_s9, 3 }
   0xb   : > { %v729_v0 = vld [vmem:[%s895_s1 + $0x38] sm:$0xff]  ;;  %v728_v3 = vld [vmem:[%s895_s1 + $0x30] sm:$0xff]  ;;  %v727_v6 = vld [vmem:[%s895_s1 + $0x28] sm:$0xff]  ;;  %s900_s9 = smov (!%p208_p3, %s603_s9), 3  ;;  %v769_v36 = vmov 16.0  }
   0xc   : > { %v737_v1 = vld [vmem:[%s895_s1 + $0x78] sm:$0xff]  ;;  %442 = vmatpush.bf16.msra.mxu0 %v729_v0  ;;  %v736_v4 = vld [vmem:[%s895_s1 + $0x70] sm:$0xff]  ;;  %v735_v7 = vld [vmem:[%s895_s1 + $0x68] sm:$0xff]  ;;  %s746_s27 = smul.u32 12, %s900_s9  ;;  %757 = vrcp.f32 %v769_v36  ;;  %s606_s23 = sshll.u32 %s900_s9, 3 }
   0xd   : > { %v745_v2 = vld [vmem:[%s895_s1 + $0xb8] sm:$0xff]  ;;  %456 = vmatpush.bf16.msra.mxu1 %v737_v1  ;;  %v744_v5 = vld [vmem:[%s895_s1 + $0xb0] sm:$0xff]  ;;  %v743_v8 = vld [vmem:[%s895_s1 + $0xa8] sm:$0xff]  ;;  %s218_s26 = scalar_lea.vmem %s897_s3, %s606_s23  ;;  %s224_s29 = scalar_lea.vmem %s898_s4, %s606_s23 }
   0xe   : > { %470 = vmatpush.bf16.msra.mxu2 %v745_v2  ;;  %v726_v9 = vld [vmem:[%s895_s1 + $0x20] sm:$0xff]  ;;  %v725_v12 = vld [vmem:[%s895_s1 + $0x18] sm:$0xff]  ;;  %v724_v15 = vld [vmem:[%s895_s1 + $0x10] sm:$0xff]  ;;  %s212_s11 = scalar_lea.vmem %s894_s0, %s746_s27 }
   0xf   : > { %v734_v10 = vld [vmem:[%s895_s1 + $0x60] sm:$0xff]  ;;  %v733_v13 = vld [vmem:[%s895_s1 + $0x58] sm:$0xff]  ;;  %v732_v16 = vld [vmem:[%s895_s1 + $0x50] sm:$0xff] }
  0x10   : > { %443 = vmatpush.bf16.msra.mxu0 %v728_v3  ;;  %v742_v11 = vld [vmem:[%s895_s1 + $0xa0] sm:$0xff]  ;;  %v741_v14 = vld [vmem:[%s895_s1 + $0x98] sm:$0xff]  ;;  %v740_v17 = vld [vmem:[%s895_s1 + $0x90] sm:$0xff] }
  0x11   : > { %457 = vmatpush.bf16.msra.mxu1 %v736_v4  ;;  %v723_v18 = vld [vmem:[%s895_s1 + $0x8] sm:$0xff]  ;;  %v722_v21 = vld [vmem:[%s895_s1] sm:$0xff]  ;;  %v613_v26 = vld [vmem:[%s212_s11 + $0xc] sm:$0xf0] }
  0x12   : > { %471 = vmatpush.bf16.msra.mxu2 %v744_v5  ;;  %v731_v19 = vld [vmem:[%s895_s1 + $0x48] sm:$0xff]  ;;  %v730_v22 = vld [vmem:[%s895_s1 + $0x40] sm:$0xff]  ;;  %v721_v29 = vld [vmem:[%s212_s11 + $0x10] sm:$0xf0]  ;;  %v758_v40 = vpop.eup %757 }
  0x13   : > { %v739_v20 = vld [vmem:[%s895_s1 + $0x88] sm:$0xff]  ;;  %v611_v23 = vld [vmem:[%s212_s11] sm:$0xf]  ;;  %v719_v25 = vld [vmem:[%s212_s11 + $0x4] sm:$0xf]  ;;  %v492_v44 = vmul.f32 16.0, %v758_v40  ;;  %vm496_vm0 = vweird.f32 %v758_v40 }
  0x14   : > { %444 = vmatpush.bf16.msra.mxu0 %v727_v6  ;;  %v720_v24 = vld [vmem:[%s212_s11 + $0x8] sm:$0xf0]  ;;  %v738_v27 = vld [vmem:[%s895_s1 + $0x80] sm:$0xff]  ;;  %v619_v28 = vld [vmem:[%s212_s11 + $0x8] sm:$0xf]  ;;  %v616_v31 = vor.u32 %v719_v25, %v613_v26 }
  0x15   : > { %458 = vmatpush.bf16.msra.mxu1 %v735_v7  ;;  %v612_v30 = vor.u32 %v720_v24, %v611_v23  ;;  %v620_v32 = vor.u32 %v721_v29, %v619_v28  ;;  %v756_v35 = vld [vmem:[%s896_s2] ss:$0 sm:$0xff]  ;;  %v493_v49 = vsub.f32 1.0, %v492_v44 }
  0x16   : > { %472 = vmatpush.bf16.msra.mxu2 %v743_v8 }
  0x17   : > { %v494_v52 = vmul.f32 %v758_v40, %v493_v49 }
  0x18   : > { %445 = vmatpush.bf16.msra.mxu0 %v726_v9 }
  0x19   : > { %459 = vmatpush.bf16.msra.mxu1 %v734_v10  ;;  %v495_v55 = vadd.f32 %v758_v40, %v494_v52 }
  0x1a   : > { %473 = vmatpush.bf16.msra.mxu2 %v742_v11 }
  0x1b   : > { %v497_v58 = vsel %vm496_vm0, %v758_v40, %v495_v55 }
  0x1c   : > { %446 = vmatpush.bf16.msra.mxu0 %v725_v12 }
  0x1d   : > { %460 = vmatpush.bf16.msra.mxu1 %v733_v13 }
  0x1e   : > { %474 = vmatpush.bf16.msra.mxu2 %v741_v14 }
  0x20   : > { %447 = vmatpush.bf16.msra.mxu0 %v724_v15 }
  0x21   : > { %461 = vmatpush.bf16.msra.mxu1 %v732_v16 }
  0x22   : > { %475 = vmatpush.bf16.msra.mxu2 %v740_v17  ;;  %v524_v17 = vld [vmem:[%s218_s26] sm:$0xff] }
  0x24   : > { %448 = vmatpush.bf16.msra.mxu0 %v723_v18  ;;  %v525_v18 = vld [vmem:[%s218_s26 + $0x8] sm:$0xff] }
  0x25   : > { %462 = vmatpush.bf16.msra.mxu1 %v731_v19 }
  0x26   : > { %476 = vmatpush.bf16.msra.mxu2 %v739_v20 }
  0x28   : > { %449 = vmatpush.bf16.msra.mxu0 %v722_v21 }
  0x29   : > { %463 = vmatpush.bf16.msra.mxu1 %v730_v22 }
  0x2a   : > { %477 = vmatpush.bf16.msra.mxu2 %v738_v27 }
  0x2b   : > { %450 = vmatmul.bf16.vlgmr.msra.gmra.mxu0 %v612_v30 }
  0x2c   : > { %464 = vmatmul.bf16.vlgmr.msra.gmra.mxu1 %v616_v31 }
  0x2d   : > { %478 = vmatmul.bf16.vlgmr.msra.gmra.mxu2 %v620_v32 }
  0xa8   : > { %v451_v33 = vpop.f32.mrf.mxu0 }
  0xa9   : > { %v465_v34 = vpop.f32.mrf.mxu1  ;;  %v452_v38 = vadd.f32 %v756_v35, %v451_v33 }
  0xab   : > { %v466_v42 = vadd.f32 %v465_v34, %v452_v38 }
  0xb0   : > { %v479_v37 = vpop.f32.mrf.mxu2  ;;  %v453_v39 = vpop.f32.mrf.mxu0 }
  0xb1   : > { %v454_v41 = vadd.f32 %v756_v35, %v453_v39  ;;  %v467_v43 = vpop.f32.mrf.mxu1  ;;  %v480_v47 = vadd.f32 %v479_v37, %v466_v42 }
  0xb3   : > { %v468_v45 = vadd.f32 %v467_v43, %v454_v41 }
  0xb8   : > { %v481_v46 = vpop.f32.mrf.mxu2 }
  0xb9   : > { %v482_v48 = vadd.f32 %v481_v46, %v468_v45 }
  0xbb   : > { %v484_v50 = vadd.f32 %v482_v48, %v480_v47 }
  0xbd   : > { %v485_v51 = vrot.slane %v484_v50, 4 }
  0xbf   : > { %v486_v53 = vadd.f32 %v485_v51, %v484_v50 }
  0xc1   : > { %v487_v54 = vrot.slane %v486_v53, 2 }
  0xc3   : > { %v488_v56 = vadd.f32 %v487_v54, %v486_v53 }
  0xc5   : > { %v489_v57 = vrot.slane %v488_v56, 1 }
  0xc7   : > { %v490_v59 = vadd.f32 %v489_v57, %v488_v56 }
  0xc9   : > { %v498_v60 = vmul.f32 %v497_v58, %v490_v59 }
  0xcb   : > { %v499_v61 = vsub.f32 %v480_v47, %v498_v60  ;;  %v500_v62 = vsub.f32 %v482_v48, %v498_v60 }
  0xcd   : > { %v501_v63 = vmul.f32 %v499_v61, %v499_v61  ;;  %v502_v0 = vmul.f32 %v500_v62, %v500_v62 }
  0xcf   : > { %v503_v1 = vadd.f32 %v502_v0, %v501_v63 }
  0xd1   : > { %v504_v2 = vrot.slane %v503_v1, 4 }
  0xd3   : > { %v505_v3 = vadd.f32 %v504_v2, %v503_v1 }
  0xd5   : > { %v506_v4 = vrot.slane %v505_v3, 2 }
  0xd7   : > { %v507_v5 = vadd.f32 %v506_v4, %v505_v3 }
  0xd9   : > { %v508_v6 = vrot.slane %v507_v5, 1 }
  0xdb   : > { %v509_v7 = vadd.f32 %v508_v6, %v507_v5 }
  0xdd   : > { %v510_v8 = vmul.f32 %v509_v7, %v497_v58 }
  0xdf   : > { %v511_v9 = vadd.f32 1e-05, %v510_v8 }
  0xe1   : > { %759 = vrsqrt.f32 %v511_v9  ;;  %vm518_vm2 = vweird.f32 %v511_v9 }
  0xe7   : > { %v760_v10 = vpop.eup %759 }
  0xe8   : > { %v513_v11 = vmul.f32 %v760_v10, %v511_v9  ;;  %vm519_vm1 = vweird.f32 %v760_v10 }
  0xe9   : > { %vm520_vm3 = vmor %vm518_vm2, %vm519_vm1 }
  0xea   : > { %v514_v12 = vmul.f32 %v760_v10, %v513_v11 }
  0xec   : > { %v515_v13 = vmul.f32 0.5, %v514_v12 }
  0xee   : > { %v516_v14 = vsub.f32 1.5, %v515_v13 }
  0xf0   : > { %v517_v15 = vmul.f32 %v760_v10, %v516_v14 }
  0xf2   : > { %v521_v16 = vsel %vm520_vm3, %v760_v10, %v517_v15 }
  0xf3   : > { %v522_v19 = vmul.f32 %v521_v16, %v499_v61  ;;  %v523_v20 = vmul.f32 %v521_v16, %v500_v62 }
  0xf5   : > { %v526_v21 = vadd.f32 %v524_v17, %v522_v19  ;;  %v527_v22 = vadd.f32 %v525_v18, %v523_v20 }
  0xf7   : > { %528 = vst [vmem:[%s224_s29] sm:$0xff] %v526_v21 }
  0xf8   : > { %529 = vst [vmem:[%s224_s29 + $0x8] sm:$0xff] %v527_v22 }
  0xf9 PF: > { %s14_s15 = sadd.s32 1, %s767_s15  }
  0xfa   : > { %p11_p4 = scmp.ge.s32.totalorder %s14_s15, 4  }
  0xfc   :  { %13 = sbr.rel (!%p11_p4) target bundleno = 1 (0x1), region = 69 }

// kernel: tile.13
= control target key start
LH: loop header
LB: loop body
LE: loop exit
PB: predicated region body
PF: predicated region fallthrough
CT: control target
= control target key end

     0   :  { %s22_s0 = inlined_call_operand.vmem [shape: f32[32], index: 0, kind: input, shape index: {}]   ;;  %s23_s1 = inlined_call_operand.vmem [shape: f32[4,32], index: 1, kind: output, shape index: {}]  }
   0x1   :  { %v4_v0 = vld [vmem:[%s22_s0] ss:$0 sm:$0xff] }
   0x2   :  { %5 = vst [vmem:[%s23_s1] sm:$0xf] %v4_v0 }

// kernel: generator_forward.17
= control target key start
LH: loop header
LB: loop body
LE: loop exit
PB: predicated region body
PF: predicated region fallthrough
CT: control target
= control target key end

     0   :  { %s552_s15 = smov 0   ;;  %s648_s0 = inlined_call_operand.vmem [shape: bf16[32,128], index: 0, kind: input, shape index: {}]   ;;  %s649_s1 = inlined_call_operand.vmem [shape: bf16[128,128], index: 1, kind: input, shape index: {}]   ;;  %s650_s2 = inlined_call_operand.vmem [shape: f32[1,128], index: 2, kind: input, shape index: {}]   ;;  %s651_s3 = inlined_call_operand.vmem [shape: f32[128,128], index: 3, kind: input, shape index: {}]   ;;  %s652_s4 = inlined_call_operand.vmem [shape: f32[32,128], index: 4, kind: output, shape index: {}]  }
   0x1 LB: > { %s448_s16 = sadd.s32 4294967295, %s524_s15   ;;  %p452_p0 = scmp.ge.s32.totalorder %s524_s15, 1  ;;  %s524_s15 = sphi %s552_s15, %s14_s15  }
   0x2   : > { %p163_p1 = scmp.lt.s32.totalorder %s524_s15, 3 }
   0x4   : > { %p164_p2 = pnand %p452_p0, %p163_p1 }
   0x5   : > { %s453_s29 = sshll.u32 (!%p164_p2), %s448_s16, 1 }
   0x6   : > { %167 = sbr.rel (%p164_p2) target bundleno = 503 (0x1f7), region = 36  ;;  %p190_p3 = scmp.lt.s32.totalorder (!%p164_p2), %s453_s29, 3 }
   0xb   : > { %v503_v0 = vld [vmem:[%s649_s1 + $0x38] sm:$0xff]  ;;  %v502_v1 = vld [vmem:[%s649_s1 + $0x30] sm:$0xff]  ;;  %v501_v4 = vld [vmem:[%s649_s1 + $0x28] sm:$0xff]  ;;  %s654_s29 = smov (!%p190_p3, %s453_s29), 3  ;;  %v526_v25 = vmov 16.0  }
   0xc   : > { %277 = vmatpush.bf16.msra.mxu0 %v503_v0  ;;  %v321_v2 = vld [vmem:[%s651_s3 + $0x78] sm:$0xff]  ;;  %v320_v3 = vld [vmem:[%s651_s3 + $0x70] sm:$0xff]  ;;  %v500_v5 = vld [vmem:[%s649_s1 + $0x20] sm:$0xff]  ;;  %s454_s10 = sshll.u32 %s654_s29, 2  ;;  %514 = vrcp.f32 %v526_v25  ;;  %s456_s23 = sshll.u32 %s654_s29, 3 }
   0xd   : > { %322 = vmatpush.msra.mxu1 %v321_v2  ;;  %355 = vmatpush.msra.mxu2 %v321_v2  ;;  %v499_v6 = vld [vmem:[%s649_s1 + $0x18] sm:$0xff]  ;;  %v498_v7 = vld [vmem:[%s649_s1 + $0x10] sm:$0xff]  ;;  %v497_v8 = vld [vmem:[%s649_s1 + $0x8] sm:$0xff]  ;;  %s193_s16 = scalar_lea.vmem %s648_s0, %s454_s10  ;;  %s199_s26 = scalar_lea.vmem %s652_s4, %s456_s23 }
   0xe   : > { %v496_v9 = vld [vmem:[%s649_s1] sm:$0xff]  ;;  %v319_v11 = vld [vmem:[%s651_s3 + $0x68] sm:$0xff]  ;;  %v317_v13 = vld [vmem:[%s651_s3 + $0x58] sm:$0xff] }
   0xf   : > { %323 = vmatpush.msra.mxu1 %v320_v3  ;;  %356 = vmatpush.msra.mxu2 %v320_v3  ;;  %v495_v10 = vld [vmem:[%s193_s16] sm:$0xff]  ;;  %v316_v14 = vld [vmem:[%s651_s3 + $0x50] sm:$0xff]  ;;  %v315_v15 = vld [vmem:[%s651_s3 + $0x48] sm:$0xff] }
  0x10   : > { %278 = vmatpush.bf16.msra.mxu0 %v502_v1  ;;  %v318_v12 = vld [vmem:[%s651_s3 + $0x60] sm:$0xff]  ;;  %v313_v17 = vld [vmem:[%s651_s3 + $0x38] sm:$0xff]  ;;  %v312_v18 = vld [vmem:[%s651_s3 + $0x30] sm:$0xff] }
  0x11   : > { %324 = vmatpush.msra.mxu1 %v319_v11  ;;  %357 = vmatpush.msra.mxu2 %v319_v11  ;;  %v314_v16 = vld [vmem:[%s651_s3 + $0x40] sm:$0xff]  ;;  %v311_v19 = vld [vmem:[%s651_s3 + $0x28] sm:$0xff]  ;;  %v309_v21 = vld [vmem:[%s651_s3 + $0x18] sm:$0xff] }
  0x12   : > { %v310_v20 = vld [vmem:[%s651_s3 + $0x20] sm:$0xff]  ;;  %v308_v22 = vld [vmem:[%s651_s3 + $0x10] sm:$0xff]  ;;  %v307_v23 = vld [vmem:[%s651_s3 + $0x8] sm:$0xff]  ;;  %v515_v27 = vpop.eup %514 }
  0x13   : > { %325 = vmatpush.msra.mxu1 %v318_v12  ;;  %358 = vmatpush.msra.mxu2 %v318_v12  ;;  %v306_v24 = vld [vmem:[%s651_s3] sm:$0xff]  ;;  %v299_v29 = vmul.f32 16.0, %v515_v27  ;;  %vm303_vm0 = vweird.f32 %v515_v27 }
  0x14   : > { %279 = vmatpush.bf16.msra.mxu0 %v501_v4  ;;  %v513_v28 = vld [vmem:[%s650_s2] ss:$0 sm:$0xff] }
  0x15   : > { %326 = vmatpush.msra.mxu1 %v317_v13  ;;  %359 = vmatpush.msra.mxu2 %v317_v13  ;;  %v300_v33 = vsub.f32 1.0, %v299_v29 }
  0x17   : > { %327 = vmatpush.msra.mxu1 %v316_v14  ;;  %360 = vmatpush.msra.mxu2 %v316_v14  ;;  %v301_v36 = vmul.f32 %v515_v27, %v300_v33 }
  0x18   : > { %280 = vmatpush.bf16.msra.mxu0 %v500_v5 }
  0x19   : > { %328 = vmatpush.msra.mxu1 %v315_v15  ;;  %361 = vmatpush.msra.mxu2 %v315_v15  ;;  %v302_v39 = vadd.f32 %v515_v27, %v301_v36 }
  0x1b   : > { %329 = vmatpush.msra.mxu1 %v314_v16  ;;  %362 = vmatpush.msra.mxu2 %v314_v16  ;;  %v304_v42 = vsel %vm303_vm0, %v515_v27, %v302_v39 }
  0x1c   : > { %281 = vmatpush.bf16.msra.mxu0 %v499_v6 }
  0x1d   : > { %330 = vmatpush.msra.mxu1 %v313_v17  ;;  %363 = vmatpush.msra.mxu2 %v313_v17 }
  0x1f   : > { %331 = vmatpush.msra.mxu1 %v312_v18  ;;  %364 = vmatpush.msra.mxu2 %v312_v18 }
  0x20   : > { %282 = vmatpush.bf16.msra.mxu0 %v498_v7 }
  0x21   : > { %332 = vmatpush.msra.mxu1 %v311_v19  ;;  %365 = vmatpush.msra.mxu2 %v311_v19 }
  0x23   : > { %333 = vmatpush.msra.mxu1 %v310_v20  ;;  %366 = vmatpush.msra.mxu2 %v310_v20 }
  0x24   : > { %283 = vmatpush.bf16.msra.mxu0 %v497_v8 }
  0x25   : > { %334 = vmatpush.msra.mxu1 %v309_v21  ;;  %367 = vmatpush.msra.mxu2 %v309_v21 }
  0x27   : > { %335 = vmatpush.msra.mxu1 %v308_v22  ;;  %368 = vmatpush.msra.mxu2 %v308_v22 }
  0x28   : > { %284 = vmatpush.bf16.msra.mxu0 %v496_v9 }
  0x29   : > { %336 = vmatpush.msra.mxu1 %v307_v23  ;;  %369 = vmatpush.msra.mxu2 %v307_v23 }
  0x2b   : > { %285 = vmatmul.bf16.vlgmr.msra.gmra.mxu0 %v495_v10  ;;  %337 = vmatpush.msra.mxu1 %v306_v24 }
  0x2c   : > { %370 = vmatpush.msra.mxu2 %v306_v24 }
  0xa8   : > { %v286_v26 = vpop.f32.mrf.mxu0 }
  0xa9   : > { %v287_v31 = vadd.f32 %v513_v28, %v286_v26 }
  0xb0   : > { %v288_v30 = vpop.f32.mrf.mxu0 }
  0xb1   : > { %v289_v32 = vadd.f32 %v513_v28, %v288_v30 }
  0xb3   : > { %v291_v34 = vadd.f32 %v289_v32, %v287_v31 }
  0xb5   : > { %v292_v35 = vrot.slane %v291_v34, 4 }
  0xb7   : > { %v293_v37 = vadd.f32 %v292_v35, %v291_v34 }
  0xb9   : > { %v294_v38 = vrot.slane %v293_v37, 2 }
  0xbb   : > { %v295_v40 = vadd.f32 %v294_v38, %v293_v37 }
  0xbd   : > { %v296_v41 = vrot.slane %v295_v40, 1 }
  0xbf   : > { %v297_v43 = vadd.f32 %v296_v41, %v295_v40 }
  0xc1   : > { %v305_v44 = vmul.f32 %v304_v42, %v297_v43 }
  0xc3   : > { %338 = vmatmul.f32.vlgmr.msra.gmra.mxu1 %v305_v44 }
 0x140   : > { %v339_v45 = vpop.f32.mrf.mxu1 }
 0x141   : > { %v342_v46 = vperm.slane %v339_v45, 0 }
 0x143   : > { %v343_v47 = vsub.f32 %v287_v31, %v342_v46  ;;  %v344_v48 = vsub.f32 %v289_v32, %v342_v46 }
 0x145   : > { %v345_v49 = vmul.f32 %v343_v47, %v343_v47  ;;  %v346_v50 = vmul.f32 %v344_v48, %v344_v48 }
 0x147   : > { %v347_v51 = vadd.f32 %v346_v50, %v345_v49 }
 0x149   : > { %v348_v52 = vrot.slane %v347_v51, 4 }
 0x14b   : > { %v349_v53 = vadd.f32 %v348_v52, %v347_v51 }
 0x14d   : > { %v350_v54 = vrot.slane %v349_v53, 2 }
 0x14f   : > { %v351_v55 = vadd.f32 %v350_v54, %v349_v53 }
 0x151   : > { %v352_v56 = vrot.slane %v351_v55, 1 }
 0x153   : > { %v353_v57 = vadd.f32 %v352_v56, %v351_v55 }
 0x155   : > { %v354_v58 = vmul.f32 %v353_v57, %v304_v42 }
 0x157   : > { %371 = vmatmul.f32.vlgmr.msra.gmra.mxu2 %v354_v58 }
 0x1da   : > { %v372_v59 = vpop.f32.mrf.mxu2 }
 0x1db   : > { %v373_v60 = vadd.f32 1e-05, %v372_v59 }
 0x1dd   : > { %516 = vrsqrt.f32 %v373_v60  ;;  %vm381_vm2 = vweird.f32 %v373_v60 }
 0x1e3   : > { %v517_v61 = vpop.eup %516 }
 0x1e4   : > { %v376_v62 = vmul.f32 %v517_v61, %v373_v60  ;;  %vm382_vm1 = vweird.f32 %v517_v61 }
 0x1e5   : > { %vm383_vm3 = vmor %vm381_vm2, %vm382_vm1 }
 0x1e6   : > { %v377_v63 = vmul.f32 %v517_v61, %v376_v62 }
 0x1e8   : > { %v378_v0 = vmul.f32 0.5, %v377_v63 }
 0x1ea   : > { %v379_v1 = vsub.f32 1.5, %v378_v0 }
 0x1ec   : > { %v380_v2 = vmul.f32 %v517_v61, %v379_v1 }
 0x1ee   : > { %v384_v3 = vsel %vm383_vm3, %v517_v61, %v380_v2 }
 0x1ef   : > { %v385_v4 = vperm.slane %v384_v3, 0 }
 0x1f1   : > { %v386_v5 = vmul.f32 %v385_v4, %v343_v47  ;;  %v387_v6 = vmul.f32 %v385_v4, %v344_v48 }
 0x1f3   : > { %v388_v7 = vmax.f32 %v386_v5, 0.0  ;;  %v389_v8 = vmax.f32 %v387_v6, 0.0 }
 0x1f5   : > { %390 = vst [vmem:[%s199_s26] sm:$0xff] %v388_v7 }
 0x1f6   : > { %391 = vst [vmem:[%s199_s26 + $0x8] sm:$0xff] %v389_v8 }
 0x1f7 PF: > { %s14_s15 = sadd.s32 1, %s524_s15  }
 0x1f8   : > { %p11_p4 = scmp.ge.s32.totalorder %s14_s15, 4  }
 0x1fa   :  { %13 = sbr.rel (!%p11_p4) target bundleno = 1 (0x1), region = 66 }

// kernel: generator_forward.18
= control target key start
LH: loop header
LB: loop body
LE: loop exit
PB: predicated region body
PF: predicated region fallthrough
CT: control target
= control target key end

     0   :  { %s656_s15 = smov 0   ;;  %s752_s0 = inlined_call_operand.vmem [shape: bf16[128,128], index: 0, kind: input, shape index: {}]   ;;  %s753_s1 = inlined_call_operand.vmem [shape: bf16[128,128], index: 1, kind: input, shape index: {}]   ;;  %s754_s2 = inlined_call_operand.vmem [shape: f32[1,128], index: 2, kind: input, shape index: {}]   ;;  %s755_s3 = inlined_call_operand.vmem [shape: f32[128,128], index: 3, kind: input, shape index: {}]   ;;  %s756_s4 = inlined_call_operand.vmem [shape: f32[128,128], index: 4, kind: output, shape index: {}]  }
   0x1 LB: > { %s529_s16 = sadd.s32 4294967295, %s628_s15   ;;  %p533_p0 = scmp.ge.s32.totalorder %s628_s15, 1  ;;  %s628_s15 = sphi %s656_s15, %s14_s15  }
   0x2   : > { %p163_p1 = scmp.lt.s32.totalorder %s628_s15, 3 }
   0x4   : > { %p164_p2 = pnand %p533_p0, %p163_p1 }
   0x5   : > { %s534_s25 = sshll.u32 (!%p164_p2), %s529_s16, 3 }
   0x6   : > { %167 = sbr.rel (%p164_p2) target bundleno = 545 (0x221), region = 36  ;;  %p190_p3 = scmp.lt.s32.totalorder (!%p164_p2), %s534_s25, 15 }
   0xb   : > { %v599_v0 = vld [vmem:[%s753_s1 + $0x38] sm:$0xff]  ;;  %v598_v1 = vld [vmem:[%s753_s1 + $0x30] sm:$0xff]  ;;  %v597_v2 = vld [vmem:[%s753_s1 + $0x28] sm:$0xff]  ;;  %s758_s25 = smov (!%p190_p3, %s534_s25), 15  ;;  %v630_v37 = vmov 64.0  }
   0xc   : > { %301 = vmatpush.bf16.msra.mxu0 %v599_v0  ;;  %600 = vmatpush.bf16.msra.mxu3 %v599_v0  ;;  %v596_v3 = vld [vmem:[%s753_s1 + $0x20] sm:$0xff]  ;;  %v595_v4 = vld [vmem:[%s753_s1 + $0x18] sm:$0xff]  ;;  %v594_v5 = vld [vmem:[%s753_s1 + $0x10] sm:$0xff]  ;;  %s535_s6 = sshll.u32 %s758_s25, 2  ;;  %618 = vrcp.f32 %v630_v37  ;;  %s537_s23 = sshll.u32 %s758_s25, 3 }
   0xd   : > { %v593_v6 = vld [vmem:[%s753_s1 + $0x8] sm:$0xff]  ;;  %v592_v7 = vld [vmem:[%s753_s1] sm:$0xff]  ;;  %s193_s11 = scalar_lea.vmem %s752_s0, %s535_s6  ;;  %v366_v12 = vld [vmem:[%s755_s3 + $0x78] sm:$0xff]  ;;  %s199_s27 = scalar_lea.vmem %s756_s4, %s537_s23 }
   0xe   : > { %v588_v8 = vld [vmem:[%s193_s11] sm:$0xff]  ;;  %v590_v9 = vld [vmem:[%s193_s11 + $0x10] sm:$0xff]  ;;  %v589_v10 = vld [vmem:[%s193_s11 + $0x8] sm:$0xff]  ;;  %367 = vmatpush.msra.mxu1 %v366_v12  ;;  %418 = vmatpush.msra.mxu2 %v366_v12 }
   0xf   : > { %v591_v11 = vld [vmem:[%s193_s11 + $0x18] sm:$0xff]  ;;  %v365_v13 = vld [vmem:[%s755_s3 + $0x70] sm:$0xff]  ;;  %v364_v14 = vld [vmem:[%s755_s3 + $0x68] sm:$0xff] }
  0x10   : > { %302 = vmatpush.bf16.msra.mxu0 %v598_v1  ;;  %601 = vmatpush.bf16.msra.mxu3 %v598_v1  ;;  %v363_v15 = vld [vmem:[%s755_s3 + $0x60] sm:$0xff]  ;;  %v362_v16 = vld [vmem:[%s755_s3 + $0x58] sm:$0xff]  ;;  %v361_v17 = vld [vmem:[%s755_s3 + $0x50] sm:$0xff] }
  0x11   : > { %368 = vmatpush.msra.mxu1 %v365_v13  ;;  %419 = vmatpush.msra.mxu2 %v365_v13  ;;  %v360_v18 = vld [vmem:[%s755_s3 + $0x48] sm:$0xff]  ;;  %v359_v20 = vld [vmem:[%s755_s3 + $0x40] sm:$0xff]  ;;  %v358_v21 = vld [vmem:[%s755_s3 + $0x38] sm:$0xff] }
  0x12   : > { %v357_v22 = vld [vmem:[%s755_s3 + $0x30] sm:$0xff]  ;;  %v356_v24 = vld [vmem:[%s755_s3 + $0x28] sm:$0xff]  ;;  %v355_v26 = vld [vmem:[%s755_s3 + $0x20] sm:$0xff]  ;;  %v619_v43 = vpop.eup %618 }
  0x13   : > { %369 = vmatpush.msra.mxu1 %v364_v14  ;;  %420 = vmatpush.msra.mxu2 %v364_v14  ;;  %v354_v27 = vld [vmem:[%s755_s3 + $0x18] sm:$0xff]  ;;  %v353_v28 = vld [vmem:[%s755_s3 + $0x10] sm:$0xff]  ;;  %v352_v29 = vld [vmem:[%s755_s3 + $0x8] sm:$0xff]  ;;  %v344_v49 = vmul.f32 64.0, %v619_v43  ;;  %vm348_vm0 = vweird.f32 %v619_v43 }
  0x14   : > { %303 = vmatpush.bf16.msra.mxu0 %v597_v2  ;;  %602 = vmatpush.bf16.msra.mxu3 %v597_v2  ;;  %v351_v31 = vld [vmem:[%s755_s3] sm:$0xff] }
  0x15   : > { %370 = vmatpush.msra.mxu1 %v363_v15  ;;  %421 = vmatpush.msra.mxu2 %v363_v15  ;;  %v617_v33 = vld [vmem:[%s754_s2] ss:$0 sm:$0xff]  ;;  %v345_v54 = vsub.f32 1.0, %v344_v49 }
  0x17   : > { %371 = vmatpush.msra.mxu1 %v362_v16  ;;  %422 = vmatpush.msra.mxu2 %v362_v16  ;;  %v346_v57 = vmul.f32 %v619_v43, %v345_v54 }
  0x18   : > { %304 = vmatpush.bf16.msra.mxu0 %v596_v3  ;;  %603 = vmatpush.bf16.msra.mxu3 %v596_v3 }
  0x19   : > { %372 = vmatpush.msra.mxu1 %v361_v17  ;;  %423 = vmatpush.msra.mxu2 %v361_v17  ;;  %v347_v60 = vadd.f32 %v619_v43, %v346_v57 }
  0x1b   : > { %373 = vmatpush.msra.mxu1 %v360_v18  ;;  %424 = vmatpush.msra.mxu2 %v360_v18  ;;  %v349_v63 = vsel %vm348_vm0, %v619_v43, %v347_v60 }
  0x1c   : > { %305 = vmatpush.bf16.msra.mxu0 %v595_v4  ;;  %604 = vmatpush.bf16.msra.mxu3 %v595_v4 }
  0x1d   : > { %374 = vmatpush.msra.mxu1 %v359_v20  ;;  %425 = vmatpush.msra.mxu2 %v359_v20 }
  0x1f   : > { %375 = vmatpush.msra.mxu1 %v358_v21  ;;  %426 = vmatpush.msra.mxu2 %v358_v21 }
  0x20   : > { %306 = vmatpush.bf16.msra.mxu0 %v594_v5  ;;  %605 = vmatpush.bf16.msra.mxu3 %v594_v5 }
  0x21   : > { %376 = vmatpush.msra.mxu1 %v357_v22  ;;  %427 = vmatpush.msra.mxu2 %v357_v22 }
  0x23   : > { %377 = vmatpush.msra.mxu1 %v356_v24  ;;  %428 = vmatpush.msra.mxu2 %v356_v24 }
  0x24   : > { %307 = vmatpush.bf16.msra.mxu0 %v593_v6  ;;  %606 = vmatpush.bf16.msra.mxu3 %v593_v6 }
  0x25   : > { %378 = vmatpush.msra.mxu1 %v355_v26  ;;  %429 = vmatpush.msra.mxu2 %v355_v26 }
  0x27   : > { %379 = vmatpush.msra.mxu1 %v354_v27  ;;  %430 = vmatpush.msra.mxu2 %v354_v27 }
  0x28   : > { %308 = vmatpush.bf16.msra.mxu0 %v592_v7  ;;  %607 = vmatpush.bf16.msra.mxu3 %v592_v7 }
  0x29   : > { %380 = vmatpush.msra.mxu1 %v353_v28  ;;  %431 = vmatpush.msra.mxu2 %v353_v28 }
  0x2b   : > { %309 = vmatmul.bf16.vlgmr.msra.gmra.mxu0 %v588_v8  ;;  %319 = vmatmul.bf16.vlgmr.msra.gmra.mxu3 %v590_v9 }
  0x2c   : > { %381 = vmatpush.msra.mxu1 %v352_v29  ;;  %432 = vmatpush.msra.mxu2 %v352_v29 }
  0x2e   : > { %382 = vmatpush.msra.mxu1 %v351_v31  ;;  %433 = vmatpush.msra.mxu2 %v351_v31 }
  0x3b   : > { %314 = vmatmul.bf16.gmra.mxu0 %v589_v10  ;;  %324 = vmatmul.bf16.gmra.mxu3 %v591_v11 }
  0xa8   : > { %v310_v19 = vpop.f32.mrf.mxu0 }
  0xa9   : > { %v311_v35 = vadd.f32 %v617_v33, %v310_v19 }
  0xae   : > { %v320_v23 = vpop.f32.mrf.mxu3 }
  0xaf   : > { %v321_v44 = vadd.f32 %v617_v33, %v320_v23 }
  0xb0   : > { %v312_v25 = vpop.f32.mrf.mxu0 }
  0xb1   : > { %v313_v34 = vadd.f32 %v617_v33, %v312_v25 }
  0xb3   : > { %v330_v39 = vadd.f32 %v313_v34, %v311_v35 }
  0xb6   : > { %v322_v30 = vpop.f32.mrf.mxu3 }
  0xb7   : > { %v323_v46 = vadd.f32 %v617_v33, %v322_v30 }
  0xb8   : > { %v315_v32 = vpop.f32.mrf.mxu0 }
  0xb9   : > { %v316_v36 = vadd.f32 %v617_v33, %v315_v32 }
  0xbb   : > { %v331_v41 = vadd.f32 %v330_v39, %v316_v36 }
  0xbe   : > { %v325_v38 = vpop.f32.mrf.mxu3 }
  0xbf   : > { %v326_v50 = vadd.f32 %v617_v33, %v325_v38 }
  0xc0   : > { %v317_v40 = vpop.f32.mrf.mxu0 }
  0xc1   : > { %v318_v42 = vadd.f32 %v617_v33, %v317_v40 }
  0xc3   : > { %v332_v45 = vadd.f32 %v331_v41, %v318_v42 }
  0xc5   : > { %v333_v47 = vadd.f32 %v332_v45, %v321_v44 }
  0xc6   : > { %v327_v48 = vpop.f32.mrf.mxu3 }
  0xc7   : > { %v334_v51 = vadd.f32 %v333_v47, %v323_v46  ;;  %v328_v52 = vadd.f32 %v617_v33, %v327_v48 }
  0xc9   : > { %v335_v53 = vadd.f32 %v334_v51, %v326_v50 }
  0xcb   : > { %v336_v55 = vadd.f32 %v335_v53, %v328_v52 }
  0xcd   : > { %v337_v56 = vrot.slane %v336_v55, 4 }
  0xcf   : > { %v338_v58 = vadd.f32 %v337_v56, %v336_v55 }
  0xd1   : > { %v339_v59 = vrot.slane %v338_v58, 2 }
  0xd3   : > { %v340_v61 = vadd.f32 %v339_v59, %v338_v58 }
  0xd5   : > { %v341_v62 = vrot.slane %v340_v61, 1 }
  0xd7   : > { %v342_v0 = vadd.f32 %v341_v62, %v340_v61 }
  0xd9   : > { %v350_v1 = vmul.f32 %v349_v63, %v342_v0 }
  0xdb   : > { %383 = vmatmul.f32.vlgmr.msra.gmra.mxu1 %v350_v1 }
 0x158   : > { %v384_v2 = vpop.f32.mrf.mxu1 }
 0x159   : > { %v387_v3 = vperm.slane %v384_v2, 0 }
 0x15b   : > { %v388_v4 = vsub.f32 %v311_v35, %v387_v3  ;;  %v389_v5 = vsub.f32 %v313_v34, %v387_v3  ;;  %v390_v6 = vsub.f32 %v316_v36, %v387_v3  ;;  %v391_v7 = vsub.f32 %v318_v42, %v387_v3 }
 0x15c   : > { %v392_v10 = vsub.f32 %v321_v44, %v387_v3  ;;  %v393_v13 = vsub.f32 %v323_v46, %v387_v3  ;;  %v394_v16 = vsub.f32 %v326_v50, %v387_v3  ;;  %v395_v19 = vsub.f32 %v328_v52, %v387_v3 }
 0x15d   : > { %v396_v8 = vmul.f32 %v388_v4, %v388_v4  ;;  %v397_v9 = vmul.f32 %v389_v5, %v389_v5  ;;  %v398_v11 = vmul.f32 %v390_v6, %v390_v6  ;;  %v399_v14 = vmul.f32 %v391_v7, %v391_v7 }
 0x15e   : > { %v400_v17 = vmul.f32 %v392_v10, %v392_v10  ;;  %v401_v20 = vmul.f32 %v393_v13, %v393_v13  ;;  %v402_v22 = vmul.f32 %v394_v16, %v394_v16  ;;  %v403_v24 = vmul.f32 %v395_v19, %v395_v19 }
 0x15f   : > { %v404_v12 = vadd.f32 %v397_v9, %v396_v8 }
 0x161   : > { %v405_v15 = vadd.f32 %v404_v12, %v398_v11 }
 0x163   : > { %v406_v18 = vadd.f32 %v405_v15, %v399_v14 }
 0x165   : > { %v407_v21 = vadd.f32 %v406_v18, %v400_v17 }
 0x167   : > { %v408_v23 = vadd.f32 %v407_v21, %v401_v20 }
 0x169   : > { %v409_v25 = vadd.f32 %v408_v23, %v402_v22 }
 0x16b   : > { %v410_v26 = vadd.f32 %v409_v25, %v403_v24 }
 0x16d   : > { %v411_v27 = vrot.slane %v410_v26, 4 }
 0x16f   : > { %v412_v28 = vadd.f32 %v411_v27, %v410_v26 }
 0x171   : > { %v413_v29 = vrot.slane %v412_v28, 2 }
 0x173   : > { %v414_v30 = vadd.f32 %v413_v29, %v412_v28 }
 0x175   : > { %v415_v31 = vrot.slane %v414_v30, 1 }
 0x177   : > { %v416_v32 = vadd.f32 %v415_v31, %v414_v30 }
 0x179   : > { %v417_v33 = vmul.f32 %v416_v32, %v349_v63 }
 0x17b   : > { %434 = vmatmul.f32.vlgmr.msra.gmra.mxu2 %v417_v33 }
 0x1fe   : > { %v435_v34 = vpop.f32.mrf.mxu2 }
 0x1ff   : > { %v436_v35 = vadd.f32 1e-05, %v435_v34 }
 0x201   : > { %620 = vrsqrt.f32 %v436_v35  ;;  %vm444_vm2 = vweird.f32 %v436_v35 }
 0x207   : > { %v621_v36 = vpop.eup %620 }
 0x208   : > { %v439_v37 = vmul.f32 %v621_v36, %v436_v35  ;;  %vm445_vm1 = vweird.f32 %v621_v36 }
 0x209   : > { %vm446_vm3 = vmor %vm444_vm2, %vm445_vm1 }
 0x20a   : > { %v440_v38 = vmul.f32 %v621_v36, %v439_v37 }
 0x20c   : > { %v441_v39 = vmul.f32 0.5, %v440_v38 }
 0x20e   : > { %v442_v40 = vsub.f32 1.5, %v441_v39 }
 0x210   : > { %v443_v41 = vmul.f32 %v621_v36, %v442_v40 }
 0x212   : > { %v447_v42 = vsel %vm446_vm3, %v621_v36, %v443_v41 }
 0x213   : > { %v448_v43 = vperm.slane %v447_v42, 0 }
 0x215   : > { %v449_v44 = vmul.f32 %v448_v43, %v388_v4  ;;  %v450_v45 = vmul.f32 %v448_v43, %v389_v5  ;;  %v451_v46 = vmul.f32 %v448_v43, %v390_v6  ;;  %v452_v47 = vmul.f32 %v448_v43, %v391_v7 }
 0x216   : > { %v453_v48 = vmul.f32 %v448_v43, %v392_v10  ;;  %v454_v49 = vmul.f32 %v448_v43, %v393_v13  ;;  %v455_v50 = vmul.f32 %v448_v43, %v394_v16  ;;  %v456_v54 = vmul.f32 %v448_v43, %v395_v19 }
 0x217   : > { %v457_v51 = vmax.f32 %v449_v44, 0.0  ;;  %v458_v52 = vmax.f32 %v450_v45, 0.0  ;;  %v459_v53 = vmax.f32 %v451_v46, 0.0  ;;  %v460_v55 = vmax.f32 %v452_v47, 0.0 }
 0x218   : > { %v461_v56 = vmax.f32 %v453_v48, 0.0  ;;  %v462_v57 = vmax.f32 %v454_v49, 0.0  ;;  %v463_v58 = vmax.f32 %v455_v50, 0.0  ;;  %v464_v59 = vmax.f32 %v456_v54, 0.0 }
 0x219   : > { %465 = vst [vmem:[%s199_s27] sm:$0xff] %v457_v51 }
 0x21a   : > { %466 = vst [vmem:[%s199_s27 + $0x8] sm:$0xff] %v458_v52 }
 0x21b   : > { %467 = vst [vmem:[%s199_s27 + $0x10] sm:$0xff] %v459_v53 }
 0x21c   : > { %468 = vst [vmem:[%s199_s27 + $0x18] sm:$0xff] %v460_v55 }
 0x21d   : > { %469 = vst [vmem:[%s199_s27 + $0x20] sm:$0xff] %v461_v56 }
 0x21e   : > { %470 = vst [vmem:[%s199_s27 + $0x28] sm:$0xff] %v462_v57 }
 0x21f   : > { %471 = vst [vmem:[%s199_s27 + $0x30] sm:$0xff] %v463_v58 }
 0x220   : > { %472 = vst [vmem:[%s199_s27 + $0x38] sm:$0xff] %v464_v59 }
 0x221 PF: > { %s14_s15 = sadd.s32 1, %s628_s15  }
 0x222   : > { %p11_p4 = scmp.ge.s32.totalorder %s14_s15, 4  }
 0x224   :  { %13 = sbr.rel (!%p11_p4) target bundleno = 1 (0x1), region = 66 }

// kernel: generator_forward.19
= control target key start
LH: loop header
LB: loop body
LE: loop exit
PB: predicated region body
PF: predicated region fallthrough
CT: control target
= control target key end

     0   :  { %s1891_s12 = smov 0   ;;  %s2209_s0 = inlined_call_operand.vmem [shape: bf16[512,512], index: 0, kind: input, shape index: {}]   ;;  %s2210_s1 = inlined_call_operand.vmem [shape: bf16[512,128], index: 1, kind: input, shape index: {}]   ;;  %s2211_s2 = inlined_call_operand.vmem [shape: f32[1,128], index: 2, kind: input, shape index: {}]   ;;  %s2212_s3 = inlined_call_operand.vmem [shape: f32[512,128], index: 3, kind: output, shape index: {}]  }
   0x1 LB: > { %s1297_s13 = sadd.s32 4294967295, %s1869_s12   ;;  %p1301_p0 = scmp.ge.s32.totalorder %s1869_s12, 1  ;;  %s1869_s12 = sphi %s1891_s12, %s13_s12  }
   0x2   : > { %p139_p1 = scmp.lt.s32.totalorder %s1869_s12, 3 }
   0x4   : > { %p140_p2 = pnand %p1301_p0, %p139_p1 }
   0x5   : > { %s1302_s11 = sshll.u32 (!%p140_p2), %s1297_s13, 5 }
   0x6   : > { %143 = sbr.rel (%p140_p2) target bundleno = 437 (0x1b5), region = 32  ;;  %p165_p3 = scmp.lt.s32.totalorder (!%p140_p2), %s1302_s11, 63 }
   0xb   : > { %v1765_v0 = vld [vmem:[%s2210_s1 + $0x38] sm:$0xff]  ;;  %v1764_v4 = vld [vmem:[%s2210_s1 + $0x30] sm:$0xff]  ;;  %v1763_v8 = vld [vmem:[%s2210_s1 + $0x28] sm:$0xff]  ;;  %s2214_s11 = smov (!%p165_p3, %s1302_s11), 63 }
   0xc   : > { %v1773_v1 = vld [vmem:[%s2210_s1 + $0x78] sm:$0xff]  ;;  %821 = vmatpush.bf16.msra.mxu0 %v1765_v0  ;;  %v1772_v5 = vld [vmem:[%s2210_s1 + $0x70] sm:$0xff]  ;;  %v1771_v9 = vld [vmem:[%s2210_s1 + $0x68] sm:$0xff]  ;;  %s1693_s10 = sshll.u32 %s2214_s11, 4  ;;  %s1306_s7 = sshll.u32 %s2214_s11, 3 }
   0xd   : > { %v1781_v2 = vld [vmem:[%s2210_s1 + $0xb8] sm:$0xff]  ;;  %910 = vmatpush.bf16.msra.mxu1 %v1773_v1  ;;  %v1780_v6 = vld [vmem:[%s2210_s1 + $0xb0] sm:$0xff]  ;;  %v1779_v10 = vld [vmem:[%s2210_s1 + $0xa8] sm:$0xff]  ;;  %s1983_s20 = scalar_lea.vmem %s2209_s0, %s1693_s10  ;;  %s2094_s10 = scalar_lea.vmem %s2212_s3, %s1306_s7 }
   0xe   : > { %v1789_v3 = vld [vmem:[%s2210_s1 + $0xf8] sm:$0xff]  ;;  %999 = vmatpush.bf16.msra.mxu2 %v1781_v2  ;;  %v1788_v7 = vld [vmem:[%s2210_s1 + $0xf0] sm:$0xff]  ;;  %v1787_v11 = vld [vmem:[%s2210_s1 + $0xe8] sm:$0xff] }
   0xf   : > { %1088 = vmatpush.bf16.msra.mxu3 %v1789_v3  ;;  %v1762_v12 = vld [vmem:[%s2210_s1 + $0x20] sm:$0xff]  ;;  %v1761_v16 = vld [vmem:[%s2210_s1 + $0x18] sm:$0xff]  ;;  %v1760_v20 = vld [vmem:[%s2210_s1 + $0x10] sm:$0xff] }
  0x10   : > { %822 = vmatpush.bf16.msra.mxu0 %v1764_v4  ;;  %v1770_v13 = vld [vmem:[%s2210_s1 + $0x60] sm:$0xff]  ;;  %v1769_v17 = vld [vmem:[%s2210_s1 + $0x58] sm:$0xff]  ;;  %v1768_v21 = vld [vmem:[%s2210_s1 + $0x50] sm:$0xff] }
  0x11   : > { %911 = vmatpush.bf16.msra.mxu1 %v1772_v5  ;;  %v1778_v14 = vld [vmem:[%s2210_s1 + $0xa0] sm:$0xff]  ;;  %v1777_v18 = vld [vmem:[%s2210_s1 + $0x98] sm:$0xff]  ;;  %v1776_v22 = vld [vmem:[%s2210_s1 + $0x90] sm:$0xff] }
  0x12   : > { %1000 = vmatpush.bf16.msra.mxu2 %v1780_v6  ;;  %v1786_v15 = vld [vmem:[%s2210_s1 + $0xe0] sm:$0xff]  ;;  %v1785_v19 = vld [vmem:[%s2210_s1 + $0xd8] sm:$0xff]  ;;  %v1784_v23 = vld [vmem:[%s2210_s1 + $0xd0] sm:$0xff] }
  0x13   : > { %1089 = vmatpush.bf16.msra.mxu3 %v1788_v7  ;;  %v1759_v24 = vld [vmem:[%s2210_s1 + $0x8] sm:$0xff]  ;;  %v1758_v28 = vld [vmem:[%s2210_s1] sm:$0xff]  ;;  %v1696_v33 = vld [vmem:[%s1983_s20 + $0xc] sm:$0xf0] }
  0x14   : > { %823 = vmatpush.bf16.msra.mxu0 %v1763_v8  ;;  %v1767_v25 = vld [vmem:[%s2210_s1 + $0x48] sm:$0xff]  ;;  %v1766_v29 = vld [vmem:[%s2210_s1 + $0x40] sm:$0xff]  ;;  %v1311_v35 = vld [vmem:[%s1983_s20 + $0x10] sm:$0xf0] }
  0x15   : > { %912 = vmatpush.bf16.msra.mxu1 %v1771_v9  ;;  %v1775_v26 = vld [vmem:[%s2210_s1 + $0x88] sm:$0xff]  ;;  %v1774_v30 = vld [vmem:[%s2210_s1 + $0x80] sm:$0xff]  ;;  %v1697_v37 = vld [vmem:[%s1983_s20 + $0x14] sm:$0xf0] }
  0x16   : > { %1001 = vmatpush.bf16.msra.mxu2 %v1779_v10  ;;  %v1783_v27 = vld [vmem:[%s2210_s1 + $0xc8] sm:$0xff]  ;;  %v1782_v31 = vld [vmem:[%s2210_s1 + $0xc0] sm:$0xff]  ;;  %v1319_v39 = vld [vmem:[%s1983_s20 + $0x18] sm:$0xf0] }
  0x17   : > { %1090 = vmatpush.bf16.msra.mxu3 %v1787_v11  ;;  %v1309_v32 = vld [vmem:[%s1983_s20] sm:$0xf]  ;;  %v1694_v34 = vld [vmem:[%s1983_s20 + $0x4] sm:$0xf]  ;;  %v1317_v36 = vld [vmem:[%s1983_s20 + $0x8] sm:$0xf] }
  0x18   : > { %824 = vmatpush.bf16.msra.mxu0 %v1762_v12  ;;  %v1695_v38 = vld [vmem:[%s1983_s20 + $0xc] sm:$0xf]  ;;  %v1310_v40 = vor.u32 %v1696_v33, %v1309_v32  ;;  %v1314_v41 = vor.u32 %v1694_v34, %v1311_v35  ;;  %v1318_v42 = vor.u32 %v1697_v37, %v1317_v36  ;;  %v1325_v44 = vld [vmem:[%s1983_s20 + $0x20] sm:$0xf]  ;;  %v1700_v45 = vld [vmem:[%s1983_s20 + $0x2c] sm:$0xf0] }
  0x19   : > { %913 = vmatpush.bf16.msra.mxu1 %v1770_v13  ;;  %v1322_v43 = vor.u32 %v1695_v38, %v1319_v39  ;;  %v1698_v46 = vld [vmem:[%s1983_s20 + $0x24] sm:$0xf]  ;;  %v1327_v47 = vld [vmem:[%s1983_s20 + $0x30] sm:$0xf0]  ;;  %v1333_v48 = vld [vmem:[%s1983_s20 + $0x28] sm:$0xf]  ;;  %v1326_v52 = vor.u32 %v1700_v45, %v1325_v44 }
  0x1a   : > { %1002 = vmatpush.bf16.msra.mxu2 %v1778_v14  ;;  %v1701_v49 = vld [vmem:[%s1983_s20 + $0x34] sm:$0xf0]  ;;  %v1699_v50 = vld [vmem:[%s1983_s20 + $0x2c] sm:$0xf]  ;;  %v1335_v51 = vld [vmem:[%s1983_s20 + $0x38] sm:$0xf0]  ;;  %v1330_v53 = vor.u32 %v1698_v46, %v1327_v47 }
  0x1b   : > { %1091 = vmatpush.bf16.msra.mxu3 %v1786_v15  ;;  %v1334_v54 = vor.u32 %v1701_v49, %v1333_v48  ;;  %v1338_v55 = vor.u32 %v1699_v50, %v1335_v51  ;;  %v1341_v56 = vld [vmem:[%s1983_s20 + $0x40] sm:$0xf]  ;;  %v1704_v57 = vld [vmem:[%s1983_s20 + $0x4c] sm:$0xf0]  ;;  %v1702_v58 = vld [vmem:[%s1983_s20 + $0x44] sm:$0xf] }
  0x1c   : > { %825 = vmatpush.bf16.msra.mxu0 %v1761_v16  ;;  %v1343_v59 = vld [vmem:[%s1983_s20 + $0x50] sm:$0xf0]  ;;  %v1349_v60 = vld [vmem:[%s1983_s20 + $0x48] sm:$0xf]  ;;  %v1705_v61 = vld [vmem:[%s1983_s20 + $0x54] sm:$0xf0]  ;;  %v1342_v0 = vor.u32 %v1704_v57, %v1341_v56 }
  0x1d   : > { %914 = vmatpush.bf16.msra.mxu1 %v1769_v17  ;;  %v1703_v62 = vld [vmem:[%s1983_s20 + $0x4c] sm:$0xf]  ;;  %v1351_v63 = vld [vmem:[%s1983_s20 + $0x58] sm:$0xf0]  ;;  %v1346_v1 = vor.u32 %v1702_v58, %v1343_v59  ;;  %v1350_v2 = vor.u32 %v1705_v61, %v1349_v60  ;;  %v1357_v4 = vld [vmem:[%s1983_s20 + $0x60] sm:$0xf] }
  0x1e   : > { %1003 = vmatpush.bf16.msra.mxu2 %v1777_v18  ;;  %v1354_v3 = vor.u32 %v1703_v62, %v1351_v63  ;;  %v1708_v5 = vld [vmem:[%s1983_s20 + $0x6c] sm:$0xf0]  ;;  %v1706_v6 = vld [vmem:[%s1983_s20 + $0x64] sm:$0xf]  ;;  %v1359_v7 = vld [vmem:[%s1983_s20 + $0x70] sm:$0xf0] }
  0x1f   : > { %1092 = vmatpush.bf16.msra.mxu3 %v1785_v19  ;;  %v1365_v8 = vld [vmem:[%s1983_s20 + $0x68] sm:$0xf]  ;;  %v1709_v9 = vld [vmem:[%s1983_s20 + $0x74] sm:$0xf0]  ;;  %v1707_v10 = vld [vmem:[%s1983_s20 + $0x6c] sm:$0xf]  ;;  %v1358_v12 = vor.u32 %v1708_v5, %v1357_v4  ;;  %v1362_v13 = vor.u32 %v1706_v6, %v1359_v7 }
  0x20   : > { %826 = vmatpush.bf16.msra.mxu0 %v1760_v20  ;;  %v1367_v11 = vld [vmem:[%s1983_s20 + $0x78] sm:$0xf0]  ;;  %v1366_v14 = vor.u32 %v1709_v9, %v1365_v8  ;;  %v1373_v16 = vld [vmem:[%s1983_s20 + $0x80] sm:$0xf]  ;;  %v1712_v17 = vld [vmem:[%s1983_s20 + $0x8c] sm:$0xf0] }
  0x21   : > { %915 = vmatpush.bf16.msra.mxu1 %v1768_v21  ;;  %v1370_v15 = vor.u32 %v1707_v10, %v1367_v11  ;;  %v1710_v18 = vld [vmem:[%s1983_s20 + $0x84] sm:$0xf]  ;;  %v1375_v19 = vld [vmem:[%s1983_s20 + $0x90] sm:$0xf0]  ;;  %v1381_v20 = vld [vmem:[%s1983_s20 + $0x88] sm:$0xf] }
  0x22   : > { %1004 = vmatpush.bf16.msra.mxu2 %v1776_v22  ;;  %v1713_v21 = vld [vmem:[%s1983_s20 + $0x94] sm:$0xf0]  ;;  %v1711_v22 = vld [vmem:[%s1983_s20 + $0x8c] sm:$0xf]  ;;  %v1397_v32 = vld [vmem:[%s1983_s20 + $0xa8] sm:$0xf] }
  0x23   : > { %1093 = vmatpush.bf16.msra.mxu3 %v1784_v23  ;;  %v1383_v23 = vld [vmem:[%s1983_s20 + $0x98] sm:$0xf0]  ;;  %v1717_v33 = vld [vmem:[%s1983_s20 + $0xb4] sm:$0xf0]  ;;  %v1715_v34 = vld [vmem:[%s1983_s20 + $0xac] sm:$0xf] }
  0x24   : > { %827 = vmatpush.bf16.msra.mxu0 %v1759_v24  ;;  %v1374_v24 = vor.u32 %v1712_v17, %v1373_v16  ;;  %v1399_v35 = vld [vmem:[%s1983_s20 + $0xb8] sm:$0xf0]  ;;  %v1398_v38 = vor.u32 %v1717_v33, %v1397_v32  ;;  %v1413_v44 = vld [vmem:[%s1983_s20 + $0xc8] sm:$0xf]  ;;  %v1721_v45 = vld [vmem:[%s1983_s20 + $0xd4] sm:$0xf0] }
  0x25   : > { %916 = vmatpush.bf16.msra.mxu1 %v1767_v25  ;;  %v1378_v25 = vor.u32 %v1710_v18, %v1375_v19  ;;  %v1402_v39 = vor.u32 %v1715_v34, %v1399_v35  ;;  %v1719_v46 = vld [vmem:[%s1983_s20 + $0xcc] sm:$0xf]  ;;  %v1415_v47 = vld [vmem:[%s1983_s20 + $0xd8] sm:$0xf0]  ;;  %v1414_v50 = vor.u32 %v1721_v45, %v1413_v44  ;;  %v1429_v56 = vld [vmem:[%s1983_s20 + $0xe8] sm:$0xf] }
  0x26   : > { %1005 = vmatpush.bf16.msra.mxu2 %v1775_v26  ;;  %v1382_v26 = vor.u32 %v1713_v21, %v1381_v20  ;;  %v1418_v51 = vor.u32 %v1719_v46, %v1415_v47  ;;  %v1725_v57 = vld [vmem:[%s1983_s20 + $0xf4] sm:$0xf0]  ;;  %v1723_v58 = vld [vmem:[%s1983_s20 + $0xec] sm:$0xf]  ;;  %v1431_v59 = vld [vmem:[%s1983_s20 + $0xf8] sm:$0xf0] }
  0x27   : > { %1094 = vmatpush.bf16.msra.mxu3 %v1783_v27  ;;  %v1386_v27 = vor.u32 %v1711_v22, %v1383_v23  ;;  %v1430_v62 = vor.u32 %v1725_v57, %v1429_v56  ;;  %v1434_v63 = vor.u32 %v1723_v58, %v1431_v59  ;;  %v1439_v4 = vld [vmem:[%s1983_s20 + $0x110] sm:$0xf0]  ;;  %v1445_v5 = vld [vmem:[%s1983_s20 + $0x108] sm:$0xf]  ;;  %v1729_v6 = vld [vmem:[%s1983_s20 + $0x114] sm:$0xf0] }
  0x28   : > { %828 = vmatpush.bf16.msra.mxu0 %v1758_v28  ;;  %v1389_v28 = vld [vmem:[%s1983_s20 + $0xa0] sm:$0xf]  ;;  %v1727_v7 = vld [vmem:[%s1983_s20 + $0x10c] sm:$0xf]  ;;  %v1447_v8 = vld [vmem:[%s1983_s20 + $0x118] sm:$0xf0] }
  0x29   : > { %917 = vmatpush.bf16.msra.mxu1 %v1766_v29  ;;  %v1716_v29 = vld [vmem:[%s1983_s20 + $0xac] sm:$0xf0]  ;;  %v1734_v56 = vld [vmem:[%s1983_s20 + $0x144] sm:$0xf]  ;;  %v1471_v57 = vld [vmem:[%s1983_s20 + $0x150] sm:$0xf0] }
  0x2a   : > { %1006 = vmatpush.bf16.msra.mxu2 %v1774_v30  ;;  %v1714_v30 = vld [vmem:[%s1983_s20 + $0xa4] sm:$0xf]  ;;  %v1390_v36 = vor.u32 %v1716_v29, %v1389_v28  ;;  %v1461_v28 = vld [vmem:[%s1983_s20 + $0x128] sm:$0xf]  ;;  %v1733_v29 = vld [vmem:[%s1983_s20 + $0x134] sm:$0xf0] }
  0x2b   : > { %1095 = vmatpush.bf16.msra.mxu3 %v1782_v31  ;;  %829 = vmatmul.bf16.vlgmr.msra.gmra.mxu0 %v1310_v40  ;;  %v1391_v31 = vld [vmem:[%s1983_s20 + $0xb0] sm:$0xf0]  ;;  %v1405_v40 = vld [vmem:[%s1983_s20 + $0xc0] sm:$0xf]  ;;  %v1477_v58 = vld [vmem:[%s1983_s20 + $0x148] sm:$0xf] }
  0x2c   : > { %918 = vmatmul.bf16.vlgmr.msra.gmra.mxu1 %v1314_v41  ;;  %v1394_v37 = vor.u32 %v1714_v30, %v1391_v31  ;;  %v1720_v41 = vld [vmem:[%s1983_s20 + $0xcc] sm:$0xf0]  ;;  %v1731_v30 = vld [vmem:[%s1983_s20 + $0x12c] sm:$0xf]  ;;  %v1463_v31 = vld [vmem:[%s1983_s20 + $0x138] sm:$0xf0] }
  0x2d   : > { %1007 = vmatmul.bf16.vlgmr.msra.gmra.mxu2 %v1318_v42  ;;  %v1718_v42 = vld [vmem:[%s1983_s20 + $0xc4] sm:$0xf]  ;;  %v1406_v48 = vor.u32 %v1720_v41, %v1405_v40  ;;  %v1462_v40 = vor.u32 %v1733_v29, %v1461_v28  ;;  %v1466_v41 = vor.u32 %v1731_v30, %v1463_v31  ;;  %v1737_v59 = vld [vmem:[%s1983_s20 + $0x154] sm:$0xf0]  ;;  %v1495_v28 = vld [vmem:[%s1983_s20 + $0x178] sm:$0xf0] }
  0x2e   : > { %1096 = vmatmul.bf16.vlgmr.msra.gmra.mxu3 %v1322_v43  ;;  %v1407_v43 = vld [vmem:[%s1983_s20 + $0xd0] sm:$0xf0] }
  0x2f   : > { %v1410_v49 = vor.u32 %v1718_v42, %v1407_v43 }
  0x3b   : > { %834 = vmatmul.bf16.gmra.mxu0 %v1326_v52  ;;  %v1421_v52 = vld [vmem:[%s1983_s20 + $0xe0] sm:$0xf] }
  0x3c   : > { %923 = vmatmul.bf16.gmra.mxu1 %v1330_v53  ;;  %v1724_v53 = vld [vmem:[%s1983_s20 + $0xec] sm:$0xf0] }
  0x3d   : > { %1012 = vmatmul.bf16.gmra.mxu2 %v1334_v54  ;;  %v1722_v54 = vld [vmem:[%s1983_s20 + $0xe4] sm:$0xf]  ;;  %v1422_v60 = vor.u32 %v1724_v53, %v1421_v52 }
  0x3e   : > { %1101 = vmatmul.bf16.gmra.mxu3 %v1338_v55  ;;  %v1423_v55 = vld [vmem:[%s1983_s20 + $0xf0] sm:$0xf0] }
  0x3f   : > { %v1426_v61 = vor.u32 %v1722_v54, %v1423_v55  ;;  %v1469_v54 = vld [vmem:[%s1983_s20 + $0x140] sm:$0xf]  ;;  %v1736_v55 = vld [vmem:[%s1983_s20 + $0x14c] sm:$0xf0] }
  0x4b   : > { %839 = vmatmul.bf16.gmra.mxu0 %v1342_v0  ;;  %v2070_v0 = vld [vmem:[%s2211_s2] ss:$0 sm:$0xff] }
  0x4c   : > { %928 = vmatmul.bf16.gmra.mxu1 %v1346_v1  ;;  %v1437_v1 = vld [vmem:[%s1983_s20 + $0x100] sm:$0xf] }
  0x4d   : > { %1017 = vmatmul.bf16.gmra.mxu2 %v1350_v2  ;;  %v1728_v2 = vld [vmem:[%s1983_s20 + $0x10c] sm:$0xf0] }
  0x4e   : > { %1106 = vmatmul.bf16.gmra.mxu3 %v1354_v3  ;;  %v1726_v3 = vld [vmem:[%s1983_s20 + $0x104] sm:$0xf]  ;;  %v1438_v9 = vor.u32 %v1728_v2, %v1437_v1  ;;  %v1470_v2 = vor.u32 %v1736_v55, %v1469_v54  ;;  %v1503_v54 = vld [vmem:[%s1983_s20 + $0x190] sm:$0xf0]  ;;  %v1509_v55 = vld [vmem:[%s1983_s20 + $0x188] sm:$0xf] }
  0x4f   : > { %v1442_v10 = vor.u32 %v1726_v3, %v1439_v4  ;;  %v1474_v3 = vor.u32 %v1734_v56, %v1471_v57  ;;  %v1745_v56 = vld [vmem:[%s1983_s20 + $0x194] sm:$0xf0]  ;;  %v1743_v57 = vld [vmem:[%s1983_s20 + $0x18c] sm:$0xf] }
  0x5b   : > { %844 = vmatmul.bf16.gmra.mxu0 %v1358_v12 }
  0x5c   : > { %933 = vmatmul.bf16.gmra.mxu1 %v1362_v13  ;;  %v1446_v13 = vor.u32 %v1729_v6, %v1445_v5 }
  0x5d   : > { %1022 = vmatmul.bf16.gmra.mxu2 %v1366_v14  ;;  %v1450_v14 = vor.u32 %v1727_v7, %v1447_v8  ;;  %v1478_v7 = vor.u32 %v1737_v59, %v1477_v58  ;;  %v1511_v58 = vld [vmem:[%s1983_s20 + $0x198] sm:$0xf0] }
  0x5e   : > { %1111 = vmatmul.bf16.gmra.mxu3 %v1370_v15 }
  0x6b   : > { %849 = vmatmul.bf16.gmra.mxu0 %v1374_v24  ;;  %v1453_v24 = vld [vmem:[%s1983_s20 + $0x120] sm:$0xf] }
  0x6c   : > { %938 = vmatmul.bf16.gmra.mxu1 %v1378_v25  ;;  %v1732_v25 = vld [vmem:[%s1983_s20 + $0x12c] sm:$0xf0] }
  0x6d   : > { %1027 = vmatmul.bf16.gmra.mxu2 %v1382_v26  ;;  %v1730_v26 = vld [vmem:[%s1983_s20 + $0x124] sm:$0xf]  ;;  %v1454_v35 = vor.u32 %v1732_v25, %v1453_v24  ;;  %v1487_v24 = vld [vmem:[%s1983_s20 + $0x170] sm:$0xf0]  ;;  %v1493_v25 = vld [vmem:[%s1983_s20 + $0x168] sm:$0xf] }
  0x6e   : > { %1116 = vmatmul.bf16.gmra.mxu3 %v1386_v27  ;;  %v1455_v27 = vld [vmem:[%s1983_s20 + $0x130] sm:$0xf0] }
  0x7b   : > { %854 = vmatmul.bf16.gmra.mxu0 %v1390_v36  ;;  %v1458_v36 = vor.u32 %v1730_v26, %v1455_v27  ;;  %v1741_v26 = vld [vmem:[%s1983_s20 + $0x174] sm:$0xf0]  ;;  %v1739_v27 = vld [vmem:[%s1983_s20 + $0x16c] sm:$0xf] }
  0x7c   : > { %943 = vmatmul.bf16.gmra.mxu1 %v1394_v37 }
  0x7d   : > { %1032 = vmatmul.bf16.gmra.mxu2 %v1398_v38 }
  0x7e   : > { %1121 = vmatmul.bf16.gmra.mxu3 %v1402_v39 }
  0x8b   : > { %859 = vmatmul.bf16.gmra.mxu0 %v1406_v48 }
  0x8c   : > { %948 = vmatmul.bf16.gmra.mxu1 %v1410_v49 }
  0x8d   : > { %1037 = vmatmul.bf16.gmra.mxu2 %v1414_v50 }
  0x8e   : > { %1126 = vmatmul.bf16.gmra.mxu3 %v1418_v51 }
  0x9b   : > { %864 = vmatmul.bf16.gmra.mxu0 %v1422_v60  ;;  %v1735_v60 = vld [vmem:[%s1983_s20 + $0x14c] sm:$0xf] }
  0x9c   : > { %953 = vmatmul.bf16.gmra.mxu1 %v1426_v61  ;;  %v1479_v61 = vld [vmem:[%s1983_s20 + $0x158] sm:$0xf0] }
  0x9d   : > { %1042 = vmatmul.bf16.gmra.mxu2 %v1430_v62  ;;  %v1482_v8 = vor.u32 %v1735_v60, %v1479_v61 }
  0x9e   : > { %1131 = vmatmul.bf16.gmra.mxu3 %v1434_v63 }
  0xa8   : > { %v830_v11 = vpop.f32.mrf.mxu0 }
  0xa9   : > { %v919_v12 = vpop.f32.mrf.mxu1  ;;  %v831_v15 = vadd.f32 %v2070_v0, %v830_v11 }
  0xab   : > { %869 = vmatmul.bf16.gmra.mxu0 %v1438_v9  ;;  %v920_v16 = vadd.f32 %v919_v12, %v831_v15 }
  0xac   : > { %958 = vmatmul.bf16.gmra.mxu1 %v1442_v10 }
  0xad   : > { %1047 = vmatmul.bf16.gmra.mxu2 %v1446_v13 }
  0xae   : > { %1136 = vmatmul.bf16.gmra.mxu3 %v1450_v14 }
  0xb0   : > { %v1008_v17 = vpop.f32.mrf.mxu2  ;;  %v832_v20 = vpop.f32.mrf.mxu0 }
  0xb1   : > { %v1097_v18 = vpop.f32.mrf.mxu3  ;;  %v1009_v19 = vadd.f32 %v1008_v17, %v920_v16  ;;  %v921_v21 = vpop.f32.mrf.mxu1  ;;  %v833_v23 = vadd.f32 %v2070_v0, %v832_v20 }
  0xb3   : > { %v1098_v22 = vadd.f32 %v1097_v18, %v1009_v19  ;;  %v922_v32 = vadd.f32 %v921_v21, %v833_v23  ;;  %v1485_v21 = vld [vmem:[%s1983_s20 + $0x160] sm:$0xf]  ;;  %v1738_v23 = vld [vmem:[%s1983_s20 + $0x164] sm:$0xf] }
  0xb5   : > { %1799 = vtanh.f32 %v1098_v22  ;;  %v1740_v22 = vld [vmem:[%s1983_s20 + $0x16c] sm:$0xf0] }
  0xb8   : > { %v1010_v33 = vpop.f32.mrf.mxu2  ;;  %v835_v38 = vpop.f32.mrf.mxu0 }
  0xb9   : > { %v1099_v34 = vpop.f32.mrf.mxu3  ;;  %v1011_v37 = vadd.f32 %v1010_v33, %v922_v32  ;;  %v924_v39 = vpop.f32.mrf.mxu1  ;;  %v836_v42 = vadd.f32 %v2070_v0, %v835_v38  ;;  %v1486_v32 = vor.u32 %v1740_v22, %v1485_v21  ;;  %v1490_v33 = vor.u32 %v1738_v23, %v1487_v24  ;;  %v1519_v21 = vld [vmem:[%s1983_s20 + $0x1b0] sm:$0xf0]  ;;  %v1525_v22 = vld [vmem:[%s1983_s20 + $0x1a8] sm:$0xf]  ;;  %v1749_v23 = vld [vmem:[%s1983_s20 + $0x1b4] sm:$0xf0] }
  0xba   : > { %v1498_v38 = vor.u32 %v1739_v27, %v1495_v28  ;;  %v1747_v24 = vld [vmem:[%s1983_s20 + $0x1ac] sm:$0xf] }
  0xbb   : > { %v1800_v43 = vpop.eup %1799  ;;  %v1100_v44 = vadd.f32 %v1099_v34, %v1011_v37  ;;  %874 = vmatmul.bf16.gmra.mxu0 %v1454_v35  ;;  %v925_v45 = vadd.f32 %v924_v39, %v836_v42  ;;  %v1494_v37 = vor.u32 %v1741_v26, %v1493_v25  ;;  %v1527_v25 = vld [vmem:[%s1983_s20 + $0x1b8] sm:$0xf0] }
  0xbc   : > { %1209 = vst [vmem:[%s2094_s10] sm:$0xff] %v1800_v43  ;;  %963 = vmatmul.bf16.gmra.mxu1 %v1458_v36 }
  0xbd   : > { %1801 = vtanh.f32 %v1100_v44  ;;  %1052 = vmatmul.bf16.gmra.mxu2 %v1462_v40 }
  0xbe   : > { %1141 = vmatmul.bf16.gmra.mxu3 %v1466_v41 }
  0xc0   : > { %v1013_v46 = vpop.f32.mrf.mxu2  ;;  %v837_v49 = vpop.f32.mrf.mxu0 }
  0xc1   : > { %v1102_v47 = vpop.f32.mrf.mxu3  ;;  %v1014_v48 = vadd.f32 %v1013_v46, %v925_v45  ;;  %v926_v50 = vpop.f32.mrf.mxu1  ;;  %v838_v53 = vadd.f32 %v2070_v0, %v837_v49 }
  0xc3   : > { %v1802_v51 = vpop.eup %1801  ;;  %v1103_v52 = vadd.f32 %v1102_v47, %v1014_v48  ;;  %v927_v62 = vadd.f32 %v926_v50, %v838_v53  ;;  %v1742_v53 = vld [vmem:[%s1983_s20 + $0x184] sm:$0xf] }
  0xc4   : > { %1210 = vst [vmem:[%s2094_s10 + $0x8] sm:$0xff] %v1802_v51  ;;  %v1501_v51 = vld [vmem:[%s1983_s20 + $0x180] sm:$0xf] }
  0xc5   : > { %1803 = vtanh.f32 %v1103_v52  ;;  %v1744_v52 = vld [vmem:[%s1983_s20 + $0x18c] sm:$0xf0] }
  0xc8   : > { %v1015_v63 = vpop.f32.mrf.mxu2  ;;  %v840_v5 = vpop.f32.mrf.mxu0 }
  0xc9   : > { %v1104_v1 = vpop.f32.mrf.mxu3  ;;  %v1016_v4 = vadd.f32 %v1015_v63, %v927_v62  ;;  %v929_v6 = vpop.f32.mrf.mxu1  ;;  %v841_v9 = vadd.f32 %v2070_v0, %v840_v5  ;;  %v1502_v62 = vor.u32 %v1744_v52, %v1501_v51  ;;  %v1506_v63 = vor.u32 %v1742_v53, %v1503_v54  ;;  %v1535_v51 = vld [vmem:[%s1983_s20 + $0x1d0] sm:$0xf0]  ;;  %v1541_v52 = vld [vmem:[%s1983_s20 + $0x1c8] sm:$0xf]  ;;  %v1753_v53 = vld [vmem:[%s1983_s20 + $0x1d4] sm:$0xf0] }
  0xca   : > { %v1514_v5 = vor.u32 %v1743_v57, %v1511_v58  ;;  %v1751_v54 = vld [vmem:[%s1983_s20 + $0x1cc] sm:$0xf] }
  0xcb   : > { %v1804_v10 = vpop.eup %1803  ;;  %v1105_v11 = vadd.f32 %v1104_v1, %v1016_v4  ;;  %879 = vmatmul.bf16.gmra.mxu0 %v1470_v2  ;;  %v930_v12 = vadd.f32 %v929_v6, %v841_v9  ;;  %v1510_v4 = vor.u32 %v1745_v56, %v1509_v55  ;;  %v1543_v55 = vld [vmem:[%s1983_s20 + $0x1d8] sm:$0xf0] }
  0xcc   : > { %1211 = vst [vmem:[%s2094_s10 + $0x10] sm:$0xff] %v1804_v10  ;;  %968 = vmatmul.bf16.gmra.mxu1 %v1474_v3 }
  0xcd   : > { %1805 = vtanh.f32 %v1105_v11  ;;  %1057 = vmatmul.bf16.gmra.mxu2 %v1478_v7 }
  0xce   : > { %1146 = vmatmul.bf16.gmra.mxu3 %v1482_v8 }
  0xd0   : > { %v1018_v13 = vpop.f32.mrf.mxu2  ;;  %v842_v16 = vpop.f32.mrf.mxu0 }
  0xd1   : > { %v1107_v14 = vpop.f32.mrf.mxu3  ;;  %v1019_v15 = vadd.f32 %v1018_v13, %v930_v12  ;;  %v931_v17 = vpop.f32.mrf.mxu1  ;;  %v843_v20 = vadd.f32 %v2070_v0, %v842_v16 }
  0xd3   : > { %v1806_v18 = vpop.eup %1805  ;;  %v1108_v19 = vadd.f32 %v1107_v14, %v1019_v15  ;;  %v932_v29 = vadd.f32 %v931_v17, %v843_v20  ;;  %v1746_v20 = vld [vmem:[%s1983_s20 + $0x1a4] sm:$0xf] }
  0xd4   : > { %1212 = vst [vmem:[%s2094_s10 + $0x18] sm:$0xff] %v1806_v18  ;;  %v1517_v18 = vld [vmem:[%s1983_s20 + $0x1a0] sm:$0xf] }
  0xd5   : > { %1807 = vtanh.f32 %v1108_v19  ;;  %v1748_v19 = vld [vmem:[%s1983_s20 + $0x1ac] sm:$0xf0] }
  0xd8   : > { %v1020_v30 = vpop.f32.mrf.mxu2  ;;  %v845_v35 = vpop.f32.mrf.mxu0 }
  0xd9   : > { %v1109_v31 = vpop.f32.mrf.mxu3  ;;  %v1021_v34 = vadd.f32 %v1020_v30, %v932_v29  ;;  %v934_v36 = vpop.f32.mrf.mxu1  ;;  %v846_v39 = vadd.f32 %v2070_v0, %v845_v35  ;;  %v1518_v29 = vor.u32 %v1748_v19, %v1517_v18  ;;  %v1522_v30 = vor.u32 %v1746_v20, %v1519_v21  ;;  %v1551_v18 = vld [vmem:[%s1983_s20 + $0x1f0] sm:$0xf0]  ;;  %v1557_v19 = vld [vmem:[%s1983_s20 + $0x1e8] sm:$0xf]  ;;  %v1757_v20 = vld [vmem:[%s1983_s20 + $0x1f4] sm:$0xf0] }
  0xda   : > { %v1530_v35 = vor.u32 %v1747_v24, %v1527_v25  ;;  %v1755_v21 = vld [vmem:[%s1983_s20 + $0x1ec] sm:$0xf] }
  0xdb   : > { %v1808_v40 = vpop.eup %1807  ;;  %v1110_v41 = vadd.f32 %v1109_v31, %v1021_v34  ;;  %884 = vmatmul.bf16.gmra.mxu0 %v1486_v32  ;;  %v935_v42 = vadd.f32 %v934_v36, %v846_v39  ;;  %v1526_v34 = vor.u32 %v1749_v23, %v1525_v22  ;;  %v1559_v22 = vld [vmem:[%s1983_s20 + $0x1f8] sm:$0xf0] }
  0xdc   : > { %1213 = vst [vmem:[%s2094_s10 + $0x20] sm:$0xff] %v1808_v40  ;;  %973 = vmatmul.bf16.gmra.mxu1 %v1490_v33 }
  0xdd   : > { %1809 = vtanh.f32 %v1110_v41  ;;  %1062 = vmatmul.bf16.gmra.mxu2 %v1494_v37 }
  0xde   : > { %1151 = vmatmul.bf16.gmra.mxu3 %v1498_v38 }
  0xe0   : > { %v1023_v43 = vpop.f32.mrf.mxu2  ;;  %v847_v46 = vpop.f32.mrf.mxu0 }
  0xe1   : > { %v1112_v44 = vpop.f32.mrf.mxu3  ;;  %v1024_v45 = vadd.f32 %v1023_v43, %v935_v42  ;;  %v936_v47 = vpop.f32.mrf.mxu1  ;;  %v848_v50 = vadd.f32 %v2070_v0, %v847_v46 }
  0xe3   : > { %v1810_v48 = vpop.eup %1809  ;;  %v1113_v49 = vadd.f32 %v1112_v44, %v1024_v45  ;;  %v937_v59 = vadd.f32 %v936_v47, %v848_v50  ;;  %v1750_v50 = vld [vmem:[%s1983_s20 + $0x1c4] sm:$0xf] }
  0xe4   : > { %1214 = vst [vmem:[%s2094_s10 + $0x28] sm:$0xff] %v1810_v48  ;;  %v1533_v48 = vld [vmem:[%s1983_s20 + $0x1c0] sm:$0xf] }
  0xe5   : > { %1811 = vtanh.f32 %v1113_v49  ;;  %v1752_v49 = vld [vmem:[%s1983_s20 + $0x1cc] sm:$0xf0] }
  0xe8   : > { %v1025_v60 = vpop.f32.mrf.mxu2  ;;  %v850_v2 = vpop.f32.mrf.mxu0 }
  0xe9   : > { %v1114_v61 = vpop.f32.mrf.mxu3  ;;  %v1026_v1 = vadd.f32 %v1025_v60, %v937_v59  ;;  %v939_v3 = vpop.f32.mrf.mxu1  ;;  %v851_v6 = vadd.f32 %v2070_v0, %v850_v2  ;;  %v1534_v59 = vor.u32 %v1752_v49, %v1533_v48  ;;  %v1538_v60 = vor.u32 %v1750_v50, %v1535_v51 }
  0xea   : > { %v1546_v2 = vor.u32 %v1751_v54, %v1543_v55 }
  0xeb   : > { %v1812_v7 = vpop.eup %1811  ;;  %v1115_v8 = vadd.f32 %v1114_v61, %v1026_v1  ;;  %889 = vmatmul.bf16.gmra.mxu0 %v1502_v62  ;;  %v940_v9 = vadd.f32 %v939_v3, %v851_v6  ;;  %v1542_v1 = vor.u32 %v1753_v53, %v1541_v52 }
  0xec   : > { %1215 = vst [vmem:[%s2094_s10 + $0x30] sm:$0xff] %v1812_v7  ;;  %978 = vmatmul.bf16.gmra.mxu1 %v1506_v63 }
  0xed   : > { %1813 = vtanh.f32 %v1115_v8  ;;  %1067 = vmatmul.bf16.gmra.mxu2 %v1510_v4 }
  0xee   : > { %1156 = vmatmul.bf16.gmra.mxu3 %v1514_v5 }
  0xf0   : > { %v1028_v10 = vpop.f32.mrf.mxu2  ;;  %v852_v13 = vpop.f32.mrf.mxu0 }
  0xf1   : > { %v1117_v11 = vpop.f32.mrf.mxu3  ;;  %v1029_v12 = vadd.f32 %v1028_v10, %v940_v9  ;;  %v941_v14 = vpop.f32.mrf.mxu1  ;;  %v853_v17 = vadd.f32 %v2070_v0, %v852_v13 }
  0xf3   : > { %v1814_v15 = vpop.eup %1813  ;;  %v1118_v16 = vadd.f32 %v1117_v11, %v1029_v12  ;;  %v942_v26 = vadd.f32 %v941_v14, %v853_v17  ;;  %v1754_v17 = vld [vmem:[%s1983_s20 + $0x1e4] sm:$0xf] }
  0xf4   : > { %1216 = vst [vmem:[%s2094_s10 + $0x38] sm:$0xff] %v1814_v15  ;;  %v1549_v15 = vld [vmem:[%s1983_s20 + $0x1e0] sm:$0xf] }
  0xf5   : > { %1815 = vtanh.f32 %v1118_v16  ;;  %v1756_v16 = vld [vmem:[%s1983_s20 + $0x1ec] sm:$0xf0] }
  0xf8   : > { %v1030_v27 = vpop.f32.mrf.mxu2  ;;  %v855_v32 = vpop.f32.mrf.mxu0 }
  0xf9   : > { %v1119_v28 = vpop.f32.mrf.mxu3  ;;  %v1031_v31 = vadd.f32 %v1030_v27, %v942_v26  ;;  %v944_v33 = vpop.f32.mrf.mxu1  ;;  %v856_v36 = vadd.f32 %v2070_v0, %v855_v32  ;;  %v1550_v26 = vor.u32 %v1756_v16, %v1549_v15  ;;  %v1554_v27 = vor.u32 %v1754_v17, %v1551_v18 }
  0xfa   : > { %v1562_v32 = vor.u32 %v1755_v21, %v1559_v22 }
  0xfb   : > { %v1816_v37 = vpop.eup %1815  ;;  %v1120_v38 = vadd.f32 %v1119_v28, %v1031_v31  ;;  %894 = vmatmul.bf16.gmra.mxu0 %v1518_v29  ;;  %v945_v39 = vadd.f32 %v944_v33, %v856_v36  ;;  %v1558_v31 = vor.u32 %v1757_v20, %v1557_v19 }
  0xfc   : > { %1217 = vst [vmem:[%s2094_s10 + $0x40] sm:$0xff] %v1816_v37  ;;  %983 = vmatmul.bf16.gmra.mxu1 %v1522_v30 }
  0xfd   : > { %1817 = vtanh.f32 %v1120_v38  ;;  %1072 = vmatmul.bf16.gmra.mxu2 %v1526_v34 }
  0xfe   : > { %1161 = vmatmul.bf16.gmra.mxu3 %v1530_v35 }
 0x100   : > { %v1033_v40 = vpop.f32.mrf.mxu2  ;;  %v857_v43 = vpop.f32.mrf.mxu0 }
 0x101   : > { %v1122_v41 = vpop.f32.mrf.mxu3  ;;  %v1034_v42 = vadd.f32 %v1033_v40, %v945_v39  ;;  %v946_v44 = vpop.f32.mrf.mxu1  ;;  %v858_v47 = vadd.f32 %v2070_v0, %v857_v43 }
 0x103   : > { %v1818_v45 = vpop.eup %1817  ;;  %v1123_v46 = vadd.f32 %v1122_v41, %v1034_v42  ;;  %v947_v56 = vadd.f32 %v946_v44, %v858_v47 }
 0x104   : > { %1218 = vst [vmem:[%s2094_s10 + $0x48] sm:$0xff] %v1818_v45 }
 0x105   : > { %1819 = vtanh.f32 %v1123_v46 }
 0x108   : > { %v1035_v57 = vpop.f32.mrf.mxu2  ;;  %v860_v62 = vpop.f32.mrf.mxu0 }
 0x109   : > { %v1124_v58 = vpop.f32.mrf.mxu3  ;;  %v1036_v61 = vadd.f32 %v1035_v57, %v947_v56  ;;  %v949_v63 = vpop.f32.mrf.mxu1  ;;  %v861_v3 = vadd.f32 %v2070_v0, %v860_v62 }
 0x10b   : > { %v1820_v4 = vpop.eup %1819  ;;  %v1125_v5 = vadd.f32 %v1124_v58, %v1036_v61  ;;  %899 = vmatmul.bf16.gmra.mxu0 %v1534_v59  ;;  %v950_v6 = vadd.f32 %v949_v63, %v861_v3 }
 0x10c   : > { %1219 = vst [vmem:[%s2094_s10 + $0x50] sm:$0xff] %v1820_v4  ;;  %988 = vmatmul.bf16.gmra.mxu1 %v1538_v60 }
 0x10d   : > { %1821 = vtanh.f32 %v1125_v5  ;;  %1077 = vmatmul.bf16.gmra.mxu2 %v1542_v1 }
 0x10e   : > { %1166 = vmatmul.bf16.gmra.mxu3 %v1546_v2 }
 0x110   : > { %v1038_v7 = vpop.f32.mrf.mxu2  ;;  %v862_v10 = vpop.f32.mrf.mxu0 }
 0x111   : > { %v1127_v8 = vpop.f32.mrf.mxu3  ;;  %v1039_v9 = vadd.f32 %v1038_v7, %v950_v6  ;;  %v951_v11 = vpop.f32.mrf.mxu1  ;;  %v863_v14 = vadd.f32 %v2070_v0, %v862_v10 }
 0x113   : > { %v1822_v12 = vpop.eup %1821  ;;  %v1128_v13 = vadd.f32 %v1127_v8, %v1039_v9  ;;  %v952_v23 = vadd.f32 %v951_v11, %v863_v14 }
 0x114   : > { %1220 = vst [vmem:[%s2094_s10 + $0x58] sm:$0xff] %v1822_v12 }
 0x115   : > { %1823 = vtanh.f32 %v1128_v13 }
 0x118   : > { %v1040_v24 = vpop.f32.mrf.mxu2  ;;  %v865_v29 = vpop.f32.mrf.mxu0 }
 0x119   : > { %v1129_v25 = vpop.f32.mrf.mxu3  ;;  %v1041_v28 = vadd.f32 %v1040_v24, %v952_v23  ;;  %v954_v30 = vpop.f32.mrf.mxu1  ;;  %v866_v33 = vadd.f32 %v2070_v0, %v865_v29 }
 0x11b   : > { %v1824_v34 = vpop.eup %1823  ;;  %v1130_v35 = vadd.f32 %v1129_v25, %v1041_v28  ;;  %904 = vmatmul.bf16.gmra.mxu0 %v1550_v26  ;;  %v955_v36 = vadd.f32 %v954_v30, %v866_v33 }
 0x11c   : > { %1221 = vst [vmem:[%s2094_s10 + $0x60] sm:$0xff] %v1824_v34  ;;  %993 = vmatmul.bf16.gmra.mxu1 %v1554_v27 }
 0x11d   : > { %1825 = vtanh.f32 %v1130_v35  ;;  %1082 = vmatmul.bf16.gmra.mxu2 %v1558_v31 }
 0x11e   : > { %1171 = vmatmul.bf16.gmra.mxu3 %v1562_v32 }
 0x120   : > { %v1043_v37 = vpop.f32.mrf.mxu2  ;;  %v867_v40 = vpop.f32.mrf.mxu0 }
 0x121   : > { %v1132_v38 = vpop.f32.mrf.mxu3  ;;  %v1044_v39 = vadd.f32 %v1043_v37, %v955_v36  ;;  %v956_v41 = vpop.f32.mrf.mxu1  ;;  %v868_v44 = vadd.f32 %v2070_v0, %v867_v40 }
 0x123   : > { %v1826_v42 = vpop.eup %1825  ;;  %v1133_v43 = vadd.f32 %v1132_v38, %v1044_v39  ;;  %v957_v45 = vadd.f32 %v956_v41, %v868_v44 }
 0x124   : > { %1222 = vst [vmem:[%s2094_s10 + $0x68] sm:$0xff] %v1826_v42 }
 0x125   : > { %1827 = vtanh.f32 %v1133_v43 }
 0x128   : > { %v1045_v46 = vpop.f32.mrf.mxu2  ;;  %v870_v49 = vpop.f32.mrf.mxu0 }
 0x129   : > { %v1134_v47 = vpop.f32.mrf.mxu3  ;;  %v1046_v48 = vadd.f32 %v1045_v46, %v957_v45  ;;  %v959_v50 = vpop.f32.mrf.mxu1  ;;  %v871_v51 = vadd.f32 %v2070_v0, %v870_v49 }
 0x12b   : > { %v1828_v52 = vpop.eup %1827  ;;  %v1135_v53 = vadd.f32 %v1134_v47, %v1046_v48  ;;  %v960_v54 = vadd.f32 %v959_v50, %v871_v51 }
 0x12c   : > { %1223 = vst [vmem:[%s2094_s10 + $0x70] sm:$0xff] %v1828_v52 }
 0x12d   : > { %1829 = vtanh.f32 %v1135_v53 }
 0x130   : > { %v1048_v55 = vpop.f32.mrf.mxu2  ;;  %v872_v58 = vpop.f32.mrf.mxu0 }
 0x131   : > { %v1137_v56 = vpop.f32.mrf.mxu3  ;;  %v1049_v57 = vadd.f32 %v1048_v55, %v960_v54  ;;  %v961_v59 = vpop.f32.mrf.mxu1  ;;  %v873_v62 = vadd.f32 %v2070_v0, %v872_v58 }
 0x133   : > { %v1830_v60 = vpop.eup %1829  ;;  %v1138_v61 = vadd.f32 %v1137_v56, %v1049_v57  ;;  %v962_v63 = vadd.f32 %v961_v59, %v873_v62 }
 0x134   : > { %1224 = vst [vmem:[%s2094_s10 + $0x78] sm:$0xff] %v1830_v60 }
 0x135   : > { %1831 = vtanh.f32 %v1138_v61 }
 0x138   : > { %v1050_v1 = vpop.f32.mrf.mxu2  ;;  %v875_v4 = vpop.f32.mrf.mxu0 }
 0x139   : > { %v1139_v2 = vpop.f32.mrf.mxu3  ;;  %v1051_v3 = vadd.f32 %v1050_v1, %v962_v63  ;;  %v964_v5 = vpop.f32.mrf.mxu1  ;;  %v876_v6 = vadd.f32 %v2070_v0, %v875_v4 }
 0x13b   : > { %v1832_v7 = vpop.eup %1831  ;;  %v1140_v8 = vadd.f32 %v1139_v2, %v1051_v3  ;;  %v965_v9 = vadd.f32 %v964_v5, %v876_v6 }
 0x13c   : > { %1225 = vst [vmem:[%s2094_s10 + $0x80] sm:$0xff] %v1832_v7 }
 0x13d   : > { %1833 = vtanh.f32 %v1140_v8 }
 0x140   : > { %v1053_v10 = vpop.f32.mrf.mxu2  ;;  %v877_v13 = vpop.f32.mrf.mxu0 }
 0x141   : > { %v1142_v11 = vpop.f32.mrf.mxu3  ;;  %v1054_v12 = vadd.f32 %v1053_v10, %v965_v9  ;;  %v966_v14 = vpop.f32.mrf.mxu1  ;;  %v878_v17 = vadd.f32 %v2070_v0, %v877_v13 }
 0x143   : > { %v1834_v15 = vpop.eup %1833  ;;  %v1143_v16 = vadd.f32 %v1142_v11, %v1054_v12  ;;  %v967_v18 = vadd.f32 %v966_v14, %v878_v17 }
 0x144   : > { %1226 = vst [vmem:[%s2094_s10 + $0x88] sm:$0xff] %v1834_v15 }
 0x145   : > { %1835 = vtanh.f32 %v1143_v16 }
 0x148   : > { %v1055_v19 = vpop.f32.mrf.mxu2  ;;  %v880_v22 = vpop.f32.mrf.mxu0 }
 0x149   : > { %v1144_v20 = vpop.f32.mrf.mxu3  ;;  %v1056_v21 = vadd.f32 %v1055_v19, %v967_v18  ;;  %v969_v23 = vpop.f32.mrf.mxu1  ;;  %v881_v24 = vadd.f32 %v2070_v0, %v880_v22 }
 0x14b   : > { %v1836_v25 = vpop.eup %1835  ;;  %v1145_v26 = vadd.f32 %v1144_v20, %v1056_v21  ;;  %v970_v27 = vadd.f32 %v969_v23, %v881_v24 }
 0x14c   : > { %1227 = vst [vmem:[%s2094_s10 + $0x90] sm:$0xff] %v1836_v25 }
 0x14d   : > { %1837 = vtanh.f32 %v1145_v26 }
 0x150   : > { %v1058_v28 = vpop.f32.mrf.mxu2  ;;  %v882_v31 = vpop.f32.mrf.mxu0 }
 0x151   : > { %v1147_v29 = vpop.f32.mrf.mxu3  ;;  %v1059_v30 = vadd.f32 %v1058_v28, %v970_v27  ;;  %v971_v32 = vpop.f32.mrf.mxu1  ;;  %v883_v35 = vadd.f32 %v2070_v0, %v882_v31 }
 0x153   : > { %v1838_v33 = vpop.eup %1837  ;;  %v1148_v34 = vadd.f32 %v1147_v29, %v1059_v30  ;;  %v972_v36 = vadd.f32 %v971_v32, %v883_v35 }
 0x154   : > { %1228 = vst [vmem:[%s2094_s10 + $0x98] sm:$0xff] %v1838_v33 }
 0x155   : > { %1839 = vtanh.f32 %v1148_v34 }
 0x158   : > { %v1060_v37 = vpop.f32.mrf.mxu2  ;;  %v885_v40 = vpop.f32.mrf.mxu0 }
 0x159   : > { %v1149_v38 = vpop.f32.mrf.mxu3  ;;  %v1061_v39 = vadd.f32 %v1060_v37, %v972_v36  ;;  %v974_v41 = vpop.f32.mrf.mxu1  ;;  %v886_v42 = vadd.f32 %v2070_v0, %v885_v40 }
 0x15b   : > { %v1840_v43 = vpop.eup %1839  ;;  %v1150_v44 = vadd.f32 %v1149_v38, %v1061_v39  ;;  %v975_v45 = vadd.f32 %v974_v41, %v886_v42 }
 0x15c   : > { %1229 = vst [vmem:[%s2094_s10 + $0xa0] sm:$0xff] %v1840_v43 }
 0x15d   : > { %1841 = vtanh.f32 %v1150_v44 }
 0x160   : > { %v1063_v46 = vpop.f32.mrf.mxu2  ;;  %v887_v49 = vpop.f32.mrf.mxu0 }
 0x161   : > { %v1152_v47 = vpop.f32.mrf.mxu3  ;;  %v1064_v48 = vadd.f32 %v1063_v46, %v975_v45  ;;  %v976_v50 = vpop.f32.mrf.mxu1  ;;  %v888_v53 = vadd.f32 %v2070_v0, %v887_v49 }
 0x163   : > { %v1842_v51 = vpop.eup %1841  ;;  %v1153_v52 = vadd.f32 %v1152_v47, %v1064_v48  ;;  %v977_v54 = vadd.f32 %v976_v50, %v888_v53 }
 0x164   : > { %1230 = vst [vmem:[%s2094_s10 + $0xa8] sm:$0xff] %v1842_v51 }
 0x165   : > { %1843 = vtanh.f32 %v1153_v52 }
 0x168   : > { %v1065_v55 = vpop.f32.mrf.mxu2  ;;  %v890_v58 = vpop.f32.mrf.mxu0 }
 0x169   : > { %v1154_v56 = vpop.f32.mrf.mxu3  ;;  %v1066_v57 = vadd.f32 %v1065_v55, %v977_v54  ;;  %v979_v59 = vpop.f32.mrf.mxu1  ;;  %v891_v60 = vadd.f32 %v2070_v0, %v890_v58 }
 0x16b   : > { %v1844_v61 = vpop.eup %1843  ;;  %v1155_v62 = vadd.f32 %v1154_v56, %v1066_v57  ;;  %v980_v63 = vadd.f32 %v979_v59, %v891_v60 }
 0x16c   : > { %1231 = vst [vmem:[%s2094_s10 + $0xb0] sm:$0xff] %v1844_v61 }
 0x16d   : > { %1845 = vtanh.f32 %v1155_v62 }
 0x170   : > { %v1068_v1 = vpop.f32.mrf.mxu2  ;;  %v892_v4 = vpop.f32.mrf.mxu0 }
 0x171   : > { %v1157_v2 = vpop.f32.mrf.mxu3  ;;  %v1069_v3 = vadd.f32 %v1068_v1, %v980_v63  ;;  %v981_v5 = vpop.f32.mrf.mxu1  ;;  %v893_v8 = vadd.f32 %v2070_v0, %v892_v4 }
 0x173   : > { %v1846_v6 = vpop.eup %1845  ;;  %v1158_v7 = vadd.f32 %v1157_v2, %v1069_v3  ;;  %v982_v9 = vadd.f32 %v981_v5, %v893_v8 }
 0x174   : > { %1232 = vst [vmem:[%s2094_s10 + $0xb8] sm:$0xff] %v1846_v6 }
 0x175   : > { %1847 = vtanh.f32 %v1158_v7 }
 0x178   : > { %v1070_v10 = vpop.f32.mrf.mxu2  ;;  %v895_v13 = vpop.f32.mrf.mxu0 }
 0x179   : > { %v1159_v11 = vpop.f32.mrf.mxu3  ;;  %v1071_v12 = vadd.f32 %v1070_v10, %v982_v9  ;;  %v984_v14 = vpop.f32.mrf.mxu1  ;;  %v896_v15 = vadd.f32 %v2070_v0, %v895_v13 }
 0x17b   : > { %v1848_v16 = vpop.eup %1847  ;;  %v1160_v17 = vadd.f32 %v1159_v11, %v1071_v12  ;;  %v985_v18 = vadd.f32 %v984_v14, %v896_v15 }
 0x17c   : > { %1233 = vst [vmem:[%s2094_s10 + $0xc0] sm:$0xff] %v1848_v16 }
 0x17d   : > { %1849 = vtanh.f32 %v1160_v17 }
 0x180   : > { %v1073_v19 = vpop.f32.mrf.mxu2  ;;  %v897_v22 = vpop.f32.mrf.mxu0 }
 0x181   : > { %v1162_v20 = vpop.f32.mrf.mxu3  ;;  %v1074_v21 = vadd.f32 %v1073_v19, %v985_v18  ;;  %v986_v23 = vpop.f32.mrf.mxu1  ;;  %v898_v26 = vadd.f32 %v2070_v0, %v897_v22 }
 0x183   : > { %v1850_v24 = vpop.eup %1849  ;;  %v1163_v25 = vadd.f32 %v1162_v20, %v1074_v21  ;;  %v987_v27 = vadd.f32 %v986_v23, %v898_v26 }
 0x184   : > { %1234 = vst [vmem:[%s2094_s10 + $0xc8] sm:$0xff] %v1850_v24 }
 0x185   : > { %1851 = vtanh.f32 %v1163_v25 }
 0x188   : > { %v1075_v28 = vpop.f32.mrf.mxu2  ;;  %v900_v31 = vpop.f32.mrf.mxu0 }
 0x189   : > { %v1164_v29 = vpop.f32.mrf.mxu3  ;;  %v1076_v30 = vadd.f32 %v1075_v28, %v987_v27  ;;  %v989_v32 = vpop.f32.mrf.mxu1  ;;  %v901_v33 = vadd.f32 %v2070_v0, %v900_v31 }
 0x18b   : > { %v1852_v34 = vpop.eup %1851  ;;  %v1165_v35 = vadd.f32 %v1164_v29, %v1076_v30  ;;  %v990_v36 = vadd.f32 %v989_v32, %v901_v33 }
 0x18c   : > { %1235 = vst [vmem:[%s2094_s10 + $0xd0] sm:$0xff] %v1852_v34 }
 0x18d   : > { %1853 = vtanh.f32 %v1165_v35 }
 0x190   : > { %v1078_v37 = vpop.f32.mrf.mxu2  ;;  %v902_v40 = vpop.f32.mrf.mxu0 }
 0x191   : > { %v1167_v38 = vpop.f32.mrf.mxu3  ;;  %v1079_v39 = vadd.f32 %v1078_v37, %v990_v36  ;;  %v991_v41 = vpop.f32.mrf.mxu1  ;;  %v903_v44 = vadd.f32 %v2070_v0, %v902_v40 }
 0x193   : > { %v1854_v42 = vpop.eup %1853  ;;  %v1168_v43 = vadd.f32 %v1167_v38, %v1079_v39  ;;  %v992_v45 = vadd.f32 %v991_v41, %v903_v44 }
 0x194   : > { %1236 = vst [vmem:[%s2094_s10 + $0xd8] sm:$0xff] %v1854_v42 }
 0x195   : > { %1855 = vtanh.f32 %v1168_v43 }
 0x198   : > { %v1080_v46 = vpop.f32.mrf.mxu2  ;;  %v905_v49 = vpop.f32.mrf.mxu0 }
 0x199   : > { %v1169_v47 = vpop.f32.mrf.mxu3  ;;  %v1081_v48 = vadd.f32 %v1080_v46, %v992_v45  ;;  %v906_v50 = vadd.f32 %v2070_v0, %v905_v49  ;;  %v994_v53 = vpop.f32.mrf.mxu1 }
 0x19b   : > { %v1856_v51 = vpop.eup %1855  ;;  %v1170_v52 = vadd.f32 %v1169_v47, %v1081_v48  ;;  %v995_v54 = vadd.f32 %v994_v53, %v906_v50 }
 0x19c   : > { %1237 = vst [vmem:[%s2094_s10 + $0xe0] sm:$0xff] %v1856_v51 }
 0x19d   : > { %1857 = vtanh.f32 %v1170_v52 }
 0x1a0   : > { %v1083_v55 = vpop.f32.mrf.mxu2  ;;  %v907_v58 = vpop.f32.mrf.mxu0 }
 0x1a1   : > { %v1172_v56 = vpop.f32.mrf.mxu3  ;;  %v1084_v57 = vadd.f32 %v1083_v55, %v995_v54  ;;  %v908_v61 = vadd.f32 %v2070_v0, %v907_v58  ;;  %v996_v62 = vpop.f32.mrf.mxu1 }
 0x1a3   : > { %v1858_v59 = vpop.eup %1857  ;;  %v1173_v60 = vadd.f32 %v1172_v56, %v1084_v57  ;;  %v997_v63 = vadd.f32 %v996_v62, %v908_v61 }
 0x1a4   : > { %1238 = vst [vmem:[%s2094_s10 + $0xe8] sm:$0xff] %v1858_v59 }
 0x1a5   : > { %1859 = vtanh.f32 %v1173_v60 }
 0x1a8   : > { %v1085_v1 = vpop.f32.mrf.mxu2 }
 0x1a9   : > { %v1086_v2 = vadd.f32 %v1085_v1, %v997_v63  ;;  %v1174_v3 = vpop.f32.mrf.mxu3 }
 0x1ab   : > { %v1860_v4 = vpop.eup %1859  ;;  %v1175_v5 = vadd.f32 %v1174_v3, %v1086_v2 }
 0x1ac   : > { %1239 = vst [vmem:[%s2094_s10 + $0xf0] sm:$0xff] %v1860_v4 }
 0x1ad   : > { %1861 = vtanh.f32 %v1175_v5 }
 0x1b3   : > { %v1862_v6 = vpop.eup %1861 }
 0x1b4   : > { %1240 = vst [vmem:[%s2094_s10 + $0xf8] sm:$0xff] %v1862_v6 }
 0x1b5 PF: > { %s13_s12 = sadd.s32 1, %s1869_s12  }
 0x1b6   : > { %p10_p4 = scmp.ge.s32.totalorder %s13_s12, 4  }
 0x1b8   :  { %12 = sbr.rel (!%p10_p4) target bundleno = 1 (0x1), region = 62 }

</bundles_post_ra>
